<compile_context>
chip_gen: v7x
topology: tpu7x:2x2x1
jax: 0.10.0
libtpu: 0.0.40
codegen_flags: <defaults>
</compile_context>

<pallas_src>
import functools
import math

import jax
import jax.numpy as jnp
from jax import lax
from jax.experimental import pallas as pl
from jax.experimental.pallas import tpu as pltpu

# ----------------------------- config (scaled-down) -----------------------------
BATCH = 2
IN_CH = 3
IMG = 64            # scaled-down ImageNet-style input (orig 224)
BASE_WIDTH = 8      # scaled-down ResNet34 base width (orig 64)
POOL_OUT = 4        # scaled-down AdaptiveMaxPool2d target (orig 2**5 = 32)
FC_HIDDEN = 64      # scaled-down first Linear width (orig 512)
BLOCK_COUNTS = (3, 4, 6, 3)  # exact ResNet34 block structure
BN_EPS = 1e-5

LANE = 128                  # TPU lane width: weight-N / packed-K padding target
ACT_DTYPE = jnp.bfloat16    # activation & weight storage / MXU input dtype
VMEM_LIMIT = 32 * 1024 * 1024


def _ceil_mul(x, m):
    return ((x + m - 1) // m) * m


def _conv_out(h, k, s, p):
    return (h + 2 * p - k) // s + 1


# ----------------------------- Pallas kernels -----------------------------------
def _apply_relu_cols(out, relu_cols):
    """ReLU only the first `relu_cols` output columns (None/0 = none, >=N = all)."""
    n = out.shape[-1]
    if not relu_cols:
        return out
    if relu_cols >= n:
        return jnp.maximum(out, 0.0)
    col = lax.broadcasted_iota(jnp.int32, out.shape, out.ndim - 1)
    return jnp.where(col < relu_cols, jnp.maximum(out, 0.0), out)


def _mm_kernel(a_ref, b_ref, bias_ref, o_ref, *, relu_cols):
    """out = relu_cols(A @ B + bias); single K block, f32 accumulate, f32 epilogue."""
    acc = jnp.dot(a_ref[...], b_ref[...], preferred_element_type=jnp.float32)
    o_ref[...] = _apply_relu_cols(acc + bias_ref[...], relu_cols).astype(o_ref.dtype)


def _mm_res_kernel(a_ref, b_ref, bias_ref, res_ref, o_ref, *, relu_cols):
    """out = relu_cols(A @ B + bias + residual); residual add fused in the epilogue."""
    acc = jnp.dot(a_ref[...], b_ref[...], preferred_element_type=jnp.float32)
    acc = acc + bias_ref[...] + res_ref[...].astype(jnp.float32)
    o_ref[...] = _apply_relu_cols(acc, relu_cols).astype(o_ref.dtype)


def _head_kernel(x_ref, w1_ref, b1_ref, w2_ref, b2_ref, w3_ref, b3_ref, o_ref):
    """Fused FC head: relu(x@W1+b1) -> relu(.@W2+b2) -> .@W3+b3.
    BatchNorm1d affines and the AdaptiveMaxPool+NCHW-flatten gather are pre-folded
    into W1/W2/b1/b2 at prepare time."""
    h = jnp.dot(x_ref[...], w1_ref[...], preferred_element_type=jnp.float32)
    h = jnp.maximum(h + b1_ref[...], 0.0)
    h = jnp.dot(h.astype(ACT_DTYPE), w2_ref[...], preferred_element_type=jnp.float32)
    h = jnp.maximum(h + b2_ref[...], 0.0)
    h = jnp.dot(h.astype(ACT_DTYPE), w3_ref[...], preferred_element_type=jnp.float32)
    o_ref[...] = (h + b3_ref[...]).astype(o_ref.dtype)


def _pick_tm(M):
    """Largest row tile that keeps grid >= 2 (both v7x TensorCores busy)."""
    if M < 16:
        return M                      # tiny M: single full-M block (full-dim exception)
    for tm in (512, 256, 128, 64, 32, 16, 8):
        if M % tm == 0 and M // tm >= 2:
            return tm
    return M


def matmul_bias_act(a, b, bias2d, residual=None, relu_cols=None, use_pallas=True):
    """out = relu_cols(a @ b + bias [+ residual]).

    a: (M, K) bf16 with K % 128 == 0, b: (K, Np) bf16 with Np % 128 == 0,
    bias2d: (1, Np) f32, residual: (M, Np) bf16 or None.  Returns (M, Np) bf16.
    """
    M, K = a.shape
    Kb, Np = b.shape
    assert K == Kb and K % LANE == 0 and Np % LANE == 0

    if not use_pallas:  # pure-JAX reference path with identical numerics
        out = jnp.dot(a, b, preferred_element_type=jnp.float32) + bias2d
        if residual is not None:
            out = out + residual.astype(jnp.float32)
        return _apply_relu_cols(out, relu_cols).astype(ACT_DTYPE)

    tm = _pick_tm(M)
    in_specs = [
        pl.BlockSpec((tm, K), lambda i: (i, 0)),   # A: tiled over rows
        pl.BlockSpec((K, Np), lambda i: (0, 0)),   # B: resident across the grid
        pl.BlockSpec((1, Np), lambda i: (0, 0)),   # bias: resident
    ]
    operands = [a, b, bias2d]
    if residual is not None:
        in_specs.append(pl.BlockSpec((tm, Np), lambda i: (i, 0)))
        operands.append(residual)
        kernel = functools.partial(_mm_res_kernel, relu_cols=relu_cols)
    else:
        kernel = functools.partial(_mm_kernel, relu_cols=relu_cols)

    return pl.pallas_call(
        kernel,
        out_shape=jax.ShapeDtypeStruct((M, Np), ACT_DTYPE),
        grid=(M // tm,),
        in_specs=in_specs,
        out_specs=pl.BlockSpec((tm, Np), lambda i: (i, 0)),
        compiler_params=pltpu.CompilerParams(
            dimension_semantics=("parallel",),      # rows split across TCs (v7x)
            vmem_limit_bytes=VMEM_LIMIT),
    )(*operands)


def head_forward(hp, x, use_pallas=True):
    """Fused FC head (fc1+ReLU -> fc2+ReLU -> fc3) in ONE pallas_call."""
    if not use_pallas:  # reference path with identical casts
        h = jnp.dot(x, hp['w1'], preferred_element_type=jnp.float32) + hp['b1']
        h = jnp.maximum(h, 0.0)
        h = jnp.dot(h.astype(ACT_DTYPE), hp['w2'],
                    preferred_element_type=jnp.float32) + hp['b2']
        h = jnp.maximum(h, 0.0)
        h = jnp.dot(h.astype(ACT_DTYPE), hp['w3'],
                    preferred_element_type=jnp.float32) + hp['b3']
        return h[:, 0]

    M, K1 = x.shape
    out = pl.pallas_call(
        _head_kernel,
        out_shape=jax.ShapeDtypeStruct((M, LANE), jnp.float32),
        grid=(1,),
        in_specs=[
            pl.BlockSpec((M, K1), lambda i: (0, 0)),
            pl.BlockSpec((K1, LANE), lambda i: (0, 0)),
            pl.BlockSpec((1, LANE), lambda i: (0, 0)),
            pl.BlockSpec((LANE, LANE), lambda i: (0, 0)),
            pl.BlockSpec((1, LANE), lambda i: (0, 0)),
            pl.BlockSpec((LANE, LANE), lambda i: (0, 0)),
            pl.BlockSpec((1, LANE), lambda i: (0, 0)),
        ],
        out_specs=pl.BlockSpec((M, LANE), lambda i: (0, 0)),
        compiler_params=pltpu.CompilerParams(
            dimension_semantics=("arbitrary",),
            vmem_limit_bytes=VMEM_LIMIT),
    )(x, hp['w1'], hp['b1'], hp['w2'], hp['b2'], hp['w3'], hp['b3'])
    return out[:, 0]


# ----------------------------- conv / pooling glue -------------------------------
def im2col(x_nhwc, kh, kw, stride, pad, k_pad):
    """Packed-K patches: (M, kh*kw*C_true) padded once to k_pad (tap-major,
    channel-minor -- matches the weight packing in fold_conv_bn)."""
    # TODO(synk): fuse the kh*kw tap accumulation into the matmul kernel (in-kernel
    # im2col over a VMEM-resident input tile) to avoid materializing patches in HBM.
    N, H, W, C = x_nhwc.shape
    xp = jnp.pad(x_nhwc, ((0, 0), (pad, pad), (pad, pad), (0, 0)))
    Ho = (H + 2 * pad - kh) // stride + 1
    Wo = (W + 2 * pad - kw) // stride + 1
    cols = []
    for i in range(kh):
        for j in range(kw):
            cols.append(xp[:, i:i + stride * Ho:stride, j:j + stride * Wo:stride, :])
    patches = jnp.stack(cols, axis=-2).reshape(N * Ho * Wo, kh * kw * C)
    if k_pad > kh * kw * C:
        patches = jnp.pad(patches, ((0, 0), (0, k_pad - kh * kw * C)))
    return patches, (N, Ho, Wo)


def maxpool_3x3_s2(x_nhwc):
    # TODO(synk): 3x3/s2 max pool stays in XLA (reduce_window), not in-kernel.
    neg_inf = jnp.array(-jnp.inf, dtype=x_nhwc.dtype)
    return lax.reduce_window(x_nhwc, neg_inf, lax.max,
                             window_dimensions=(1, 3, 3, 1),
                             window_strides=(1, 2, 2, 1),
                             padding=((0, 0), (1, 1), (1, 1), (0, 0)))


def _adaptive_pool_windows(in_size, out_size):
    starts = [(i * in_size) // out_size for i in range(out_size)]
    ends = [-(-((i + 1) * in_size) // out_size) for i in range(out_size)]
    return starts, ends


def adaptive_max_pool(x_nhwc, out_hw):
    """General AdaptiveMaxPool2d fallback (only used when windows hold >1 element)."""
    N, H, W, C = x_nhwc.shape
    Ho, Wo = out_hw
    hs, he = _adaptive_pool_windows(H, Ho)
    ws, we = _adaptive_pool_windows(W, Wo)
    rows = []
    for i in range(Ho):
        cols = []
        for j in range(Wo):
            cols.append(jnp.max(x_nhwc[:, hs[i]:he[i], ws[j]:we[j], :], axis=(1, 2)))
        rows.append(jnp.stack(cols, axis=1))
    return jnp.stack(rows, axis=1)                      # (N, Ho, Wo, C)


# ----------------------------- parameter init ------------------------------------
def init_conv(key, cout, cin, kh, kw):
    fan_in = cin * kh * kw
    return jax.random.normal(key, (cout, cin, kh, kw), jnp.float32) / math.sqrt(fan_in)


def init_bn(key, c):
    k1, k2, k3, k4 = jax.random.split(key, 4)
    return dict(gamma=1.0 + 0.1 * jax.random.normal(k1, (c,), jnp.float32),
                beta=0.1 * jax.random.normal(k2, (c,), jnp.float32),
                mean=0.1 * jax.random.normal(k3, (c,), jnp.float32),
                var=1.0 + 0.1 * jax.random.uniform(k4, (c,), jnp.float32))


def init_linear(key, cin, cout):
    k1, k2 = jax.random.split(key)
    bound = 1.0 / math.sqrt(cin)
    return dict(w=jax.random.uniform(k1, (cout, cin), jnp.float32, -bound, bound),
                b=jax.random.uniform(k2, (cout,), jnp.float32, -bound, bound))


def init_params(key):
    keys = iter(jax.random.split(key, 512))
    widths = [BASE_WIDTH, BASE_WIDTH * 2, BASE_WIDTH * 4, BASE_WIDTH * 8]
    params = {'conv1_w': init_conv(next(keys), BASE_WIDTH, IN_CH, 7, 7),
              'bn1': init_bn(next(keys), BASE_WIDTH)}
    layers = []
    in_c = BASE_WIDTH
    for li, (nblocks, c) in enumerate(zip(BLOCK_COUNTS, widths)):
        blocks = []
        for bi in range(nblocks):
            stride = 2 if (bi == 0 and li > 0) else 1
            p = {'conv1_w': init_conv(next(keys), c, in_c, 3, 3),
                 'bn1': init_bn(next(keys), c),
                 'conv2_w': init_conv(next(keys), c, c, 3, 3),
                 'bn2': init_bn(next(keys), c)}
            if stride != 1 or in_c != c:
                p['down_w'] = init_conv(next(keys), c, in_c, 1, 1)
                p['down_bn'] = init_bn(next(keys), c)
            blocks.append(p)
            in_c = c
        layers.append(blocks)
    params['layers'] = layers
    feat = widths[-1] * POOL_OUT * POOL_OUT
    params['bn_flat'] = init_bn(next(keys), feat)       # BatchNorm1d(524288) analog
    params['fc1'] = init_linear(next(keys), feat, FC_HIDDEN)
    params['bn_fc'] = init_bn(next(keys), FC_HIDDEN)    # BatchNorm1d(512) analog
    params['fc2'] = init_linear(next(keys), FC_HIDDEN, 16)
    params['fc3'] = init_linear(next(keys), 16, 1)
    return params


# ----------------------------- one-time weight preparation ------------------------
def fold_conv_bn(conv_w, bn):
    """Fold eval-mode BatchNorm2d into the conv; return the PACKED-K matmul weight
    (kh*kw*true_cin, cout) f32 (tap-major, channel-minor -- matches im2col) + bias."""
    s = bn['gamma'] / jnp.sqrt(bn['var'] + BN_EPS)
    w = conv_w * s[:, None, None, None]                 # (cout, cin, kh, kw)
    bias = bn['beta'] - bn['mean'] * s                  # (cout,)
    cout, cin, kh, kw = conv_w.shape
    w_mm = jnp.transpose(w, (2, 3, 1, 0)).reshape(kh * kw * cin, cout)
    return w_mm, bias


def _pad_wb(w_mm, bias, k_pad, n_pad):
    """Pad K/N to lane-dense sizes once; cast weights to bf16 (MXU input dtype)."""
    w = jnp.pad(w_mm, ((0, k_pad - w_mm.shape[0]), (0, n_pad - w_mm.shape[1])))
    b = jnp.pad(bias, (0, n_pad - bias.shape[0]))
    return dict(w=w.astype(ACT_DTYPE), b=b.reshape(1, -1).astype(jnp.float32))


def prepare_head(params, h_f, w_f, c_f):
    """Fold both eval-mode BatchNorm1d affines into fc1/fc2, and (when every
    adaptive-pool window holds exactly one element) fold AdaptiveMaxPool +
    NCHW-order flatten into fc1's weight as a row-gather, so the head consumes
    the layer4 NHWC activation directly."""
    bnf = params['bn_flat']
    s1 = bnf['gamma'] / jnp.sqrt(bnf['var'] + BN_EPS)
    t1 = bnf['beta'] - bnf['mean'] * s1
    w1 = params['fc1']['w']                              # (FC_HIDDEN, feat)
    w1t = w1.T * s1[:, None]                             # (feat, FC_HIDDEN)
    b1 = params['fc1']['b'] + t1 @ w1.T

    bnh = params['bn_fc']
    s2 = bnh['gamma'] / jnp.sqrt(bnh['var'] + BN_EPS)
    t2 = bnh['beta'] - bnh['mean'] * s2
    w2 = params['fc2']['w']                              # (16, FC_HIDDEN)
    w2t = w2.T * s2[:, None]                             # (FC_HIDDEN, 16)
    b2 = params['fc2']['b'] + t2 @ w2.T

    w3t = params['fc3']['w'].T                           # (16, 1)
    b3 = params['fc3']['b']

    hs, he = _adaptive_pool_windows(h_f, POOL_OUT)
    ws, we = _adaptive_pool_windows(w_f, POOL_OUT)
    pool_folded = (all(e - s == 1 for s, e in zip(hs, he)) and
                   all(e - s == 1 for s, e in zip(ws, we)))
    if pool_folded:
        # pooled NCHW-flat feature f = c*Po*Po + i*Po + j reads layer4 NHWC element
        # g = hs[i]*(w_f*c_f) + ws[j]*c_f + c  (single-element window => pure gather),
        # so  feats_nhwc @ W1_folded == pooled_nchw_flat @ W1.
        g_of_f = []
        for c in range(c_f):
            for i in range(POOL_OUT):
                for j in range(POOL_OUT):
                    g_of_f.append(hs[i] * (w_f * c_f) + ws[j] * c_f + c)
        g_of_f = jnp.asarray(g_of_f, jnp.int32)
        w1t = jnp.zeros((h_f * w_f * c_f, FC_HIDDEN), jnp.float32).at[g_of_f].add(w1t)

    def padw(w, rpad, cpad):
        return jnp.pad(w, ((0, rpad - w.shape[0]),
                           (0, cpad - w.shape[1]))).astype(ACT_DTYPE)

    def padb(b, cpad):
        return jnp.pad(b, (0, cpad - b.shape[0])).reshape(1, -1).astype(jnp.float32)

    k1p = _ceil_mul(w1t.shape[0], LANE)
    return dict(pool_folded=pool_folded,
                w1=padw(w1t, k1p, LANE), b1=padb(b1, LANE),
                w2=padw(w2t, LANE, LANE), b2=padb(b2, LANE),
                w3=padw(w3t, LANE, LANE), b3=padb(b3, LANE))


def prepare_params(params):
    w, b = fold_conv_bn(params['conv1_w'], params['bn1'])          # stem K = 147
    ip = {'stem': _pad_wb(w, b, _ceil_mul(w.shape[0], LANE), LANE)}

    widths = [BASE_WIDTH, BASE_WIDTH * 2, BASE_WIDTH * 4, BASE_WIDTH * 8]
    in_c = BASE_WIDTH
    layers = []
    for li, blocks in enumerate(params['layers']):
        prepared = []
        for p in blocks:
            c = widths[li]
            w1, b1 = fold_conv_bn(p['conv1_w'], p['bn1'])          # K = 9 * in_c
            k1p = _ceil_mul(w1.shape[0], LANE)
            fused_down = 'down_w' in p
            if fused_down:
                # Place the folded 1x1 downsample on the center-tap rows of the 3x3
                # contraction and concatenate it as 128 extra N columns: conv1 and
                # downsample share one patch read and one MXU pass (N = 256).
                wd, bd = fold_conv_bn(p['down_w'], p['down_bn'])   # (in_c, c)
                wd_full = jnp.zeros_like(w1[:, :wd.shape[1]])
                center = 4 * in_c                                   # tap (1,1) of 3x3
                wd_full = wd_full.at[center:center + in_c, :].set(wd)
                w1 = jnp.concatenate(
                    [jnp.pad(w1, ((0, 0), (0, LANE - w1.shape[1]))),
                     jnp.pad(wd_full, ((0, 0), (0, LANE - wd_full.shape[1])))], axis=1)
                b1 = jnp.concatenate(
                    [jnp.pad(b1, (0, LANE - b1.shape[0])),
                     jnp.pad(bd, (0, LANE - bd.shape[0]))])
                conv1 = _pad_wb(w1, b1, k1p, 2 * LANE)
            else:
                conv1 = _pad_wb(w1, b1, k1p, LANE)
            w2, b2 = fold_conv_bn(p['conv2_w'], p['bn2'])          # K = 9 * c
            conv2 = _pad_wb(w2, b2, _ceil_mul(w2.shape[0], LANE), LANE)
            prepared.append(dict(conv1=conv1, conv2=conv2, cout=c,
                                 fused_down=fused_down))
            in_c = c
        layers.append(prepared)
    ip['layers'] = layers

    h_f = _conv_out(IMG, 7, 2, 3)            # stem conv
    h_f = _conv_out(h_f, 3, 2, 1)            # 3x3/s2 max pool
    for _ in range(1, len(BLOCK_COUNTS)):
        h_f = _conv_out(h_f, 3, 2, 1)        # stride-2 first block of layers 2..4
    ip['head'] = prepare_head(params, h_f, h_f, widths[-1])
    return ip


# ----------------------------- forward pass --------------------------------------
def basic_block(x, bp, stride, use_pallas):
    N, H, W, cin = x.shape
    c = bp['cout']
    patches, (N, Ho, Wo) = im2col(x, 3, 3, stride, 1, bp['conv1']['w'].shape[0])
    M = N * Ho * Wo
    if bp['fused_down']:
        # one kernel: relu(bn1(conv1)) in columns [0:128), downsample in [128:256)
        comb = matmul_bias_act(patches, bp['conv1']['w'], bp['conv1']['b'],
                               relu_cols=LANE, use_pallas=use_pallas)
        h1, res = comb[:, :LANE], comb[:, LANE:]
    else:
        assert stride == 1 and cin == c                  # identity skip connection
        h1 = matmul_bias_act(patches, bp['conv1']['w'], bp['conv1']['b'],
                             relu_cols=LANE, use_pallas=use_pallas)
        res = jnp.pad(x.reshape(M, cin), ((0, 0), (0, LANE - cin)))
    h1 = h1[:, :c].reshape(N, Ho, Wo, c)
    patches2, _ = im2col(h1, 3, 3, 1, 1, bp['conv2']['w'].shape[0])
    # relu(bn2(conv2(h1)) + skip) -- residual + ReLU fused in the matmul epilogue
    out = matmul_bias_act(patches2, bp['conv2']['w'], bp['conv2']['b'],
                          residual=res, relu_cols=LANE, use_pallas=use_pallas)
    return out[:, :c].reshape(N, Ho, Wo, c)


def forward(iparams, x_nchw, use_pallas=True):
    # NCHW at the boundary (PyTorch convention); bf16 NHWC at TRUE channel count
    # inside (the lane padding lives only in the weights' packed-K / N dimensions).
    x = jnp.transpose(x_nchw, (0, 2, 3, 1)).astype(ACT_DTYPE)
    patches, (N, Ho, Wo) = im2col(x, 7, 7, 2, 3, iparams['stem']['w'].shape[0])
    x = matmul_bias_act(patches, iparams['stem']['w'], iparams['stem']['b'],
                        relu_cols=LANE, use_pallas=use_pallas)
    x = x[:, :BASE_WIDTH].reshape(N, Ho, Wo, BASE_WIDTH)
    x = maxpool_3x3_s2(x)
    for li, blocks in enumerate(iparams['layers']):
        for bi, bp in enumerate(blocks):
            stride = 2 if (bi == 0 and li > 0) else 1
            x = basic_block(x, bp, stride, use_pallas)

    hp = iparams['head']
    if hp['pool_folded']:
        # AdaptiveMaxPool (single-element windows) + NCHW-order flatten are folded
        # into fc1's weights: feed the layer4 NHWC activation directly.
        feats = x.reshape(x.shape[0], -1)
    else:
        # TODO(synk): general multi-element-window adaptive max pool stays in XLA.
        xp = adaptive_max_pool(x, (POOL_OUT, POOL_OUT))
        feats = jnp.transpose(xp, (0, 3, 1, 2)).reshape(xp.shape[0], -1)
    k1 = hp['w1'].shape[0]
    if feats.shape[1] < k1:
        feats = jnp.pad(feats, ((0, 0), (0, k1 - feats.shape[1])))
    # BatchNorm1d x2 folded into fc1/fc2; Dropout(p=0.5) is identity in eval mode.
    # TODO(synk): train-mode dropout RNG not implemented (eval mode: identity).
    return head_forward(hp, feats.astype(ACT_DTYPE), use_pallas=use_pallas)


# ----------------------------- main ----------------------------------------------
if __name__ == "__main__":
    key = jax.random.PRNGKey(0)
    kp, kx = jax.random.split(key)
    params = init_params(kp)
    iparams = prepare_params(params)     # one-time fold / pack / pad / bf16 cast
    x = jax.random.normal(kx, (BATCH, IN_CH, IMG, IMG), jnp.float32)

    fwd_pallas = jax.jit(lambda xx: forward(iparams, xx, use_pallas=True))
    fwd_ref = jax.jit(lambda xx: forward(iparams, xx, use_pallas=False))

    out = fwd_pallas(x)
    jax.block_until_ready(out)
    assert out.shape == (BATCH,), out.shape

    ref = fwd_ref(x)
    jax.block_until_ready(ref)
    # Both paths use identical bf16-in / f32-accumulate numerics; tolerance allows
    # for accumulation-order / bf16-rounding differences between Pallas and XLA dots.
    assert jnp.allclose(out, ref, rtol=2e-2, atol=2e-2), (out, ref)

    print("KERNEL_OK")
</pallas_src>

<mosaic_0001>
module attributes {stable_mosaic.version = 11 : i64} {
  func.func @_mm_kernel(%arg0: i32, %arg1: memref<512x256xbf16, #tpu.memory_space<vmem>>, %arg2: memref<256x128xbf16, #tpu.memory_space<vmem>>, %arg3: memref<1x128xf32, #tpu.memory_space<vmem>>, %arg4: memref<512x128xbf16, #tpu.memory_space<vmem>>) attributes {dimension_semantics = [#tpu.dimension_semantics<parallel>], iteration_bounds = array<i64: 4>, scalar_prefetch = 0 : i64, scratch_operands = 0 : i64, tpu.core_type = #tpu.core_type<tc>, window_params = [{transform_indices = @transform_0, window_bounds = array<i64: 512, 256>}, {pipeline_mode = #tpu.pipeline_mode<synchronous>, transform_indices = @transform_1, window_bounds = array<i64: 256, 128>}, {pipeline_mode = #tpu.pipeline_mode<synchronous>, transform_indices = @transform_2, window_bounds = array<i64: 1, 128>}, {transform_indices = @transform_3, window_bounds = array<i64: 512, 128>}]} {
    %c0 = arith.constant 0 : index
    %c0_0 = arith.constant 0 : index
    %0 = vector.load %arg1[%c0, %c0_0] : memref<512x256xbf16, #tpu.memory_space<vmem>>, vector<512x256xbf16>
    %c0_1 = arith.constant 0 : index
    %c0_2 = arith.constant 0 : index
    %1 = vector.load %arg2[%c0_1, %c0_2] : memref<256x128xbf16, #tpu.memory_space<vmem>>, vector<256x128xbf16>
    %cst = arith.constant dense<0.000000e+00> : vector<512x128xf32>
    %2 = tpu.matmul %0, %1, %cst {dimension_numbers = #tpu.dot_dimension_numbers<[1], [0], [0], [1], [0, 0, 1, 1], [], []>} : vector<512x256xbf16>, vector<256x128xbf16>, vector<512x128xf32> -> vector<512x128xf32>
    %c0_3 = arith.constant 0 : index
    %c0_4 = arith.constant 0 : index
    %3 = vector.load %arg3[%c0_3, %c0_4] : memref<1x128xf32, #tpu.memory_space<vmem>>, vector<1x128xf32>
    %4 = vector.broadcast %3 : vector<1x128xf32> to vector<512x128xf32>
    %5 = arith.addf %2, %4 : vector<512x128xf32>
    %cst_5 = arith.constant 0.000000e+00 : f32
    %6 = vector.broadcast %cst_5 : f32 to vector<512x128xf32>
    %7 = arith.maximumf %5, %6 : vector<512x128xf32>
    %8 = arith.truncf %7 : vector<512x128xf32> to vector<512x128xbf16>
    %c0_6 = arith.constant 0 : index
    %c0_7 = arith.constant 0 : index
    %9 = vector.load %arg4[%c0_6, %c0_7] : memref<512x128xbf16, #tpu.memory_space<vmem>>, vector<512x128xbf16>
    tpu.vector_store %arg4[%c0_6, %c0_7], %8 {strides = array<i32>} : memref<512x128xbf16, #tpu.memory_space<vmem>>, vector<512x128xbf16>,
    return
  }
  func.func @transform_0(%arg0: i32) -> (i32, i32) {
    %c0_i32 = arith.constant 0 : i32
    %c0_i32_0 = arith.constant 0 : i32
    return %arg0, %c0_i32 : i32, i32
  }
  func.func @transform_1(%arg0: i32) -> (i32, i32) {
    %c0_i32 = arith.constant 0 : i32
    %c0_i32_0 = arith.constant 0 : i32
    %c0_i32_1 = arith.constant 0 : i32
    return %c0_i32, %c0_i32_0 : i32, i32
  }
  func.func @transform_2(%arg0: i32) -> (i32, i32) {
    %c0_i32 = arith.constant 0 : i32
    %c0_i32_0 = arith.constant 0 : i32
    %c0_i32_1 = arith.constant 0 : i32
    return %c0_i32, %c0_i32_0 : i32, i32
  }
  func.func @transform_3(%arg0: i32) -> (i32, i32) {
    %c0_i32 = arith.constant 0 : i32
    %c0_i32_0 = arith.constant 0 : i32
    return %arg0, %c0_i32 : i32, i32
  }
}

module attributes {stable_mosaic.version = 11 : i64} {
  func.func @_mm_kernel(%arg0: i32, %arg1: memref<256x128xbf16, #tpu.memory_space<vmem>>, %arg2: memref<128x128xbf16, #tpu.memory_space<vmem>>, %arg3: memref<1x128xf32, #tpu.memory_space<vmem>>, %arg4: memref<256x128xbf16, #tpu.memory_space<vmem>>) attributes {dimension_semantics = [#tpu.dimension_semantics<parallel>], iteration_bounds = array<i64: 2>, scalar_prefetch = 0 : i64, scratch_operands = 0 : i64, tpu.core_type = #tpu.core_type<tc>, window_params = [{transform_indices = @transform_0, window_bounds = array<i64: 256, 128>}, {pipeline_mode = #tpu.pipeline_mode<synchronous>, transform_indices = @transform_1, window_bounds = array<i64: 128, 128>}, {pipeline_mode = #tpu.pipeline_mode<synchronous>, transform_indices = @transform_2, window_bounds = array<i64: 1, 128>}, {transform_indices = @transform_3, window_bounds = array<i64: 256, 128>}]} {
    %c0 = arith.constant 0 : index
    %c0_0 = arith.constant 0 : index
    %0 = vector.load %arg1[%c0, %c0_0] : memref<256x128xbf16, #tpu.memory_space<vmem>>, vector<256x128xbf16>
    %c0_1 = arith.constant 0 : index
    %c0_2 = arith.constant 0 : index
    %1 = vector.load %arg2[%c0_1, %c0_2] : memref<128x128xbf16, #tpu.memory_space<vmem>>, vector<128x128xbf16>
    %cst = arith.constant dense<0.000000e+00> : vector<256x128xf32>
    %2 = tpu.matmul %0, %1, %cst {dimension_numbers = #tpu.dot_dimension_numbers<[1], [0], [0], [1], [0, 0, 1, 1], [], []>} : vector<256x128xbf16>, vector<128x128xbf16>, vector<256x128xf32> -> vector<256x128xf32>
    %c0_3 = arith.constant 0 : index
    %c0_4 = arith.constant 0 : index
    %3 = vector.load %arg3[%c0_3, %c0_4] : memref<1x128xf32, #tpu.memory_space<vmem>>, vector<1x128xf32>
    %4 = vector.broadcast %3 : vector<1x128xf32> to vector<256x128xf32>
    %5 = arith.addf %2, %4 : vector<256x128xf32>
    %cst_5 = arith.constant 0.000000e+00 : f32
    %6 = vector.broadcast %cst_5 : f32 to vector<256x128xf32>
    %7 = arith.maximumf %5, %6 : vector<256x128xf32>
    %8 = arith.truncf %7 : vector<256x128xf32> to vector<256x128xbf16>
    %c0_6 = arith.constant 0 : index
    %c0_7 = arith.constant 0 : index
    %9 = vector.load %arg4[%c0_6, %c0_7] : memref<256x128xbf16, #tpu.memory_space<vmem>>, vector<256x128xbf16>
    tpu.vector_store %arg4[%c0_6, %c0_7], %8 {strides = array<i32>} : memref<256x128xbf16, #tpu.memory_space<vmem>>, vector<256x128xbf16>,
    return
  }
  func.func @transform_0(%arg0: i32) -> (i32, i32) {
    %c0_i32 = arith.constant 0 : i32
    %c0_i32_0 = arith.constant 0 : i32
    return %arg0, %c0_i32 : i32, i32
  }
  func.func @transform_1(%arg0: i32) -> (i32, i32) {
    %c0_i32 = arith.constant 0 : i32
    %c0_i32_0 = arith.constant 0 : i32
    %c0_i32_1 = arith.constant 0 : i32
    return %c0_i32, %c0_i32_0 : i32, i32
  }
  func.func @transform_2(%arg0: i32) -> (i32, i32) {
    %c0_i32 = arith.constant 0 : i32
    %c0_i32_0 = arith.constant 0 : i32
    %c0_i32_1 = arith.constant 0 : i32
    return %c0_i32, %c0_i32_0 : i32, i32
  }
  func.func @transform_3(%arg0: i32) -> (i32, i32) {
    %c0_i32 = arith.constant 0 : i32
    %c0_i32_0 = arith.constant 0 : i32
    return %arg0, %c0_i32 : i32, i32
  }
}

module attributes {stable_mosaic.version = 11 : i64} {
  func.func @_mm_res_kernel(%arg0: i32, %arg1: memref<256x128xbf16, #tpu.memory_space<vmem>>, %arg2: memref<128x128xbf16, #tpu.memory_space<vmem>>, %arg3: memref<1x128xf32, #tpu.memory_space<vmem>>, %arg4: memref<256x128xbf16, #tpu.memory_space<vmem>>, %arg5: memref<256x128xbf16, #tpu.memory_space<vmem>>) attributes {dimension_semantics = [#tpu.dimension_semantics<parallel>], iteration_bounds = array<i64: 2>, scalar_prefetch = 0 : i64, scratch_operands = 0 : i64, tpu.core_type = #tpu.core_type<tc>, window_params = [{transform_indices = @transform_0, window_bounds = array<i64: 256, 128>}, {pipeline_mode = #tpu.pipeline_mode<synchronous>, transform_indices = @transform_1, window_bounds = array<i64: 128, 128>}, {pipeline_mode = #tpu.pipeline_mode<synchronous>, transform_indices = @transform_2, window_bounds = array<i64: 1, 128>}, {transform_indices = @transform_3, window_bounds = array<i64: 256, 128>}, {transform_indices = @transform_4, window_bounds = array<i64: 256, 128>}]} {
    %c0 = arith.constant 0 : index
    %c0_0 = arith.constant 0 : index
    %0 = vector.load %arg1[%c0, %c0_0] : memref<256x128xbf16, #tpu.memory_space<vmem>>, vector<256x128xbf16>
    %c0_1 = arith.constant 0 : index
    %c0_2 = arith.constant 0 : index
    %1 = vector.load %arg2[%c0_1, %c0_2] : memref<128x128xbf16, #tpu.memory_space<vmem>>, vector<128x128xbf16>
    %cst = arith.constant dense<0.000000e+00> : vector<256x128xf32>
    %2 = tpu.matmul %0, %1, %cst {dimension_numbers = #tpu.dot_dimension_numbers<[1], [0], [0], [1], [0, 0, 1, 1], [], []>} : vector<256x128xbf16>, vector<128x128xbf16>, vector<256x128xf32> -> vector<256x128xf32>
    %c0_3 = arith.constant 0 : index
    %c0_4 = arith.constant 0 : index
    %3 = vector.load %arg3[%c0_3, %c0_4] : memref<1x128xf32, #tpu.memory_space<vmem>>, vector<1x128xf32>
    %4 = vector.broadcast %3 : vector<1x128xf32> to vector<256x128xf32>
    %5 = arith.addf %2, %4 : vector<256x128xf32>
    %c0_5 = arith.constant 0 : index
    %c0_6 = arith.constant 0 : index
    %6 = vector.load %arg4[%c0_5, %c0_6] : memref<256x128xbf16, #tpu.memory_space<vmem>>, vector<256x128xbf16>
    %7 = arith.extf %6 : vector<256x128xbf16> to vector<256x128xf32>
    %8 = arith.addf %5, %7 : vector<256x128xf32>
    %cst_7 = arith.constant 0.000000e+00 : f32
    %9 = vector.broadcast %cst_7 : f32 to vector<256x128xf32>
    %10 = arith.maximumf %8, %9 : vector<256x128xf32>
    %11 = arith.truncf %10 : vector<256x128xf32> to vector<256x128xbf16>
    %c0_8 = arith.constant 0 : index
    %c0_9 = arith.constant 0 : index
    %12 = vector.load %arg5[%c0_8, %c0_9] : memref<256x128xbf16, #tpu.memory_space<vmem>>, vector<256x128xbf16>
    tpu.vector_store %arg5[%c0_8, %c0_9], %11 {strides = array<i32>} : memref<256x128xbf16, #tpu.memory_space<vmem>>, vector<256x128xbf16>,
    return
  }
  func.func @transform_0(%arg0: i32) -> (i32, i32) {
    %c0_i32 = arith.constant 0 : i32
    %c0_i32_0 = arith.constant 0 : i32
    return %arg0, %c0_i32 : i32, i32
  }
  func.func @transform_1(%arg0: i32) -> (i32, i32) {
    %c0_i32 = arith.constant 0 : i32
    %c0_i32_0 = arith.constant 0 : i32
    %c0_i32_1 = arith.constant 0 : i32
    return %c0_i32, %c0_i32_0 : i32, i32
  }
  func.func @transform_2(%arg0: i32) -> (i32, i32) {
    %c0_i32 = arith.constant 0 : i32
    %c0_i32_0 = arith.constant 0 : i32
    %c0_i32_1 = arith.constant 0 : i32
    return %c0_i32, %c0_i32_0 : i32, i32
  }
  func.func @transform_3(%arg0: i32) -> (i32, i32) {
    %c0_i32 = arith.constant 0 : i32
    %c0_i32_0 = arith.constant 0 : i32
    return %arg0, %c0_i32 : i32, i32
  }
  func.func @transform_4(%arg0: i32) -> (i32, i32) {
    %c0_i32 = arith.constant 0 : i32
    %c0_i32_0 = arith.constant 0 : i32
    return %arg0, %c0_i32 : i32, i32
  }
}

module attributes {stable_mosaic.version = 11 : i64} {
  func.func @_mm_kernel(%arg0: i32, %arg1: memref<64x128xbf16, #tpu.memory_space<vmem>>, %arg2: memref<128x256xbf16, #tpu.memory_space<vmem>>, %arg3: memref<1x256xf32, #tpu.memory_space<vmem>>, %arg4: memref<64x256xbf16, #tpu.memory_space<vmem>>) attributes {dimension_semantics = [#tpu.dimension_semantics<parallel>], iteration_bounds = array<i64: 2>, scalar_prefetch = 0 : i64, scratch_operands = 0 : i64, tpu.core_type = #tpu.core_type<tc>, window_params = [{transform_indices = @transform_0, window_bounds = array<i64: 64, 128>}, {pipeline_mode = #tpu.pipeline_mode<synchronous>, transform_indices = @transform_1, window_bounds = array<i64: 128, 256>}, {pipeline_mode = #tpu.pipeline_mode<synchronous>, transform_indices = @transform_2, window_bounds = array<i64: 1, 256>}, {transform_indices = @transform_3, window_bounds = array<i64: 64, 256>}]} {
    %c0 = arith.constant 0 : index
    %c0_0 = arith.constant 0 : index
    %0 = vector.load %arg1[%c0, %c0_0] : memref<64x128xbf16, #tpu.memory_space<vmem>>, vector<64x128xbf16>
    %c0_1 = arith.constant 0 : index
    %c0_2 = arith.constant 0 : index
    %1 = vector.load %arg2[%c0_1, %c0_2] : memref<128x256xbf16, #tpu.memory_space<vmem>>, vector<128x256xbf16>
    %cst = arith.constant dense<0.000000e+00> : vector<64x256xf32>
    %2 = tpu.matmul %0, %1, %cst {dimension_numbers = #tpu.dot_dimension_numbers<[1], [0], [0], [1], [0, 0, 1, 1], [], []>} : vector<64x128xbf16>, vector<128x256xbf16>, vector<64x256xf32> -> vector<64x256xf32>
    %c0_3 = arith.constant 0 : index
    %c0_4 = arith.constant 0 : index
    %3 = vector.load %arg3[%c0_3, %c0_4] : memref<1x256xf32, #tpu.memory_space<vmem>>, vector<1x256xf32>
    %4 = vector.broadcast %3 : vector<1x256xf32> to vector<64x256xf32>
    %5 = arith.addf %2, %4 : vector<64x256xf32>
    %6 = tpu.iota {dimensions = array<i32: 1>} : vector<64x256xi32>
    %c128_i32 = arith.constant 128 : i32
    %7 = vector.broadcast %c128_i32 : i32 to vector<64x256xi32>
    %8 = arith.cmpi slt, %6, %7 : vector<64x256xi32>
    %cst_5 = arith.constant 0.000000e+00 : f32
    %9 = vector.broadcast %cst_5 : f32 to vector<64x256xf32>
    %10 = arith.maximumf %5, %9 : vector<64x256xf32>
    %11 = arith.select %8, %10, %5 : vector<64x256xi1>, vector<64x256xf32>
    %12 = arith.truncf %11 : vector<64x256xf32> to vector<64x256xbf16>
    %c0_6 = arith.constant 0 : index
    %c0_7 = arith.constant 0 : index
    %13 = vector.load %arg4[%c0_6, %c0_7] : memref<64x256xbf16, #tpu.memory_space<vmem>>, vector<64x256xbf16>
    tpu.vector_store %arg4[%c0_6, %c0_7], %12 {strides = array<i32>} : memref<64x256xbf16, #tpu.memory_space<vmem>>, vector<64x256xbf16>,
    return
  }
  func.func @transform_0(%arg0: i32) -> (i32, i32) {
    %c0_i32 = arith.constant 0 : i32
    %c0_i32_0 = arith.constant 0 : i32
    return %arg0, %c0_i32 : i32, i32
  }
  func.func @transform_1(%arg0: i32) -> (i32, i32) {
    %c0_i32 = arith.constant 0 : i32
    %c0_i32_0 = arith.constant 0 : i32
    %c0_i32_1 = arith.constant 0 : i32
    return %c0_i32, %c0_i32_0 : i32, i32
  }
  func.func @transform_2(%arg0: i32) -> (i32, i32) {
    %c0_i32 = arith.constant 0 : i32
    %c0_i32_0 = arith.constant 0 : i32
    %c0_i32_1 = arith.constant 0 : i32
    return %c0_i32, %c0_i32_0 : i32, i32
  }
  func.func @transform_3(%arg0: i32) -> (i32, i32) {
    %c0_i32 = arith.constant 0 : i32
    %c0_i32_0 = arith.constant 0 : i32
    return %arg0, %c0_i32 : i32, i32
  }
}

module attributes {stable_mosaic.version = 11 : i64} {
  func.func @_mm_res_kernel(%arg0: i32, %arg1: memref<64x256xbf16, #tpu.memory_space<vmem>>, %arg2: memref<256x128xbf16, #tpu.memory_space<vmem>>, %arg3: memref<1x128xf32, #tpu.memory_space<vmem>>, %arg4: memref<64x128xbf16, #tpu.memory_space<vmem>>, %arg5: memref<64x128xbf16, #tpu.memory_space<vmem>>) attributes {dimension_semantics = [#tpu.dimension_semantics<parallel>], iteration_bounds = array<i64: 2>, scalar_prefetch = 0 : i64, scratch_operands = 0 : i64, tpu.core_type = #tpu.core_type<tc>, window_params = [{transform_indices = @transform_0, window_bounds = array<i64: 64, 256>}, {pipeline_mode = #tpu.pipeline_mode<synchronous>, transform_indices = @transform_1, window_bounds = array<i64: 256, 128>}, {pipeline_mode = #tpu.pipeline_mode<synchronous>, transform_indices = @transform_2, window_bounds = array<i64: 1, 128>}, {transform_indices = @transform_3, window_bounds = array<i64: 64, 128>}, {transform_indices = @transform_4, window_bounds = array<i64: 64, 128>}]} {
    %c0 = arith.constant 0 : index
    %c0_0 = arith.constant 0 : index
    %0 = vector.load %arg1[%c0, %c0_0] : memref<64x256xbf16, #tpu.memory_space<vmem>>, vector<64x256xbf16>
    %c0_1 = arith.constant 0 : index
    %c0_2 = arith.constant 0 : index
    %1 = vector.load %arg2[%c0_1, %c0_2] : memref<256x128xbf16, #tpu.memory_space<vmem>>, vector<256x128xbf16>
    %cst = arith.constant dense<0.000000e+00> : vector<64x128xf32>
    %2 = tpu.matmul %0, %1, %cst {dimension_numbers = #tpu.dot_dimension_numbers<[1], [0], [0], [1], [0, 0, 1, 1], [], []>} : vector<64x256xbf16>, vector<256x128xbf16>, vector<64x128xf32> -> vector<64x128xf32>
    %c0_3 = arith.constant 0 : index
    %c0_4 = arith.constant 0 : index
    %3 = vector.load %arg3[%c0_3, %c0_4] : memref<1x128xf32, #tpu.memory_space<vmem>>, vector<1x128xf32>
    %4 = vector.broadcast %3 : vector<1x128xf32> to vector<64x128xf32>
    %5 = arith.addf %2, %4 : vector<64x128xf32>
    %c0_5 = arith.constant 0 : index
    %c0_6 = arith.constant 0 : index
    %6 = vector.load %arg4[%c0_5, %c0_6] : memref<64x128xbf16, #tpu.memory_space<vmem>>, vector<64x128xbf16>
    %7 = arith.extf %6 : vector<64x128xbf16> to vector<64x128xf32>
    %8 = arith.addf %5, %7 : vector<64x128xf32>
    %cst_7 = arith.constant 0.000000e+00 : f32
    %9 = vector.broadcast %cst_7 : f32 to vector<64x128xf32>
    %10 = arith.maximumf %8, %9 : vector<64x128xf32>
    %11 = arith.truncf %10 : vector<64x128xf32> to vector<64x128xbf16>
    %c0_8 = arith.constant 0 : index
    %c0_9 = arith.constant 0 : index
    %12 = vector.load %arg5[%c0_8, %c0_9] : memref<64x128xbf16, #tpu.memory_space<vmem>>, vector<64x128xbf16>
    tpu.vector_store %arg5[%c0_8, %c0_9], %11 {strides = array<i32>} : memref<64x128xbf16, #tpu.memory_space<vmem>>, vector<64x128xbf16>,
    return
  }
  func.func @transform_0(%arg0: i32) -> (i32, i32) {
    %c0_i32 = arith.constant 0 : i32
    %c0_i32_0 = arith.constant 0 : i32
    return %arg0, %c0_i32 : i32, i32
  }
  func.func @transform_1(%arg0: i32) -> (i32, i32) {
    %c0_i32 = arith.constant 0 : i32
    %c0_i32_0 = arith.constant 0 : i32
    %c0_i32_1 = arith.constant 0 : i32
    return %c0_i32, %c0_i32_0 : i32, i32
  }
  func.func @transform_2(%arg0: i32) -> (i32, i32) {
    %c0_i32 = arith.constant 0 : i32
    %c0_i32_0 = arith.constant 0 : i32
    %c0_i32_1 = arith.constant 0 : i32
    return %c0_i32, %c0_i32_0 : i32, i32
  }
  func.func @transform_3(%arg0: i32) -> (i32, i32) {
    %c0_i32 = arith.constant 0 : i32
    %c0_i32_0 = arith.constant 0 : i32
    return %arg0, %c0_i32 : i32, i32
  }
  func.func @transform_4(%arg0: i32) -> (i32, i32) {
    %c0_i32 = arith.constant 0 : i32
    %c0_i32_0 = arith.constant 0 : i32
    return %arg0, %c0_i32 : i32, i32
  }
}

module attributes {stable_mosaic.version = 11 : i64} {
  func.func @_mm_kernel(%arg0: i32, %arg1: memref<64x256xbf16, #tpu.memory_space<vmem>>, %arg2: memref<256x128xbf16, #tpu.memory_space<vmem>>, %arg3: memref<1x128xf32, #tpu.memory_space<vmem>>, %arg4: memref<64x128xbf16, #tpu.memory_space<vmem>>) attributes {dimension_semantics = [#tpu.dimension_semantics<parallel>], iteration_bounds = array<i64: 2>, scalar_prefetch = 0 : i64, scratch_operands = 0 : i64, tpu.core_type = #tpu.core_type<tc>, window_params = [{transform_indices = @transform_0, window_bounds = array<i64: 64, 256>}, {pipeline_mode = #tpu.pipeline_mode<synchronous>, transform_indices = @transform_1, window_bounds = array<i64: 256, 128>}, {pipeline_mode = #tpu.pipeline_mode<synchronous>, transform_indices = @transform_2, window_bounds = array<i64: 1, 128>}, {transform_indices = @transform_3, window_bounds = array<i64: 64, 128>}]} {
    %c0 = arith.constant 0 : index
    %c0_0 = arith.constant 0 : index
    %0 = vector.load %arg1[%c0, %c0_0] : memref<64x256xbf16, #tpu.memory_space<vmem>>, vector<64x256xbf16>
    %c0_1 = arith.constant 0 : index
    %c0_2 = arith.constant 0 : index
    %1 = vector.load %arg2[%c0_1, %c0_2] : memref<256x128xbf16, #tpu.memory_space<vmem>>, vector<256x128xbf16>
    %cst = arith.constant dense<0.000000e+00> : vector<64x128xf32>
    %2 = tpu.matmul %0, %1, %cst {dimension_numbers = #tpu.dot_dimension_numbers<[1], [0], [0], [1], [0, 0, 1, 1], [], []>} : vector<64x256xbf16>, vector<256x128xbf16>, vector<64x128xf32> -> vector<64x128xf32>
    %c0_3 = arith.constant 0 : index
    %c0_4 = arith.constant 0 : index
    %3 = vector.load %arg3[%c0_3, %c0_4] : memref<1x128xf32, #tpu.memory_space<vmem>>, vector<1x128xf32>
    %4 = vector.broadcast %3 : vector<1x128xf32> to vector<64x128xf32>
    %5 = arith.addf %2, %4 : vector<64x128xf32>
    %cst_5 = arith.constant 0.000000e+00 : f32
    %6 = vector.broadcast %cst_5 : f32 to vector<64x128xf32>
    %7 = arith.maximumf %5, %6 : vector<64x128xf32>
    %8 = arith.truncf %7 : vector<64x128xf32> to vector<64x128xbf16>
    %c0_6 = arith.constant 0 : index
    %c0_7 = arith.constant 0 : index
    %9 = vector.load %arg4[%c0_6, %c0_7] : memref<64x128xbf16, #tpu.memory_space<vmem>>, vector<64x128xbf16>
    tpu.vector_store %arg4[%c0_6, %c0_7], %8 {strides = array<i32>} : memref<64x128xbf16, #tpu.memory_space<vmem>>, vector<64x128xbf16>,
    return
  }
  func.func @transform_0(%arg0: i32) -> (i32, i32) {
    %c0_i32 = arith.constant 0 : i32
    %c0_i32_0 = arith.constant 0 : i32
    return %arg0, %c0_i32 : i32, i32
  }
  func.func @transform_1(%arg0: i32) -> (i32, i32) {
    %c0_i32 = arith.constant 0 : i32
    %c0_i32_0 = arith.constant 0 : i32
    %c0_i32_1 = arith.constant 0 : i32
    return %c0_i32, %c0_i32_0 : i32, i32
  }
  func.func @transform_2(%arg0: i32) -> (i32, i32) {
    %c0_i32 = arith.constant 0 : i32
    %c0_i32_0 = arith.constant 0 : i32
    %c0_i32_1 = arith.constant 0 : i32
    return %c0_i32, %c0_i32_0 : i32, i32
  }
  func.func @transform_3(%arg0: i32) -> (i32, i32) {
    %c0_i32 = arith.constant 0 : i32
    %c0_i32_0 = arith.constant 0 : i32
    return %arg0, %c0_i32 : i32, i32
  }
}

module attributes {stable_mosaic.version = 11 : i64} {
  func.func @_mm_kernel(%arg0: i32, %arg1: memref<16x256xbf16, #tpu.memory_space<vmem>>, %arg2: memref<256x256xbf16, #tpu.memory_space<vmem>>, %arg3: memref<1x256xf32, #tpu.memory_space<vmem>>, %arg4: memref<16x256xbf16, #tpu.memory_space<vmem>>) attributes {dimension_semantics = [#tpu.dimension_semantics<parallel>], iteration_bounds = array<i64: 2>, scalar_prefetch = 0 : i64, scratch_operands = 0 : i64, tpu.core_type = #tpu.core_type<tc>, window_params = [{transform_indices = @transform_0, window_bounds = array<i64: 16, 256>}, {pipeline_mode = #tpu.pipeline_mode<synchronous>, transform_indices = @transform_1, window_bounds = array<i64: 256, 256>}, {pipeline_mode = #tpu.pipeline_mode<synchronous>, transform_indices = @transform_2, window_bounds = array<i64: 1, 256>}, {transform_indices = @transform_3, window_bounds = array<i64: 16, 256>}]} {
    %c0 = arith.constant 0 : index
    %c0_0 = arith.constant 0 : index
    %0 = vector.load %arg1[%c0, %c0_0] : memref<16x256xbf16, #tpu.memory_space<vmem>>, vector<16x256xbf16>
    %c0_1 = arith.constant 0 : index
    %c0_2 = arith.constant 0 : index
    %1 = vector.load %arg2[%c0_1, %c0_2] : memref<256x256xbf16, #tpu.memory_space<vmem>>, vector<256x256xbf16>
    %cst = arith.constant dense<0.000000e+00> : vector<16x256xf32>
    %2 = tpu.matmul %0, %1, %cst {dimension_numbers = #tpu.dot_dimension_numbers<[1], [0], [0], [1], [0, 0, 1, 1], [], []>} : vector<16x256xbf16>, vector<256x256xbf16>, vector<16x256xf32> -> vector<16x256xf32>
    %c0_3 = arith.constant 0 : index
    %c0_4 = arith.constant 0 : index
    %3 = vector.load %arg3[%c0_3, %c0_4] : memref<1x256xf32, #tpu.memory_space<vmem>>, vector<1x256xf32>
    %4 = vector.broadcast %3 : vector<1x256xf32> to vector<16x256xf32>
    %5 = arith.addf %2, %4 : vector<16x256xf32>
    %6 = tpu.iota {dimensions = array<i32: 1>} : vector<16x256xi32>
    %c128_i32 = arith.constant 128 : i32
    %7 = vector.broadcast %c128_i32 : i32 to vector<16x256xi32>
    %8 = arith.cmpi slt, %6, %7 : vector<16x256xi32>
    %cst_5 = arith.constant 0.000000e+00 : f32
    %9 = vector.broadcast %cst_5 : f32 to vector<16x256xf32>
    %10 = arith.maximumf %5, %9 : vector<16x256xf32>
    %11 = arith.select %8, %10, %5 : vector<16x256xi1>, vector<16x256xf32>
    %12 = arith.truncf %11 : vector<16x256xf32> to vector<16x256xbf16>
    %c0_6 = arith.constant 0 : index
    %c0_7 = arith.constant 0 : index
    %13 = vector.load %arg4[%c0_6, %c0_7] : memref<16x256xbf16, #tpu.memory_space<vmem>>, vector<16x256xbf16>
    tpu.vector_store %arg4[%c0_6, %c0_7], %12 {strides = array<i32>} : memref<16x256xbf16, #tpu.memory_space<vmem>>, vector<16x256xbf16>,
    return
  }
  func.func @transform_0(%arg0: i32) -> (i32, i32) {
    %c0_i32 = arith.constant 0 : i32
    %c0_i32_0 = arith.constant 0 : i32
    return %arg0, %c0_i32 : i32, i32
  }
  func.func @transform_1(%arg0: i32) -> (i32, i32) {
    %c0_i32 = arith.constant 0 : i32
    %c0_i32_0 = arith.constant 0 : i32
    %c0_i32_1 = arith.constant 0 : i32
    return %c0_i32, %c0_i32_0 : i32, i32
  }
  func.func @transform_2(%arg0: i32) -> (i32, i32) {
    %c0_i32 = arith.constant 0 : i32
    %c0_i32_0 = arith.constant 0 : i32
    %c0_i32_1 = arith.constant 0 : i32
    return %c0_i32, %c0_i32_0 : i32, i32
  }
  func.func @transform_3(%arg0: i32) -> (i32, i32) {
    %c0_i32 = arith.constant 0 : i32
    %c0_i32_0 = arith.constant 0 : i32
    return %arg0, %c0_i32 : i32, i32
  }
}

module attributes {stable_mosaic.version = 11 : i64} {
  func.func @_mm_res_kernel(%arg0: i32, %arg1: memref<16x384xbf16, #tpu.memory_space<vmem>>, %arg2: memref<384x128xbf16, #tpu.memory_space<vmem>>, %arg3: memref<1x128xf32, #tpu.memory_space<vmem>>, %arg4: memref<16x128xbf16, #tpu.memory_space<vmem>>, %arg5: memref<16x128xbf16, #tpu.memory_space<vmem>>) attributes {dimension_semantics = [#tpu.dimension_semantics<parallel>], iteration_bounds = array<i64: 2>, scalar_prefetch = 0 : i64, scratch_operands = 0 : i64, tpu.core_type = #tpu.core_type<tc>, window_params = [{transform_indices = @transform_0, window_bounds = array<i64: 16, 384>}, {pipeline_mode = #tpu.pipeline_mode<synchronous>, transform_indices = @transform_1, window_bounds = array<i64: 384, 128>}, {pipeline_mode = #tpu.pipeline_mode<synchronous>, transform_indices = @transform_2, window_bounds = array<i64: 1, 128>}, {transform_indices = @transform_3, window_bounds = array<i64: 16, 128>}, {transform_indices = @transform_4, window_bounds = array<i64: 16, 128>}]} {
    %c0 = arith.constant 0 : index
    %c0_0 = arith.constant 0 : index
    %0 = vector.load %arg1[%c0, %c0_0] : memref<16x384xbf16, #tpu.memory_space<vmem>>, vector<16x384xbf16>
    %c0_1 = arith.constant 0 : index
    %c0_2 = arith.constant 0 : index
    %1 = vector.load %arg2[%c0_1, %c0_2] : memref<384x128xbf16, #tpu.memory_space<vmem>>, vector<384x128xbf16>
    %cst = arith.constant dense<0.000000e+00> : vector<16x128xf32>
    %2 = tpu.matmul %0, %1, %cst {dimension_numbers = #tpu.dot_dimension_numbers<[1], [0], [0], [1], [0, 0, 1, 1], [], []>} : vector<16x384xbf16>, vector<384x128xbf16>, vector<16x128xf32> -> vector<16x128xf32>
    %c0_3 = arith.constant 0 : index
    %c0_4 = arith.constant 0 : index
    %3 = vector.load %arg3[%c0_3, %c0_4] : memref<1x128xf32, #tpu.memory_space<vmem>>, vector<1x128xf32>
    %4 = vector.broadcast %3 : vector<1x128xf32> to vector<16x128xf32>
    %5 = arith.addf %2, %4 : vector<16x128xf32>
    %c0_5 = arith.constant 0 : index
    %c0_6 = arith.constant 0 : index
    %6 = vector.load %arg4[%c0_5, %c0_6] : memref<16x128xbf16, #tpu.memory_space<vmem>>, vector<16x128xbf16>
    %7 = arith.extf %6 : vector<16x128xbf16> to vector<16x128xf32>
    %8 = arith.addf %5, %7 : vector<16x128xf32>
    %cst_7 = arith.constant 0.000000e+00 : f32
    %9 = vector.broadcast %cst_7 : f32 to vector<16x128xf32>
    %10 = arith.maximumf %8, %9 : vector<16x128xf32>
    %11 = arith.truncf %10 : vector<16x128xf32> to vector<16x128xbf16>
    %c0_8 = arith.constant 0 : index
    %c0_9 = arith.constant 0 : index
    %12 = vector.load %arg5[%c0_8, %c0_9] : memref<16x128xbf16, #tpu.memory_space<vmem>>, vector<16x128xbf16>
    tpu.vector_store %arg5[%c0_8, %c0_9], %11 {strides = array<i32>} : memref<16x128xbf16, #tpu.memory_space<vmem>>, vector<16x128xbf16>,
    return
  }
  func.func @transform_0(%arg0: i32) -> (i32, i32) {
    %c0_i32 = arith.constant 0 : i32
    %c0_i32_0 = arith.constant 0 : i32
    return %arg0, %c0_i32 : i32, i32
  }
  func.func @transform_1(%arg0: i32) -> (i32, i32) {
    %c0_i32 = arith.constant 0 : i32
    %c0_i32_0 = arith.constant 0 : i32
    %c0_i32_1 = arith.constant 0 : i32
    return %c0_i32, %c0_i32_0 : i32, i32
  }
  func.func @transform_2(%arg0: i32) -> (i32, i32) {
    %c0_i32 = arith.constant 0 : i32
    %c0_i32_0 = arith.constant 0 : i32
    %c0_i32_1 = arith.constant 0 : i32
    return %c0_i32, %c0_i32_0 : i32, i32
  }
  func.func @transform_3(%arg0: i32) -> (i32, i32) {
    %c0_i32 = arith.constant 0 : i32
    %c0_i32_0 = arith.constant 0 : i32
    return %arg0, %c0_i32 : i32, i32
  }
  func.func @transform_4(%arg0: i32) -> (i32, i32) {
    %c0_i32 = arith.constant 0 : i32
    %c0_i32_0 = arith.constant 0 : i32
    return %arg0, %c0_i32 : i32, i32
  }
}

module attributes {stable_mosaic.version = 11 : i64} {
  func.func @_mm_kernel(%arg0: i32, %arg1: memref<16x384xbf16, #tpu.memory_space<vmem>>, %arg2: memref<384x128xbf16, #tpu.memory_space<vmem>>, %arg3: memref<1x128xf32, #tpu.memory_space<vmem>>, %arg4: memref<16x128xbf16, #tpu.memory_space<vmem>>) attributes {dimension_semantics = [#tpu.dimension_semantics<parallel>], iteration_bounds = array<i64: 2>, scalar_prefetch = 0 : i64, scratch_operands = 0 : i64, tpu.core_type = #tpu.core_type<tc>, window_params = [{transform_indices = @transform_0, window_bounds = array<i64: 16, 384>}, {pipeline_mode = #tpu.pipeline_mode<synchronous>, transform_indices = @transform_1, window_bounds = array<i64: 384, 128>}, {pipeline_mode = #tpu.pipeline_mode<synchronous>, transform_indices = @transform_2, window_bounds = array<i64: 1, 128>}, {transform_indices = @transform_3, window_bounds = array<i64: 16, 128>}]} {
    %c0 = arith.constant 0 : index
    %c0_0 = arith.constant 0 : index
    %0 = vector.load %arg1[%c0, %c0_0] : memref<16x384xbf16, #tpu.memory_space<vmem>>, vector<16x384xbf16>
    %c0_1 = arith.constant 0 : index
    %c0_2 = arith.constant 0 : index
    %1 = vector.load %arg2[%c0_1, %c0_2] : memref<384x128xbf16, #tpu.memory_space<vmem>>, vector<384x128xbf16>
    %cst = arith.constant dense<0.000000e+00> : vector<16x128xf32>
    %2 = tpu.matmul %0, %1, %cst {dimension_numbers = #tpu.dot_dimension_numbers<[1], [0], [0], [1], [0, 0, 1, 1], [], []>} : vector<16x384xbf16>, vector<384x128xbf16>, vector<16x128xf32> -> vector<16x128xf32>
    %c0_3 = arith.constant 0 : index
    %c0_4 = arith.constant 0 : index
    %3 = vector.load %arg3[%c0_3, %c0_4] : memref<1x128xf32, #tpu.memory_space<vmem>>, vector<1x128xf32>
    %4 = vector.broadcast %3 : vector<1x128xf32> to vector<16x128xf32>
    %5 = arith.addf %2, %4 : vector<16x128xf32>
    %cst_5 = arith.constant 0.000000e+00 : f32
    %6 = vector.broadcast %cst_5 : f32 to vector<16x128xf32>
    %7 = arith.maximumf %5, %6 : vector<16x128xf32>
    %8 = arith.truncf %7 : vector<16x128xf32> to vector<16x128xbf16>
    %c0_6 = arith.constant 0 : index
    %c0_7 = arith.constant 0 : index
    %9 = vector.load %arg4[%c0_6, %c0_7] : memref<16x128xbf16, #tpu.memory_space<vmem>>, vector<16x128xbf16>
    tpu.vector_store %arg4[%c0_6, %c0_7], %8 {strides = array<i32>} : memref<16x128xbf16, #tpu.memory_space<vmem>>, vector<16x128xbf16>,
    return
  }
  func.func @transform_0(%arg0: i32) -> (i32, i32) {
    %c0_i32 = arith.constant 0 : i32
    %c0_i32_0 = arith.constant 0 : i32
    return %arg0, %c0_i32 : i32, i32
  }
  func.func @transform_1(%arg0: i32) -> (i32, i32) {
    %c0_i32 = arith.constant 0 : i32
    %c0_i32_0 = arith.constant 0 : i32
    %c0_i32_1 = arith.constant 0 : i32
    return %c0_i32, %c0_i32_0 : i32, i32
  }
  func.func @transform_2(%arg0: i32) -> (i32, i32) {
    %c0_i32 = arith.constant 0 : i32
    %c0_i32_0 = arith.constant 0 : i32
    %c0_i32_1 = arith.constant 0 : i32
    return %c0_i32, %c0_i32_0 : i32, i32
  }
  func.func @transform_3(%arg0: i32) -> (i32, i32) {
    %c0_i32 = arith.constant 0 : i32
    %c0_i32_0 = arith.constant 0 : i32
    return %arg0, %c0_i32 : i32, i32
  }
}

module attributes {stable_mosaic.version = 11 : i64} {
  func.func @_mm_kernel(%arg0: i32, %arg1: memref<8x384xbf16, #tpu.memory_space<vmem>>, %arg2: memref<384x256xbf16, #tpu.memory_space<vmem>>, %arg3: memref<1x256xf32, #tpu.memory_space<vmem>>, %arg4: memref<8x256xbf16, #tpu.memory_space<vmem>>) attributes {dimension_semantics = [#tpu.dimension_semantics<parallel>], iteration_bounds = array<i64: 1>, scalar_prefetch = 0 : i64, scratch_operands = 0 : i64, tpu.core_type = #tpu.core_type<tc>, window_params = [{transform_indices = @transform_0, window_bounds = array<i64: 8, 384>}, {pipeline_mode = #tpu.pipeline_mode<synchronous>, transform_indices = @transform_1, window_bounds = array<i64: 384, 256>}, {pipeline_mode = #tpu.pipeline_mode<synchronous>, transform_indices = @transform_2, window_bounds = array<i64: 1, 256>}, {transform_indices = @transform_3, window_bounds = array<i64: 8, 256>}]} {
    %c0 = arith.constant 0 : index
    %c0_0 = arith.constant 0 : index
    %0 = vector.load %arg1[%c0, %c0_0] : memref<8x384xbf16, #tpu.memory_space<vmem>>, vector<8x384xbf16>
    %c0_1 = arith.constant 0 : index
    %c0_2 = arith.constant 0 : index
    %1 = vector.load %arg2[%c0_1, %c0_2] : memref<384x256xbf16, #tpu.memory_space<vmem>>, vector<384x256xbf16>
    %cst = arith.constant dense<0.000000e+00> : vector<8x256xf32>
    %2 = tpu.matmul %0, %1, %cst {dimension_numbers = #tpu.dot_dimension_numbers<[1], [0], [0], [1], [0, 0, 1, 1], [], []>} : vector<8x384xbf16>, vector<384x256xbf16>, vector<8x256xf32> -> vector<8x256xf32>
    %c0_3 = arith.constant 0 : index
    %c0_4 = arith.constant 0 : index
    %3 = vector.load %arg3[%c0_3, %c0_4] : memref<1x256xf32, #tpu.memory_space<vmem>>, vector<1x256xf32>
    %4 = vector.broadcast %3 : vector<1x256xf32> to vector<8x256xf32>
    %5 = arith.addf %2, %4 : vector<8x256xf32>
    %6 = tpu.iota {dimensions = array<i32: 1>} : vector<8x256xi32>
    %c128_i32 = arith.constant 128 : i32
    %7 = vector.broadcast %c128_i32 : i32 to vector<8x256xi32>
    %8 = arith.cmpi slt, %6, %7 : vector<8x256xi32>
    %cst_5 = arith.constant 0.000000e+00 : f32
    %9 = vector.broadcast %cst_5 : f32 to vector<8x256xf32>
    %10 = arith.maximumf %5, %9 : vector<8x256xf32>
    %11 = arith.select %8, %10, %5 : vector<8x256xi1>, vector<8x256xf32>
    %12 = arith.truncf %11 : vector<8x256xf32> to vector<8x256xbf16>
    %c0_6 = arith.constant 0 : index
    %c0_7 = arith.constant 0 : index
    %13 = vector.load %arg4[%c0_6, %c0_7] : memref<8x256xbf16, #tpu.memory_space<vmem>>, vector<8x256xbf16>
    tpu.vector_store %arg4[%c0_6, %c0_7], %12 {strides = array<i32>} : memref<8x256xbf16, #tpu.memory_space<vmem>>, vector<8x256xbf16>,
    return
  }
  func.func @transform_0(%arg0: i32) -> (i32, i32) {
    %c0_i32 = arith.constant 0 : i32
    %c0_i32_0 = arith.constant 0 : i32
    return %arg0, %c0_i32 : i32, i32
  }
  func.func @transform_1(%arg0: i32) -> (i32, i32) {
    %c0_i32 = arith.constant 0 : i32
    %c0_i32_0 = arith.constant 0 : i32
    %c0_i32_1 = arith.constant 0 : i32
    return %c0_i32, %c0_i32_0 : i32, i32
  }
  func.func @transform_2(%arg0: i32) -> (i32, i32) {
    %c0_i32 = arith.constant 0 : i32
    %c0_i32_0 = arith.constant 0 : i32
    %c0_i32_1 = arith.constant 0 : i32
    return %c0_i32, %c0_i32_0 : i32, i32
  }
  func.func @transform_3(%arg0: i32) -> (i32, i32) {
    %c0_i32 = arith.constant 0 : i32
    %c0_i32_0 = arith.constant 0 : i32
    return %arg0, %c0_i32 : i32, i32
  }
}

module attributes {stable_mosaic.version = 11 : i64} {
  func.func @_mm_res_kernel(%arg0: i32, %arg1: memref<8x640xbf16, #tpu.memory_space<vmem>>, %arg2: memref<640x128xbf16, #tpu.memory_space<vmem>>, %arg3: memref<1x128xf32, #tpu.memory_space<vmem>>, %arg4: memref<8x128xbf16, #tpu.memory_space<vmem>>, %arg5: memref<8x128xbf16, #tpu.memory_space<vmem>>) attributes {dimension_semantics = [#tpu.dimension_semantics<parallel>], iteration_bounds = array<i64: 1>, scalar_prefetch = 0 : i64, scratch_operands = 0 : i64, tpu.core_type = #tpu.core_type<tc>, window_params = [{transform_indices = @transform_0, window_bounds = array<i64: 8, 640>}, {pipeline_mode = #tpu.pipeline_mode<synchronous>, transform_indices = @transform_1, window_bounds = array<i64: 640, 128>}, {pipeline_mode = #tpu.pipeline_mode<synchronous>, transform_indices = @transform_2, window_bounds = array<i64: 1, 128>}, {transform_indices = @transform_3, window_bounds = array<i64: 8, 128>}, {transform_indices = @transform_4, window_bounds = array<i64: 8, 128>}]} {
    %c0 = arith.constant 0 : index
    %c0_0 = arith.constant 0 : index
    %0 = vector.load %arg1[%c0, %c0_0] : memref<8x640xbf16, #tpu.memory_space<vmem>>, vector<8x640xbf16>
    %c0_1 = arith.constant 0 : index
    %c0_2 = arith.constant 0 : index
    %1 = vector.load %arg2[%c0_1, %c0_2] : memref<640x128xbf16, #tpu.memory_space<vmem>>, vector<640x128xbf16>
    %cst = arith.constant dense<0.000000e+00> : vector<8x128xf32>
    %2 = tpu.matmul %0, %1, %cst {dimension_numbers = #tpu.dot_dimension_numbers<[1], [0], [0], [1], [0, 0, 1, 1], [], []>} : vector<8x640xbf16>, vector<640x128xbf16>, vector<8x128xf32> -> vector<8x128xf32>
    %c0_3 = arith.constant 0 : index
    %c0_4 = arith.constant 0 : index
    %3 = vector.load %arg3[%c0_3, %c0_4] : memref<1x128xf32, #tpu.memory_space<vmem>>, vector<1x128xf32>
    %4 = vector.broadcast %3 : vector<1x128xf32> to vector<8x128xf32>
    %5 = arith.addf %2, %4 : vector<8x128xf32>
    %c0_5 = arith.constant 0 : index
    %c0_6 = arith.constant 0 : index
    %6 = vector.load %arg4[%c0_5, %c0_6] : memref<8x128xbf16, #tpu.memory_space<vmem>>, vector<8x128xbf16>
    %7 = arith.extf %6 : vector<8x128xbf16> to vector<8x128xf32>
    %8 = arith.addf %5, %7 : vector<8x128xf32>
    %cst_7 = arith.constant 0.000000e+00 : f32
    %9 = vector.broadcast %cst_7 : f32 to vector<8x128xf32>
    %10 = arith.maximumf %8, %9 : vector<8x128xf32>
    %11 = arith.truncf %10 : vector<8x128xf32> to vector<8x128xbf16>
    %c0_8 = arith.constant 0 : index
    %c0_9 = arith.constant 0 : index
    %12 = vector.load %arg5[%c0_8, %c0_9] : memref<8x128xbf16, #tpu.memory_space<vmem>>, vector<8x128xbf16>
    tpu.vector_store %arg5[%c0_8, %c0_9], %11 {strides = array<i32>} : memref<8x128xbf16, #tpu.memory_space<vmem>>, vector<8x128xbf16>,
    return
  }
  func.func @transform_0(%arg0: i32) -> (i32, i32) {
    %c0_i32 = arith.constant 0 : i32
    %c0_i32_0 = arith.constant 0 : i32
    return %arg0, %c0_i32 : i32, i32
  }
  func.func @transform_1(%arg0: i32) -> (i32, i32) {
    %c0_i32 = arith.constant 0 : i32
    %c0_i32_0 = arith.constant 0 : i32
    %c0_i32_1 = arith.constant 0 : i32
    return %c0_i32, %c0_i32_0 : i32, i32
  }
  func.func @transform_2(%arg0: i32) -> (i32, i32) {
    %c0_i32 = arith.constant 0 : i32
    %c0_i32_0 = arith.constant 0 : i32
    %c0_i32_1 = arith.constant 0 : i32
    return %c0_i32, %c0_i32_0 : i32, i32
  }
  func.func @transform_3(%arg0: i32) -> (i32, i32) {
    %c0_i32 = arith.constant 0 : i32
    %c0_i32_0 = arith.constant 0 : i32
    return %arg0, %c0_i32 : i32, i32
  }
  func.func @transform_4(%arg0: i32) -> (i32, i32) {
    %c0_i32 = arith.constant 0 : i32
    %c0_i32_0 = arith.constant 0 : i32
    return %arg0, %c0_i32 : i32, i32
  }
}

module attributes {stable_mosaic.version = 11 : i64} {
  func.func @_mm_kernel(%arg0: i32, %arg1: memref<8x640xbf16, #tpu.memory_space<vmem>>, %arg2: memref<640x128xbf16, #tpu.memory_space<vmem>>, %arg3: memref<1x128xf32, #tpu.memory_space<vmem>>, %arg4: memref<8x128xbf16, #tpu.memory_space<vmem>>) attributes {dimension_semantics = [#tpu.dimension_semantics<parallel>], iteration_bounds = array<i64: 1>, scalar_prefetch = 0 : i64, scratch_operands = 0 : i64, tpu.core_type = #tpu.core_type<tc>, window_params = [{transform_indices = @transform_0, window_bounds = array<i64: 8, 640>}, {pipeline_mode = #tpu.pipeline_mode<synchronous>, transform_indices = @transform_1, window_bounds = array<i64: 640, 128>}, {pipeline_mode = #tpu.pipeline_mode<synchronous>, transform_indices = @transform_2, window_bounds = array<i64: 1, 128>}, {transform_indices = @transform_3, window_bounds = array<i64: 8, 128>}]} {
    %c0 = arith.constant 0 : index
    %c0_0 = arith.constant 0 : index
    %0 = vector.load %arg1[%c0, %c0_0] : memref<8x640xbf16, #tpu.memory_space<vmem>>, vector<8x640xbf16>
    %c0_1 = arith.constant 0 : index
    %c0_2 = arith.constant 0 : index
    %1 = vector.load %arg2[%c0_1, %c0_2] : memref<640x128xbf16, #tpu.memory_space<vmem>>, vector<640x128xbf16>
    %cst = arith.constant dense<0.000000e+00> : vector<8x128xf32>
    %2 = tpu.matmul %0, %1, %cst {dimension_numbers = #tpu.dot_dimension_numbers<[1], [0], [0], [1], [0, 0, 1, 1], [], []>} : vector<8x640xbf16>, vector<640x128xbf16>, vector<8x128xf32> -> vector<8x128xf32>
    %c0_3 = arith.constant 0 : index
    %c0_4 = arith.constant 0 : index
    %3 = vector.load %arg3[%c0_3, %c0_4] : memref<1x128xf32, #tpu.memory_space<vmem>>, vector<1x128xf32>
    %4 = vector.broadcast %3 : vector<1x128xf32> to vector<8x128xf32>
    %5 = arith.addf %2, %4 : vector<8x128xf32>
    %cst_5 = arith.constant 0.000000e+00 : f32
    %6 = vector.broadcast %cst_5 : f32 to vector<8x128xf32>
    %7 = arith.maximumf %5, %6 : vector<8x128xf32>
    %8 = arith.truncf %7 : vector<8x128xf32> to vector<8x128xbf16>
    %c0_6 = arith.constant 0 : index
    %c0_7 = arith.constant 0 : index
    %9 = vector.load %arg4[%c0_6, %c0_7] : memref<8x128xbf16, #tpu.memory_space<vmem>>, vector<8x128xbf16>
    tpu.vector_store %arg4[%c0_6, %c0_7], %8 {strides = array<i32>} : memref<8x128xbf16, #tpu.memory_space<vmem>>, vector<8x128xbf16>,
    return
  }
  func.func @transform_0(%arg0: i32) -> (i32, i32) {
    %c0_i32 = arith.constant 0 : i32
    %c0_i32_0 = arith.constant 0 : i32
    return %arg0, %c0_i32 : i32, i32
  }
  func.func @transform_1(%arg0: i32) -> (i32, i32) {
    %c0_i32 = arith.constant 0 : i32
    %c0_i32_0 = arith.constant 0 : i32
    %c0_i32_1 = arith.constant 0 : i32
    return %c0_i32, %c0_i32_0 : i32, i32
  }
  func.func @transform_2(%arg0: i32) -> (i32, i32) {
    %c0_i32 = arith.constant 0 : i32
    %c0_i32_0 = arith.constant 0 : i32
    %c0_i32_1 = arith.constant 0 : i32
    return %c0_i32, %c0_i32_0 : i32, i32
  }
  func.func @transform_3(%arg0: i32) -> (i32, i32) {
    %c0_i32 = arith.constant 0 : i32
    %c0_i32_0 = arith.constant 0 : i32
    return %arg0, %c0_i32 : i32, i32
  }
}

module attributes {stable_mosaic.version = 11 : i64} {
  func.func @_head_kernel(%arg0: i32, %arg1: memref<2x256xbf16, #tpu.memory_space<vmem>>, %arg2: memref<256x128xbf16, #tpu.memory_space<vmem>>, %arg3: memref<1x128xf32, #tpu.memory_space<vmem>>, %arg4: memref<128x128xbf16, #tpu.memory_space<vmem>>, %arg5: memref<1x128xf32, #tpu.memory_space<vmem>>, %arg6: memref<128x128xbf16, #tpu.memory_space<vmem>>, %arg7: memref<1x128xf32, #tpu.memory_space<vmem>>, %arg8: memref<2x128xf32, #tpu.memory_space<vmem>>) attributes {dimension_semantics = [#tpu.dimension_semantics<arbitrary>], iteration_bounds = array<i64: 1>, scalar_prefetch = 0 : i64, scratch_operands = 0 : i64, tpu.core_type = #tpu.core_type<tc>, window_params = [{pipeline_mode = #tpu.pipeline_mode<synchronous>, transform_indices = @transform_0, window_bounds = array<i64: 2, 256>}, {pipeline_mode = #tpu.pipeline_mode<synchronous>, transform_indices = @transform_1, window_bounds = array<i64: 256, 128>}, {pipeline_mode = #tpu.pipeline_mode<synchronous>, transform_indices = @transform_2, window_bounds = array<i64: 1, 128>}, {pipeline_mode = #tpu.pipeline_mode<synchronous>, transform_indices = @transform_3, window_bounds = array<i64: 128, 128>}, {pipeline_mode = #tpu.pipeline_mode<synchronous>, transform_indices = @transform_4, window_bounds = array<i64: 1, 128>}, {pipeline_mode = #tpu.pipeline_mode<synchronous>, transform_indices = @transform_5, window_bounds = array<i64: 128, 128>}, {pipeline_mode = #tpu.pipeline_mode<synchronous>, transform_indices = @transform_6, window_bounds = array<i64: 1, 128>}, {pipeline_mode = #tpu.pipeline_mode<synchronous>, transform_indices = @transform_7, window_bounds = array<i64: 2, 128>}]} {
    %c0 = arith.constant 0 : index
    %c0_0 = arith.constant 0 : index
    %0 = vector.load %arg1[%c0, %c0_0] : memref<2x256xbf16, #tpu.memory_space<vmem>>, vector<2x256xbf16>
    %c0_1 = arith.constant 0 : index
    %c0_2 = arith.constant 0 : index
    %1 = vector.load %arg2[%c0_1, %c0_2] : memref<256x128xbf16, #tpu.memory_space<vmem>>, vector<256x128xbf16>
    %cst = arith.constant dense<0.000000e+00> : vector<2x128xf32>
    %2 = tpu.matmul %0, %1, %cst {dimension_numbers = #tpu.dot_dimension_numbers<[1], [0], [0], [1], [0, 0, 1, 1], [], []>} : vector<2x256xbf16>, vector<256x128xbf16>, vector<2x128xf32> -> vector<2x128xf32>
    %c0_3 = arith.constant 0 : index
    %c0_4 = arith.constant 0 : index
    %3 = vector.load %arg3[%c0_3, %c0_4] : memref<1x128xf32, #tpu.memory_space<vmem>>, vector<1x128xf32>
    %4 = vector.broadcast %3 : vector<1x128xf32> to vector<2x128xf32>
    %5 = arith.addf %2, %4 : vector<2x128xf32>
    %cst_5 = arith.constant 0.000000e+00 : f32
    %6 = vector.broadcast %cst_5 : f32 to vector<2x128xf32>
    %7 = arith.maximumf %5, %6 : vector<2x128xf32>
    %8 = arith.truncf %7 : vector<2x128xf32> to vector<2x128xbf16>
    %c0_6 = arith.constant 0 : index
    %c0_7 = arith.constant 0 : index
    %9 = vector.load %arg4[%c0_6, %c0_7] : memref<128x128xbf16, #tpu.memory_space<vmem>>, vector<128x128xbf16>
    %cst_8 = arith.constant dense<0.000000e+00> : vector<2x128xf32>
    %10 = tpu.matmul %8, %9, %cst_8 {dimension_numbers = #tpu.dot_dimension_numbers<[1], [0], [0], [1], [0, 0, 1, 1], [], []>} : vector<2x128xbf16>, vector<128x128xbf16>, vector<2x128xf32> -> vector<2x128xf32>
    %c0_9 = arith.constant 0 : index
    %c0_10 = arith.constant 0 : index
    %11 = vector.load %arg5[%c0_9, %c0_10] : memref<1x128xf32, #tpu.memory_space<vmem>>, vector<1x128xf32>
    %12 = vector.broadcast %11 : vector<1x128xf32> to vector<2x128xf32>
    %13 = arith.addf %10, %12 : vector<2x128xf32>
    %cst_11 = arith.constant 0.000000e+00 : f32
    %14 = vector.broadcast %cst_11 : f32 to vector<2x128xf32>
    %15 = arith.maximumf %13, %14 : vector<2x128xf32>
    %16 = arith.truncf %15 : vector<2x128xf32> to vector<2x128xbf16>
    %c0_12 = arith.constant 0 : index
    %c0_13 = arith.constant 0 : index
    %17 = vector.load %arg6[%c0_12, %c0_13] : memref<128x128xbf16, #tpu.memory_space<vmem>>, vector<128x128xbf16>
    %cst_14 = arith.constant dense<0.000000e+00> : vector<2x128xf32>
    %18 = tpu.matmul %16, %17, %cst_14 {dimension_numbers = #tpu.dot_dimension_numbers<[1], [0], [0], [1], [0, 0, 1, 1], [], []>} : vector<2x128xbf16>, vector<128x128xbf16>, vector<2x128xf32> -> vector<2x128xf32>
    %c0_15 = arith.constant 0 : index
    %c0_16 = arith.constant 0 : index
    %19 = vector.load %arg7[%c0_15, %c0_16] : memref<1x128xf32, #tpu.memory_space<vmem>>, vector<1x128xf32>
    %20 = vector.broadcast %19 : vector<1x128xf32> to vector<2x128xf32>
    %21 = arith.addf %18, %20 : vector<2x128xf32>
    %c0_17 = arith.constant 0 : index
    %c0_18 = arith.constant 0 : index
    %22 = vector.load %arg8[%c0_17, %c0_18] : memref<2x128xf32, #tpu.memory_space<vmem>>, vector<2x128xf32>
    tpu.vector_store %arg8[%c0_17, %c0_18], %21 {strides = array<i32>} : memref<2x128xf32, #tpu.memory_space<vmem>>, vector<2x128xf32>,
    return
  }
  func.func @transform_0(%arg0: i32) -> (i32, i32) {
    %c0_i32 = arith.constant 0 : i32
    %c0_i32_0 = arith.constant 0 : i32
    %c0_i32_1 = arith.constant 0 : i32
    return %c0_i32, %c0_i32_0 : i32, i32
  }
  func.func @transform_1(%arg0: i32) -> (i32, i32) {
    %c0_i32 = arith.constant 0 : i32
    %c0_i32_0 = arith.constant 0 : i32
    %c0_i32_1 = arith.constant 0 : i32
    return %c0_i32, %c0_i32_0 : i32, i32
  }
  func.func @transform_2(%arg0: i32) -> (i32, i32) {
    %c0_i32 = arith.constant 0 : i32
    %c0_i32_0 = arith.constant 0 : i32
    %c0_i32_1 = arith.constant 0 : i32
    return %c0_i32, %c0_i32_0 : i32, i32
  }
  func.func @transform_3(%arg0: i32) -> (i32, i32) {
    %c0_i32 = arith.constant 0 : i32
    %c0_i32_0 = arith.constant 0 : i32
    %c0_i32_1 = arith.constant 0 : i32
    return %c0_i32, %c0_i32_0 : i32, i32
  }
  func.func @transform_4(%arg0: i32) -> (i32, i32) {
    %c0_i32 = arith.constant 0 : i32
    %c0_i32_0 = arith.constant 0 : i32
    %c0_i32_1 = arith.constant 0 : i32
    return %c0_i32, %c0_i32_0 : i32, i32
  }
  func.func @transform_5(%arg0: i32) -> (i32, i32) {
    %c0_i32 = arith.constant 0 : i32
    %c0_i32_0 = arith.constant 0 : i32
    %c0_i32_1 = arith.constant 0 : i32
    return %c0_i32, %c0_i32_0 : i32, i32
  }
  func.func @transform_6(%arg0: i32) -> (i32, i32) {
    %c0_i32 = arith.constant 0 : i32
    %c0_i32_0 = arith.constant 0 : i32
    %c0_i32_1 = arith.constant 0 : i32
    return %c0_i32, %c0_i32_0 : i32, i32
  }
  func.func @transform_7(%arg0: i32) -> (i32, i32) {
    %c0_i32 = arith.constant 0 : i32
    %c0_i32_0 = arith.constant 0 : i32
    %c0_i32_1 = arith.constant 0 : i32
    return %c0_i32, %c0_i32_0 : i32, i32
  }
}

</mosaic_0001>

<bundles_post_ra>
// kernel: _lambda_.34
= control target key start
LH: loop header
LB: loop body
LE: loop exit
PB: predicated region body
PF: predicated region fallthrough
CT: control target
= control target key end

     0   :  { %s2021_s12 = smov 0   ;;  %s2291_s0 = inlined_call_operand.vmem [shape: bf16[2048,256], index: 0, kind: input, shape index: {}]   ;;  %s2292_s1 = inlined_call_operand.vmem [shape: bf16[256,128], index: 1, kind: input, shape index: {}]   ;;  %s2293_s2 = inlined_call_operand.vmem [shape: f32[1,128], index: 2, kind: input, shape index: {}]   ;;  %s2294_s3 = inlined_call_operand.vmem [shape: bf16[2048,128], index: 3, kind: output, shape index: {}]  }
   0x1 LB: > { %s1426_s13 = sadd.s32 4294967295, %s1998_s12   ;;  %p1430_p0 = scmp.ge.s32.totalorder %s1998_s12, 1  ;;  %s1998_s12 = sphi %s2021_s12, %s13_s12  }
   0x2   : > { %p139_p1 = scmp.lt.s32.totalorder %s1998_s12, 5 }
   0x4   : > { %p140_p2 = pnand %p1430_p0, %p139_p1 }
   0x5   : > { %v1880_v0 = vld [vmem:[%s2292_s1] sm:$0xff] (!%p140_p2)   ;;  %v2000_v1 = vmov (!%p140_p2), 0   ;;  %s1431_s16 = sshll.u32 (!%p140_p2), %s1426_s13, 6  ;;  %v1881_v2 = vld [vmem:[%s2292_s1 + $0x8] sm:$0xff] (!%p140_p2)   ;;  %v1882_v3 = vld [vmem:[%s2292_s1 + $0x10] sm:$0xff] (!%p140_p2)  }
   0x6   : > { %143 = sbr.rel (%p140_p2) target bundleno = 411 (0x19b), region = 32  ;;  %697 = vmatprep.subr.bf16.mxu0 (!%p140_p2), %v2000_v1  ;;  %1839 = vmatprep.subr.bf16.mxu1 (!%p140_p2), %v2000_v1  ;;  %p165_p3 = scmp.lt.s32.totalorder (!%p140_p2), %s1431_s16, 255  ;;  %v1883_v4 = vld [vmem:[%s2292_s1 + $0x18] sm:$0xff] (!%p140_p2)   ;;  %v1884_v5 = vld [vmem:[%s2292_s1 + $0x20] sm:$0xff] (!%p140_p2)   ;;  %v1885_v7 = vld [vmem:[%s2292_s1 + $0x28] sm:$0xff] (!%p140_p2)  }
   0x7   : > { %698 = vmatpush1.bf16.msra.mxu0 (!%p140_p2), %v1880_v0  ;;  %1855 = vmatpush1.bf16.msra.mxu1 (!%p140_p2), %v1880_v0  ;;  %v1886_v9 = vld [vmem:[%s2292_s1 + $0x30] sm:$0xff] (!%p140_p2)   ;;  %v1887_v10 = vld [vmem:[%s2292_s1 + $0x38] sm:$0xff] (!%p140_p2)   ;;  %v1888_v11 = vld [vmem:[%s2292_s1 + $0x40] sm:$0xff] (!%p140_p2)  }
   0x8   : > { %699 = vmatprep.subr.bf16.mxu0 (!%p140_p2), %v2000_v1  ;;  %1840 = vmatprep.subr.bf16.mxu1 (!%p140_p2), %v2000_v1  ;;  %v1889_v12 = vld [vmem:[%s2292_s1 + $0x48] sm:$0xff] (!%p140_p2)   ;;  %v1890_v13 = vld [vmem:[%s2292_s1 + $0x50] sm:$0xff] (!%p140_p2)   ;;  %v1891_v14 = vld [vmem:[%s2292_s1 + $0x58] sm:$0xff] (!%p140_p2)  }
   0x9   : > { %v1892_v15 = vld [vmem:[%s2292_s1 + $0x60] sm:$0xff] (!%p140_p2)   ;;  %v1893_v16 = vld [vmem:[%s2292_s1 + $0x68] sm:$0xff] (!%p140_p2)   ;;  %v1894_v17 = vld [vmem:[%s2292_s1 + $0x70] sm:$0xff] (!%p140_p2)  }
   0xa   : > { %v1895_v18 = vld [vmem:[%s2292_s1 + $0x78] sm:$0xff] (!%p140_p2)  }
   0xb   : > { %700 = vmatpush1.bf16.msra.mxu0 (!%p140_p2), %v1881_v2  ;;  %1856 = vmatpush1.bf16.msra.mxu1 (!%p140_p2), %v1881_v2 }
   0xc   : > { %701 = vmatprep.subr.bf16.mxu0 (!%p140_p2), %v2000_v1  ;;  %1841 = vmatprep.subr.bf16.mxu1 (!%p140_p2), %v2000_v1 }
   0xd   : > { %s2296_s16 = smov (!%p165_p3, %s1431_s16), 255 }
   0xe   : > { %s1583_s23 = sshll.u32 %s2296_s16, 3  ;;  %s1435_s29 = sshll.u32 %s2296_s16, 2 }
   0xf   : > { %702 = vmatpush1.bf16.msra.mxu0 %v1882_v3  ;;  %1857 = vmatpush1.bf16.msra.mxu1 %v1882_v3  ;;  %s2058_s28 = scalar_lea.vmem %s2291_s0, %s1583_s23  ;;  %s2194_s4 = scalar_lea.vmem %s2294_s3, %s1435_s29 }
  0x10   : > { %703 = vmatprep.subr.bf16.mxu0 %v2000_v1  ;;  %1842 = vmatprep.subr.bf16.mxu1 %v2000_v1  ;;  %v1898_v6 = vld [vmem:[%s2058_s28 + $0x4] ss:$8 sps:$4 sm:$0xff]   ;;  %v1896_v19 = vld [vmem:[%s2058_s28] ss:$8 sps:$4 sm:$0xff]   ;;  %v1902_v21 = vld [vmem:[%s2058_s28 + $0x14] ss:$8 sps:$4 sm:$0xff]  }
  0x11   : > { %v1901_v8 = vld [vmem:[%s2058_s28 + $0x104] ss:$8 sps:$4 sm:$0xff]   ;;  %729 = vmatprep.mubr.bf16.mxu0 %v1898_v6  ;;  %v1899_v20 = vld [vmem:[%s2058_s28 + $0x100] ss:$8 sps:$4 sm:$0xff]   ;;  %v1904_v22 = vld [vmem:[%s2058_s28 + $0x114] ss:$8 sps:$4 sm:$0xff]  }
  0x12   : > { %857 = vmatprep.mubr.bf16.mxu1 %v1901_v8  ;;  %v1906_v23 = vld [vmem:[%s2058_s28 + $0x10] ss:$8 sps:$4 sm:$0xff]   ;;  %v1908_v25 = vld [vmem:[%s2058_s28 + $0x24] ss:$8 sps:$4 sm:$0xff]   ;;  %v1912_v27 = vld [vmem:[%s2058_s28 + $0x20] ss:$8 sps:$4 sm:$0xff]  }
  0x13   : > { %704 = vmatpush1.bf16.msra.mxu0 %v1883_v4  ;;  %1858 = vmatpush1.bf16.msra.mxu1 %v1883_v4  ;;  %v1907_v24 = vld [vmem:[%s2058_s28 + $0x110] ss:$8 sps:$4 sm:$0xff]   ;;  %v1910_v26 = vld [vmem:[%s2058_s28 + $0x124] ss:$8 sps:$4 sm:$0xff]   ;;  %v1913_v28 = vld [vmem:[%s2058_s28 + $0x120] ss:$8 sps:$4 sm:$0xff]  }
  0x14   : > { %705 = vmatprep.subr.bf16.mxu0 %v2000_v1  ;;  %1843 = vmatprep.subr.bf16.mxu1 %v2000_v1  ;;  %v1914_v29 = vld [vmem:[%s2058_s28 + $0x34] ss:$8 sps:$4 sm:$0xff]   ;;  %v1918_v31 = vld [vmem:[%s2058_s28 + $0x30] ss:$8 sps:$4 sm:$0xff]   ;;  %v1920_v33 = vld [vmem:[%s2058_s28 + $0x44] ss:$8 sps:$4 sm:$0xff]  }
  0x15   : > { %v1916_v30 = vld [vmem:[%s2058_s28 + $0x134] ss:$8 sps:$4 sm:$0xff]   ;;  %v1919_v32 = vld [vmem:[%s2058_s28 + $0x130] ss:$8 sps:$4 sm:$0xff]   ;;  %v1922_v34 = vld [vmem:[%s2058_s28 + $0x144] ss:$8 sps:$4 sm:$0xff]  }
  0x16   : > { %v1924_v35 = vld [vmem:[%s2058_s28 + $0x40] ss:$8 sps:$4 sm:$0xff]   ;;  %v1926_v37 = vld [vmem:[%s2058_s28 + $0x54] ss:$8 sps:$4 sm:$0xff]   ;;  %v1930_v39 = vld [vmem:[%s2058_s28 + $0x50] ss:$8 sps:$4 sm:$0xff]  }
  0x17   : > { %706 = vmatpush1.bf16.msra.mxu0 %v1884_v5  ;;  %1859 = vmatpush1.bf16.msra.mxu1 %v1884_v5  ;;  %v1925_v36 = vld [vmem:[%s2058_s28 + $0x140] ss:$8 sps:$4 sm:$0xff]   ;;  %v1928_v38 = vld [vmem:[%s2058_s28 + $0x154] ss:$8 sps:$4 sm:$0xff]   ;;  %v1931_v40 = vld [vmem:[%s2058_s28 + $0x150] ss:$8 sps:$4 sm:$0xff]  }
  0x18   : > { %707 = vmatprep.subr.bf16.mxu0 %v2000_v1  ;;  %1844 = vmatprep.subr.bf16.mxu1 %v2000_v1  ;;  %v1932_v41 = vld [vmem:[%s2058_s28 + $0x64] ss:$8 sps:$4 sm:$0xff]   ;;  %v1936_v43 = vld [vmem:[%s2058_s28 + $0x60] ss:$8 sps:$4 sm:$0xff]   ;;  %v1938_v45 = vld [vmem:[%s2058_s28 + $0x74] ss:$8 sps:$4 sm:$0xff]  }
  0x19   : > { %v1934_v42 = vld [vmem:[%s2058_s28 + $0x164] ss:$8 sps:$4 sm:$0xff]   ;;  %v1937_v44 = vld [vmem:[%s2058_s28 + $0x160] ss:$8 sps:$4 sm:$0xff]   ;;  %v1940_v46 = vld [vmem:[%s2058_s28 + $0x174] ss:$8 sps:$4 sm:$0xff]  }
  0x1a   : > { %v1942_v47 = vld [vmem:[%s2058_s28 + $0x70] ss:$8 sps:$4 sm:$0xff]   ;;  %v1944_v49 = vld [vmem:[%s2058_s28 + $0x84] ss:$8 sps:$4 sm:$0xff]   ;;  %v1948_v51 = vld [vmem:[%s2058_s28 + $0x80] ss:$8 sps:$4 sm:$0xff]  }
  0x1b   : > { %708 = vmatpush1.bf16.msra.mxu0 %v1885_v7  ;;  %1860 = vmatpush1.bf16.msra.mxu1 %v1885_v7  ;;  %v1943_v48 = vld [vmem:[%s2058_s28 + $0x170] ss:$8 sps:$4 sm:$0xff]   ;;  %v1946_v50 = vld [vmem:[%s2058_s28 + $0x184] ss:$8 sps:$4 sm:$0xff]   ;;  %v1949_v52 = vld [vmem:[%s2058_s28 + $0x180] ss:$8 sps:$4 sm:$0xff]  }
  0x1c   : > { %709 = vmatprep.subr.bf16.mxu0 %v2000_v1  ;;  %1845 = vmatprep.subr.bf16.mxu1 %v2000_v1  ;;  %v1950_v53 = vld [vmem:[%s2058_s28 + $0x94] ss:$8 sps:$4 sm:$0xff]   ;;  %v1954_v55 = vld [vmem:[%s2058_s28 + $0x90] ss:$8 sps:$4 sm:$0xff]   ;;  %v1956_v57 = vld [vmem:[%s2058_s28 + $0xa4] ss:$8 sps:$4 sm:$0xff]  }
  0x1d   : > { %v1952_v54 = vld [vmem:[%s2058_s28 + $0x194] ss:$8 sps:$4 sm:$0xff]   ;;  %v1955_v56 = vld [vmem:[%s2058_s28 + $0x190] ss:$8 sps:$4 sm:$0xff]   ;;  %v1958_v58 = vld [vmem:[%s2058_s28 + $0x1a4] ss:$8 sps:$4 sm:$0xff]  }
  0x1e   : > { %v1960_v59 = vld [vmem:[%s2058_s28 + $0xa0] ss:$8 sps:$4 sm:$0xff]   ;;  %v1962_v61 = vld [vmem:[%s2058_s28 + $0xb4] ss:$8 sps:$4 sm:$0xff]   ;;  %v1966_v63 = vld [vmem:[%s2058_s28 + $0xb0] ss:$8 sps:$4 sm:$0xff]  }
  0x1f   : > { %710 = vmatpush1.bf16.msra.mxu0 %v1886_v9  ;;  %1861 = vmatpush1.bf16.msra.mxu1 %v1886_v9  ;;  %v1961_v60 = vld [vmem:[%s2058_s28 + $0x1a0] ss:$8 sps:$4 sm:$0xff]   ;;  %v1964_v62 = vld [vmem:[%s2058_s28 + $0x1b4] ss:$8 sps:$4 sm:$0xff]   ;;  %v1967_v0 = vld [vmem:[%s2058_s28 + $0x1b0] ss:$8 sps:$4 sm:$0xff]  }
  0x20   : > { %711 = vmatprep.subr.bf16.mxu0 %v2000_v1  ;;  %1846 = vmatprep.subr.bf16.mxu1 %v2000_v1  ;;  %v1970_v2 = vld [vmem:[%s2058_s28 + $0x1c4] ss:$8 sps:$4 sm:$0xff]   ;;  %v1972_v3 = vld [vmem:[%s2058_s28 + $0xc0] ss:$8 sps:$4 sm:$0xff]   ;;  %v1974_v5 = vld [vmem:[%s2058_s28 + $0xd4] ss:$8 sps:$4 sm:$0xff]  }
  0x21   : > { %v1973_v4 = vld [vmem:[%s2058_s28 + $0x1c0] ss:$8 sps:$4 sm:$0xff]   ;;  %v1976_v6 = vld [vmem:[%s2058_s28 + $0x1d4] ss:$8 sps:$4 sm:$0xff]   ;;  %v1978_v7 = vld [vmem:[%s2058_s28 + $0xd0] ss:$8 sps:$4 sm:$0xff]  }
  0x22   : > { %v1979_v8 = vld [vmem:[%s2058_s28 + $0x1d0] ss:$8 sps:$4 sm:$0xff]   ;;  %v1980_v9 = vld [vmem:[%s2058_s28 + $0xe4] ss:$8 sps:$4 sm:$0xff]  }
  0x23   : > { %712 = vmatpush1.bf16.msra.mxu0 %v1887_v10  ;;  %1862 = vmatpush1.bf16.msra.mxu1 %v1887_v10  ;;  %v1982_v10 = vld [vmem:[%s2058_s28 + $0x1e4] ss:$8 sps:$4 sm:$0xff]  }
  0x24   : > { %713 = vmatprep.subr.bf16.mxu0 %v2000_v1  ;;  %1847 = vmatprep.subr.bf16.mxu1 %v2000_v1 }
  0x27   : > { %714 = vmatpush1.bf16.msra.mxu0 %v1888_v11  ;;  %1863 = vmatpush1.bf16.msra.mxu1 %v1888_v11  ;;  %v1984_v11 = vld [vmem:[%s2058_s28 + $0xe0] ss:$8 sps:$4 sm:$0xff]  }
  0x28   : > { %715 = vmatprep.subr.bf16.mxu0 %v2000_v1  ;;  %1848 = vmatprep.subr.bf16.mxu1 %v2000_v1 }
  0x2b   : > { %716 = vmatpush1.bf16.msra.mxu0 %v1889_v12  ;;  %1864 = vmatpush1.bf16.msra.mxu1 %v1889_v12  ;;  %v1985_v12 = vld [vmem:[%s2058_s28 + $0x1e0] ss:$8 sps:$4 sm:$0xff]  }
  0x2c   : > { %717 = vmatprep.subr.bf16.mxu0 %v2000_v1  ;;  %1849 = vmatprep.subr.bf16.mxu1 %v2000_v1 }
  0x2f   : > { %718 = vmatpush1.bf16.msra.mxu0 %v1890_v13  ;;  %1865 = vmatpush1.bf16.msra.mxu1 %v1890_v13  ;;  %v1986_v13 = vld [vmem:[%s2058_s28 + $0xf4] ss:$8 sps:$4 sm:$0xff]  }
  0x30   : > { %719 = vmatprep.subr.bf16.mxu0 %v2000_v1  ;;  %1850 = vmatprep.subr.bf16.mxu1 %v2000_v1 }
  0x33   : > { %720 = vmatpush1.bf16.msra.mxu0 %v1891_v14  ;;  %1866 = vmatpush1.bf16.msra.mxu1 %v1891_v14  ;;  %v1988_v14 = vld [vmem:[%s2058_s28 + $0x1f4] ss:$8 sps:$4 sm:$0xff]  }
  0x34   : > { %721 = vmatprep.subr.bf16.mxu0 %v2000_v1  ;;  %1851 = vmatprep.subr.bf16.mxu1 %v2000_v1 }
  0x37   : > { %722 = vmatpush1.bf16.msra.mxu0 %v1892_v15  ;;  %1867 = vmatpush1.bf16.msra.mxu1 %v1892_v15  ;;  %v1990_v15 = vld [vmem:[%s2058_s28 + $0xf0] ss:$8 sps:$4 sm:$0xff]  }
  0x38   : > { %723 = vmatprep.subr.bf16.mxu0 %v2000_v1  ;;  %1852 = vmatprep.subr.bf16.mxu1 %v2000_v1 }
  0x3b   : > { %724 = vmatpush1.bf16.msra.mxu0 %v1893_v16  ;;  %1868 = vmatpush1.bf16.msra.mxu1 %v1893_v16  ;;  %v1991_v16 = vld [vmem:[%s2058_s28 + $0x1f0] ss:$8 sps:$4 sm:$0xff]  }
  0x3c   : > { %725 = vmatprep.subr.bf16.mxu0 %v2000_v1  ;;  %1853 = vmatprep.subr.bf16.mxu1 %v2000_v1 }
  0x3f   : > { %726 = vmatpush1.bf16.msra.mxu0 %v1894_v17  ;;  %1869 = vmatpush1.bf16.msra.mxu1 %v1894_v17  ;;  %v2184_v17 = vld [vmem:[%s2293_s2] ss:$0 sm:$0xff] }
  0x40   : > { %727 = vmatprep.subr.bf16.mxu0 %v2000_v1  ;;  %1854 = vmatprep.subr.bf16.mxu1 %v2000_v1  ;;  %v1968_v1 = vld [vmem:[%s2058_s28 + $0xc4] ss:$8 sps:$4 sm:$0xff]  }
  0x43   : > { %728 = vmatpush1.bf16.msra.mxu0 %v1895_v18  ;;  %1870 = vmatpush1.bf16.msra.mxu1 %v1895_v18 }
  0x46   : > { %730 = vmatmul.mubr.bf16.vlgmr.msra.gmra.mrb[0].mxu0 %v1896_v19  ;;  %858 = vmatmul.mubr.bf16.vlgmr.msra.gmra.mrb[0].mxu1 %v1899_v20 }
  0x47   : > { %737 = vmatprep.mubr.bf16.mxu0 %v1902_v21  ;;  %865 = vmatprep.mubr.bf16.mxu1 %v1904_v22 }
  0x4e   : > { %738 = vmatmul.mubr.bf16.gmra.mrb[4].mxu0 %v1906_v23  ;;  %866 = vmatmul.mubr.bf16.gmra.mrb[4].mxu1 %v1907_v24 }
  0x4f   : > { %745 = vmatprep.mubr.bf16.mxu0 %v1908_v25  ;;  %873 = vmatprep.mubr.bf16.mxu1 %v1910_v26 }
  0x56   : > { %746 = vmatmul.mubr.bf16.gmra.mrb[8].mxu0 %v1912_v27  ;;  %874 = vmatmul.mubr.bf16.gmra.mrb[8].mxu1 %v1913_v28 }
  0x57   : > { %753 = vmatprep.mubr.bf16.mxu0 %v1914_v29  ;;  %881 = vmatprep.mubr.bf16.mxu1 %v1916_v30 }
  0x5e   : > { %754 = vmatmul.mubr.bf16.gmra.mrb[12].mxu0 %v1918_v31  ;;  %882 = vmatmul.mubr.bf16.gmra.mrb[12].mxu1 %v1919_v32 }
  0x5f   : > { %761 = vmatprep.mubr.bf16.mxu0 %v1920_v33  ;;  %889 = vmatprep.mubr.bf16.mxu1 %v1922_v34 }
  0x66   : > { %762 = vmatmul.mubr.bf16.gmra.mrb[16].mxu0 %v1924_v35  ;;  %890 = vmatmul.mubr.bf16.gmra.mrb[16].mxu1 %v1925_v36 }
  0x67   : > { %769 = vmatprep.mubr.bf16.mxu0 %v1926_v37  ;;  %897 = vmatprep.mubr.bf16.mxu1 %v1928_v38 }
  0x6e   : > { %770 = vmatmul.mubr.bf16.gmra.mrb[20].mxu0 %v1930_v39  ;;  %898 = vmatmul.mubr.bf16.gmra.mrb[20].mxu1 %v1931_v40 }
  0x6f   : > { %777 = vmatprep.mubr.bf16.mxu0 %v1932_v41  ;;  %905 = vmatprep.mubr.bf16.mxu1 %v1934_v42 }
  0x76   : > { %778 = vmatmul.mubr.bf16.gmra.mrb[24].mxu0 %v1936_v43  ;;  %906 = vmatmul.mubr.bf16.gmra.mrb[24].mxu1 %v1937_v44 }
  0x77   : > { %785 = vmatprep.mubr.bf16.mxu0 %v1938_v45  ;;  %913 = vmatprep.mubr.bf16.mxu1 %v1940_v46 }
  0x7e   : > { %786 = vmatmul.mubr.bf16.gmra.mrb[28].mxu0 %v1942_v47  ;;  %914 = vmatmul.mubr.bf16.gmra.mrb[28].mxu1 %v1943_v48 }
  0x7f   : > { %793 = vmatprep.mubr.bf16.mxu0 %v1944_v49  ;;  %921 = vmatprep.mubr.bf16.mxu1 %v1946_v50 }
  0x86   : > { %794 = vmatmul.mubr.bf16.gmra.mrb[32].mxu0 %v1948_v51  ;;  %922 = vmatmul.mubr.bf16.gmra.mrb[32].mxu1 %v1949_v52 }
  0x87   : > { %801 = vmatprep.mubr.bf16.mxu0 %v1950_v53  ;;  %929 = vmatprep.mubr.bf16.mxu1 %v1952_v54 }
  0x8e   : > { %802 = vmatmul.mubr.bf16.gmra.mrb[36].mxu0 %v1954_v55  ;;  %930 = vmatmul.mubr.bf16.gmra.mrb[36].mxu1 %v1955_v56 }
  0x8f   : > { %809 = vmatprep.mubr.bf16.mxu0 %v1956_v57  ;;  %937 = vmatprep.mubr.bf16.mxu1 %v1958_v58 }
  0x96   : > { %810 = vmatmul.mubr.bf16.gmra.mrb[40].mxu0 %v1960_v59  ;;  %938 = vmatmul.mubr.bf16.gmra.mrb[40].mxu1 %v1961_v60 }
  0x97   : > { %817 = vmatprep.mubr.bf16.mxu0 %v1962_v61  ;;  %945 = vmatprep.mubr.bf16.mxu1 %v1964_v62 }
  0x9e   : > { %818 = vmatmul.mubr.bf16.gmra.mrb[44].mxu0 %v1966_v63  ;;  %946 = vmatmul.mubr.bf16.gmra.mrb[44].mxu1 %v1967_v0 }
  0x9f   : > { %825 = vmatprep.mubr.bf16.mxu0 %v1968_v1  ;;  %953 = vmatprep.mubr.bf16.mxu1 %v1970_v2 }
  0xa6   : > { %826 = vmatmul.mubr.bf16.gmra.mrb[48].mxu0 %v1972_v3  ;;  %954 = vmatmul.mubr.bf16.gmra.mrb[48].mxu1 %v1973_v4 }
  0xa7   : > { %833 = vmatprep.mubr.bf16.mxu0 %v1974_v5  ;;  %961 = vmatprep.mubr.bf16.mxu1 %v1976_v6 }
  0xae   : > { %834 = vmatmul.mubr.bf16.gmra.mrb[52].mxu0 %v1978_v7  ;;  %962 = vmatmul.mubr.bf16.gmra.mrb[52].mxu1 %v1979_v8 }
  0xaf   : > { %841 = vmatprep.mubr.bf16.mxu0 %v1980_v9  ;;  %969 = vmatprep.mubr.bf16.mxu1 %v1982_v10 }
  0xb6   : > { %842 = vmatmul.mubr.bf16.gmra.mrb[56].mxu0 %v1984_v11  ;;  %970 = vmatmul.mubr.bf16.gmra.mrb[56].mxu1 %v1985_v12 }
  0xb7   : > { %849 = vmatprep.mubr.bf16.mxu0 %v1986_v13  ;;  %977 = vmatprep.mubr.bf16.mxu1 %v1988_v14 }
  0xbe   : > { %850 = vmatmul.mubr.bf16.gmra.mrb[60].mxu0 %v1990_v15  ;;  %978 = vmatmul.mubr.bf16.gmra.mrb[60].mxu1 %v1991_v16 }
 0x119   : > { %v731_v18 = vpop.f32.mrb[0].mxu0  ;;  %v859_v19 = vpop.f32.mrb[0].mxu1 }
 0x11a   : > { %v732_v20 = vadd.f32 %v2184_v17, %v731_v18  ;;  %v860_v21 = vadd.f32 %v2184_v17, %v859_v19  ;;  %v733_v22 = vpop.f32.mrb[1].mxu0  ;;  %v861_v23 = vpop.f32.mrb[1].mxu1 }
 0x11b   : > { %v734_v24 = vpop.f32.mrb[2].mxu0  ;;  %v862_v25 = vpop.f32.mrb[2].mxu1 }
 0x11c   : > { %v735_v26 = vadd.f32 %v2184_v17, %v734_v24  ;;  %v863_v27 = vadd.f32 %v2184_v17, %v862_v25  ;;  %v736_v28 = vpop.f32.mrb[3].mxu0  ;;  %v864_v29 = vpop.f32.mrb[3].mxu1  ;;  %v986_v30 = vmax.f32 %v732_v20, 0.0  ;;  %v1018_v31 = vmax.f32 %v860_v21, 0.0 }
 0x11e   : > { %v987_v32 = vmax.f32 %v735_v26, 0.0  ;;  %v1019_v33 = vmax.f32 %v863_v27, 0.0 }
 0x120   : > { %v1651_v34 = vpack.c.bf16 %v987_v32, %v986_v30  ;;  %v1731_v35 = vpack.c.bf16 %v1019_v33, %v1018_v31 }
 0x121   : > { %v739_v36 = vpop.f32.mrb[4].mxu0  ;;  %v867_v37 = vpop.f32.mrb[4].mxu1 }
 0x122   : > { %1652 = vst [vmem:[%s2194_s4] sm:$0xff] %v1651_v34   ;;  %1823 = vst [vmem:[%s2194_s4 + $0x80] sm:$0xff] %v1731_v35   ;;  %v740_v38 = vadd.f32 %v2184_v17, %v739_v36  ;;  %v868_v39 = vadd.f32 %v2184_v17, %v867_v37  ;;  %v741_v40 = vpop.f32.mrb[5].mxu0  ;;  %v869_v41 = vpop.f32.mrb[5].mxu1 }
 0x123   : > { %v742_v42 = vpop.f32.mrb[6].mxu0  ;;  %v870_v43 = vpop.f32.mrb[6].mxu1 }
 0x124   : > { %v743_v44 = vadd.f32 %v2184_v17, %v742_v42  ;;  %v871_v45 = vadd.f32 %v2184_v17, %v870_v43  ;;  %v744_v46 = vpop.f32.mrb[7].mxu0  ;;  %v872_v47 = vpop.f32.mrb[7].mxu1  ;;  %v988_v48 = vmax.f32 %v740_v38, 0.0  ;;  %v1020_v49 = vmax.f32 %v868_v39, 0.0 }
 0x126   : > { %v989_v50 = vmax.f32 %v743_v44, 0.0  ;;  %v1021_v51 = vmax.f32 %v871_v45, 0.0 }
 0x128   : > { %v1656_v52 = vpack.c.bf16 %v989_v50, %v988_v48  ;;  %v1736_v53 = vpack.c.bf16 %v1021_v51, %v1020_v49 }
 0x129   : > { %v747_v54 = vpop.f32.mrb[8].mxu0  ;;  %v875_v55 = vpop.f32.mrb[8].mxu1 }
 0x12a   : > { %1808 = vst [vmem:[%s2194_s4 + $0x8] sm:$0xff] %v1656_v52   ;;  %1824 = vst [vmem:[%s2194_s4 + $0x88] sm:$0xff] %v1736_v53   ;;  %v748_v56 = vadd.f32 %v2184_v17, %v747_v54  ;;  %v876_v57 = vadd.f32 %v2184_v17, %v875_v55  ;;  %v749_v58 = vpop.f32.mrb[9].mxu0  ;;  %v877_v59 = vpop.f32.mrb[9].mxu1 }
 0x12b   : > { %v750_v60 = vpop.f32.mrb[10].mxu0  ;;  %v878_v61 = vpop.f32.mrb[10].mxu1 }
 0x12c   : > { %v751_v62 = vadd.f32 %v2184_v17, %v750_v60  ;;  %v879_v63 = vadd.f32 %v2184_v17, %v878_v61  ;;  %v752_v0 = vpop.f32.mrb[11].mxu0  ;;  %v880_v1 = vpop.f32.mrb[11].mxu1  ;;  %v990_v2 = vmax.f32 %v748_v56, 0.0  ;;  %v1022_v3 = vmax.f32 %v876_v57, 0.0 }
 0x12e   : > { %v991_v4 = vmax.f32 %v751_v62, 0.0  ;;  %v1023_v5 = vmax.f32 %v879_v63, 0.0 }
 0x130   : > { %v1661_v6 = vpack.c.bf16 %v991_v4, %v990_v2  ;;  %v1741_v7 = vpack.c.bf16 %v1023_v5, %v1022_v3 }
 0x131   : > { %v755_v8 = vpop.f32.mrb[12].mxu0  ;;  %v883_v9 = vpop.f32.mrb[12].mxu1 }
 0x132   : > { %1809 = vst [vmem:[%s2194_s4 + $0x10] sm:$0xff] %v1661_v6   ;;  %1825 = vst [vmem:[%s2194_s4 + $0x90] sm:$0xff] %v1741_v7   ;;  %v756_v10 = vadd.f32 %v2184_v17, %v755_v8  ;;  %v884_v11 = vadd.f32 %v2184_v17, %v883_v9  ;;  %v757_v12 = vpop.f32.mrb[13].mxu0  ;;  %v885_v13 = vpop.f32.mrb[13].mxu1 }
 0x133   : > { %v758_v14 = vpop.f32.mrb[14].mxu0  ;;  %v886_v15 = vpop.f32.mrb[14].mxu1 }
 0x134   : > { %v759_v16 = vadd.f32 %v2184_v17, %v758_v14  ;;  %v887_v18 = vadd.f32 %v2184_v17, %v886_v15  ;;  %v760_v19 = vpop.f32.mrb[15].mxu0  ;;  %v888_v20 = vpop.f32.mrb[15].mxu1  ;;  %v992_v21 = vmax.f32 %v756_v10, 0.0  ;;  %v1024_v22 = vmax.f32 %v884_v11, 0.0 }
 0x136   : > { %v993_v23 = vmax.f32 %v759_v16, 0.0  ;;  %v1025_v24 = vmax.f32 %v887_v18, 0.0 }
 0x138   : > { %v1666_v25 = vpack.c.bf16 %v993_v23, %v992_v21  ;;  %v1746_v26 = vpack.c.bf16 %v1025_v24, %v1024_v22 }
 0x139   : > { %v763_v27 = vpop.f32.mrb[16].mxu0  ;;  %v891_v28 = vpop.f32.mrb[16].mxu1 }
 0x13a   : > { %1810 = vst [vmem:[%s2194_s4 + $0x18] sm:$0xff] %v1666_v25   ;;  %1826 = vst [vmem:[%s2194_s4 + $0x98] sm:$0xff] %v1746_v26   ;;  %v764_v29 = vadd.f32 %v2184_v17, %v763_v27  ;;  %v892_v30 = vadd.f32 %v2184_v17, %v891_v28  ;;  %v765_v31 = vpop.f32.mrb[17].mxu0  ;;  %v893_v32 = vpop.f32.mrb[17].mxu1 }
 0x13b   : > { %v766_v33 = vpop.f32.mrb[18].mxu0  ;;  %v894_v34 = vpop.f32.mrb[18].mxu1 }
 0x13c   : > { %v767_v35 = vadd.f32 %v2184_v17, %v766_v33  ;;  %v895_v36 = vadd.f32 %v2184_v17, %v894_v34  ;;  %v768_v37 = vpop.f32.mrb[19].mxu0  ;;  %v896_v38 = vpop.f32.mrb[19].mxu1  ;;  %v994_v39 = vmax.f32 %v764_v29, 0.0  ;;  %v1026_v40 = vmax.f32 %v892_v30, 0.0 }
 0x13e   : > { %v995_v41 = vmax.f32 %v767_v35, 0.0  ;;  %v1027_v42 = vmax.f32 %v895_v36, 0.0 }
 0x140   : > { %v1671_v43 = vpack.c.bf16 %v995_v41, %v994_v39  ;;  %v1751_v44 = vpack.c.bf16 %v1027_v42, %v1026_v40 }
 0x141   : > { %v771_v45 = vpop.f32.mrb[20].mxu0  ;;  %v899_v46 = vpop.f32.mrb[20].mxu1 }
 0x142   : > { %1811 = vst [vmem:[%s2194_s4 + $0x20] sm:$0xff] %v1671_v43   ;;  %1827 = vst [vmem:[%s2194_s4 + $0xa0] sm:$0xff] %v1751_v44   ;;  %v772_v47 = vadd.f32 %v2184_v17, %v771_v45  ;;  %v900_v48 = vadd.f32 %v2184_v17, %v899_v46  ;;  %v773_v49 = vpop.f32.mrb[21].mxu0  ;;  %v901_v50 = vpop.f32.mrb[21].mxu1 }
 0x143   : > { %v774_v51 = vpop.f32.mrb[22].mxu0  ;;  %v902_v52 = vpop.f32.mrb[22].mxu1 }
 0x144   : > { %v775_v53 = vadd.f32 %v2184_v17, %v774_v51  ;;  %v903_v54 = vadd.f32 %v2184_v17, %v902_v52  ;;  %v776_v55 = vpop.f32.mrb[23].mxu0  ;;  %v904_v56 = vpop.f32.mrb[23].mxu1  ;;  %v996_v57 = vmax.f32 %v772_v47, 0.0  ;;  %v1028_v58 = vmax.f32 %v900_v48, 0.0 }
 0x146   : > { %v997_v59 = vmax.f32 %v775_v53, 0.0  ;;  %v1029_v60 = vmax.f32 %v903_v54, 0.0 }
 0x148   : > { %v1676_v61 = vpack.c.bf16 %v997_v59, %v996_v57  ;;  %v1756_v62 = vpack.c.bf16 %v1029_v60, %v1028_v58 }
 0x149   : > { %v779_v63 = vpop.f32.mrb[24].mxu0  ;;  %v907_v0 = vpop.f32.mrb[24].mxu1 }
 0x14a   : > { %1812 = vst [vmem:[%s2194_s4 + $0x28] sm:$0xff] %v1676_v61   ;;  %1828 = vst [vmem:[%s2194_s4 + $0xa8] sm:$0xff] %v1756_v62   ;;  %v780_v1 = vadd.f32 %v2184_v17, %v779_v63  ;;  %v908_v2 = vadd.f32 %v2184_v17, %v907_v0  ;;  %v781_v3 = vpop.f32.mrb[25].mxu0  ;;  %v909_v4 = vpop.f32.mrb[25].mxu1 }
 0x14b   : > { %v782_v5 = vpop.f32.mrb[26].mxu0  ;;  %v910_v6 = vpop.f32.mrb[26].mxu1 }
 0x14c   : > { %v783_v7 = vadd.f32 %v2184_v17, %v782_v5  ;;  %v911_v8 = vadd.f32 %v2184_v17, %v910_v6  ;;  %v784_v9 = vpop.f32.mrb[27].mxu0  ;;  %v912_v10 = vpop.f32.mrb[27].mxu1  ;;  %v998_v11 = vmax.f32 %v780_v1, 0.0  ;;  %v1030_v12 = vmax.f32 %v908_v2, 0.0 }
 0x14e   : > { %v999_v13 = vmax.f32 %v783_v7, 0.0  ;;  %v1031_v14 = vmax.f32 %v911_v8, 0.0 }
 0x150   : > { %v1681_v15 = vpack.c.bf16 %v999_v13, %v998_v11  ;;  %v1761_v16 = vpack.c.bf16 %v1031_v14, %v1030_v12 }
 0x151   : > { %v787_v18 = vpop.f32.mrb[28].mxu0  ;;  %v915_v19 = vpop.f32.mrb[28].mxu1 }
 0x152   : > { %1813 = vst [vmem:[%s2194_s4 + $0x30] sm:$0xff] %v1681_v15   ;;  %1829 = vst [vmem:[%s2194_s4 + $0xb0] sm:$0xff] %v1761_v16   ;;  %v788_v20 = vadd.f32 %v2184_v17, %v787_v18  ;;  %v916_v21 = vadd.f32 %v2184_v17, %v915_v19  ;;  %v789_v22 = vpop.f32.mrb[29].mxu0  ;;  %v917_v23 = vpop.f32.mrb[29].mxu1 }
 0x153   : > { %v790_v24 = vpop.f32.mrb[30].mxu0  ;;  %v918_v25 = vpop.f32.mrb[30].mxu1 }
 0x154   : > { %v791_v26 = vadd.f32 %v2184_v17, %v790_v24  ;;  %v919_v27 = vadd.f32 %v2184_v17, %v918_v25  ;;  %v792_v28 = vpop.f32.mrb[31].mxu0  ;;  %v920_v29 = vpop.f32.mrb[31].mxu1  ;;  %v1000_v30 = vmax.f32 %v788_v20, 0.0  ;;  %v1032_v31 = vmax.f32 %v916_v21, 0.0 }
 0x156   : > { %v1001_v32 = vmax.f32 %v791_v26, 0.0  ;;  %v1033_v33 = vmax.f32 %v919_v27, 0.0 }
 0x158   : > { %v1686_v34 = vpack.c.bf16 %v1001_v32, %v1000_v30  ;;  %v1766_v35 = vpack.c.bf16 %v1033_v33, %v1032_v31 }
 0x159   : > { %v795_v36 = vpop.f32.mrb[32].mxu0  ;;  %v923_v37 = vpop.f32.mrb[32].mxu1 }
 0x15a   : > { %1814 = vst [vmem:[%s2194_s4 + $0x38] sm:$0xff] %v1686_v34   ;;  %1830 = vst [vmem:[%s2194_s4 + $0xb8] sm:$0xff] %v1766_v35   ;;  %v796_v38 = vadd.f32 %v2184_v17, %v795_v36  ;;  %v924_v39 = vadd.f32 %v2184_v17, %v923_v37  ;;  %v797_v40 = vpop.f32.mrb[33].mxu0  ;;  %v925_v41 = vpop.f32.mrb[33].mxu1 }
 0x15b   : > { %v798_v42 = vpop.f32.mrb[34].mxu0  ;;  %v926_v43 = vpop.f32.mrb[34].mxu1 }
 0x15c   : > { %v799_v44 = vadd.f32 %v2184_v17, %v798_v42  ;;  %v927_v45 = vadd.f32 %v2184_v17, %v926_v43  ;;  %v800_v46 = vpop.f32.mrb[35].mxu0  ;;  %v928_v47 = vpop.f32.mrb[35].mxu1  ;;  %v1002_v48 = vmax.f32 %v796_v38, 0.0  ;;  %v1034_v49 = vmax.f32 %v924_v39, 0.0 }
 0x15e   : > { %v1003_v50 = vmax.f32 %v799_v44, 0.0  ;;  %v1035_v51 = vmax.f32 %v927_v45, 0.0 }
 0x160   : > { %v1691_v52 = vpack.c.bf16 %v1003_v50, %v1002_v48  ;;  %v1771_v53 = vpack.c.bf16 %v1035_v51, %v1034_v49 }
 0x161   : > { %v803_v54 = vpop.f32.mrb[36].mxu0  ;;  %v931_v55 = vpop.f32.mrb[36].mxu1 }
 0x162   : > { %1815 = vst [vmem:[%s2194_s4 + $0x40] sm:$0xff] %v1691_v52   ;;  %1831 = vst [vmem:[%s2194_s4 + $0xc0] sm:$0xff] %v1771_v53   ;;  %v804_v56 = vadd.f32 %v2184_v17, %v803_v54  ;;  %v932_v57 = vadd.f32 %v2184_v17, %v931_v55  ;;  %v805_v58 = vpop.f32.mrb[37].mxu0  ;;  %v933_v59 = vpop.f32.mrb[37].mxu1 }
 0x163   : > { %v806_v60 = vpop.f32.mrb[38].mxu0  ;;  %v934_v61 = vpop.f32.mrb[38].mxu1 }
 0x164   : > { %v807_v62 = vadd.f32 %v2184_v17, %v806_v60  ;;  %v935_v63 = vadd.f32 %v2184_v17, %v934_v61  ;;  %v808_v0 = vpop.f32.mrb[39].mxu0  ;;  %v936_v1 = vpop.f32.mrb[39].mxu1  ;;  %v1004_v2 = vmax.f32 %v804_v56, 0.0  ;;  %v1036_v3 = vmax.f32 %v932_v57, 0.0 }
 0x166   : > { %v1005_v4 = vmax.f32 %v807_v62, 0.0  ;;  %v1037_v5 = vmax.f32 %v935_v63, 0.0 }
 0x168   : > { %v1696_v6 = vpack.c.bf16 %v1005_v4, %v1004_v2  ;;  %v1776_v7 = vpack.c.bf16 %v1037_v5, %v1036_v3 }
 0x169   : > { %v811_v8 = vpop.f32.mrb[40].mxu0  ;;  %v939_v9 = vpop.f32.mrb[40].mxu1 }
 0x16a   : > { %1816 = vst [vmem:[%s2194_s4 + $0x48] sm:$0xff] %v1696_v6   ;;  %1832 = vst [vmem:[%s2194_s4 + $0xc8] sm:$0xff] %v1776_v7   ;;  %v812_v10 = vadd.f32 %v2184_v17, %v811_v8  ;;  %v940_v11 = vadd.f32 %v2184_v17, %v939_v9  ;;  %v813_v12 = vpop.f32.mrb[41].mxu0  ;;  %v941_v13 = vpop.f32.mrb[41].mxu1 }
 0x16b   : > { %v814_v14 = vpop.f32.mrb[42].mxu0  ;;  %v942_v15 = vpop.f32.mrb[42].mxu1 }
 0x16c   : > { %v815_v16 = vadd.f32 %v2184_v17, %v814_v14  ;;  %v943_v18 = vadd.f32 %v2184_v17, %v942_v15  ;;  %v816_v19 = vpop.f32.mrb[43].mxu0  ;;  %v944_v20 = vpop.f32.mrb[43].mxu1  ;;  %v1006_v21 = vmax.f32 %v812_v10, 0.0  ;;  %v1038_v22 = vmax.f32 %v940_v11, 0.0 }
 0x16e   : > { %v1007_v23 = vmax.f32 %v815_v16, 0.0  ;;  %v1039_v24 = vmax.f32 %v943_v18, 0.0 }
 0x170   : > { %v1701_v25 = vpack.c.bf16 %v1007_v23, %v1006_v21  ;;  %v1781_v26 = vpack.c.bf16 %v1039_v24, %v1038_v22 }
 0x171   : > { %v819_v27 = vpop.f32.mrb[44].mxu0  ;;  %v947_v28 = vpop.f32.mrb[44].mxu1 }
 0x172   : > { %1817 = vst [vmem:[%s2194_s4 + $0x50] sm:$0xff] %v1701_v25   ;;  %1833 = vst [vmem:[%s2194_s4 + $0xd0] sm:$0xff] %v1781_v26   ;;  %v820_v29 = vadd.f32 %v2184_v17, %v819_v27  ;;  %v948_v30 = vadd.f32 %v2184_v17, %v947_v28  ;;  %v821_v31 = vpop.f32.mrb[45].mxu0  ;;  %v949_v32 = vpop.f32.mrb[45].mxu1 }
 0x173   : > { %v822_v33 = vpop.f32.mrb[46].mxu0  ;;  %v950_v34 = vpop.f32.mrb[46].mxu1 }
 0x174   : > { %v823_v35 = vadd.f32 %v2184_v17, %v822_v33  ;;  %v951_v36 = vadd.f32 %v2184_v17, %v950_v34  ;;  %v824_v37 = vpop.f32.mrb[47].mxu0  ;;  %v952_v38 = vpop.f32.mrb[47].mxu1  ;;  %v1008_v39 = vmax.f32 %v820_v29, 0.0  ;;  %v1040_v40 = vmax.f32 %v948_v30, 0.0 }
 0x176   : > { %v1009_v41 = vmax.f32 %v823_v35, 0.0  ;;  %v1041_v42 = vmax.f32 %v951_v36, 0.0 }
 0x178   : > { %v1706_v43 = vpack.c.bf16 %v1009_v41, %v1008_v39  ;;  %v1786_v44 = vpack.c.bf16 %v1041_v42, %v1040_v40 }
 0x179   : > { %v827_v45 = vpop.f32.mrb[48].mxu0  ;;  %v955_v46 = vpop.f32.mrb[48].mxu1 }
 0x17a   : > { %1818 = vst [vmem:[%s2194_s4 + $0x58] sm:$0xff] %v1706_v43   ;;  %1834 = vst [vmem:[%s2194_s4 + $0xd8] sm:$0xff] %v1786_v44   ;;  %v828_v47 = vadd.f32 %v2184_v17, %v827_v45  ;;  %v956_v48 = vadd.f32 %v2184_v17, %v955_v46  ;;  %v829_v49 = vpop.f32.mrb[49].mxu0  ;;  %v957_v50 = vpop.f32.mrb[49].mxu1 }
 0x17b   : > { %v830_v51 = vpop.f32.mrb[50].mxu0  ;;  %v958_v52 = vpop.f32.mrb[50].mxu1 }
 0x17c   : > { %v831_v53 = vadd.f32 %v2184_v17, %v830_v51  ;;  %v959_v54 = vadd.f32 %v2184_v17, %v958_v52  ;;  %v832_v55 = vpop.f32.mrb[51].mxu0  ;;  %v960_v56 = vpop.f32.mrb[51].mxu1  ;;  %v1010_v57 = vmax.f32 %v828_v47, 0.0  ;;  %v1042_v58 = vmax.f32 %v956_v48, 0.0 }
 0x17e   : > { %v1011_v59 = vmax.f32 %v831_v53, 0.0  ;;  %v1043_v60 = vmax.f32 %v959_v54, 0.0 }
 0x180   : > { %v1711_v61 = vpack.c.bf16 %v1011_v59, %v1010_v57  ;;  %v1791_v62 = vpack.c.bf16 %v1043_v60, %v1042_v58 }
 0x181   : > { %v835_v63 = vpop.f32.mrb[52].mxu0  ;;  %v963_v0 = vpop.f32.mrb[52].mxu1 }
 0x182   : > { %1819 = vst [vmem:[%s2194_s4 + $0x60] sm:$0xff] %v1711_v61   ;;  %1835 = vst [vmem:[%s2194_s4 + $0xe0] sm:$0xff] %v1791_v62   ;;  %v836_v1 = vadd.f32 %v2184_v17, %v835_v63  ;;  %v964_v2 = vadd.f32 %v2184_v17, %v963_v0  ;;  %v837_v3 = vpop.f32.mrb[53].mxu0  ;;  %v965_v4 = vpop.f32.mrb[53].mxu1 }
 0x183   : > { %v838_v5 = vpop.f32.mrb[54].mxu0  ;;  %v966_v6 = vpop.f32.mrb[54].mxu1 }
 0x184   : > { %v839_v7 = vadd.f32 %v2184_v17, %v838_v5  ;;  %v967_v8 = vadd.f32 %v2184_v17, %v966_v6  ;;  %v840_v9 = vpop.f32.mrb[55].mxu0  ;;  %v968_v10 = vpop.f32.mrb[55].mxu1  ;;  %v1012_v11 = vmax.f32 %v836_v1, 0.0  ;;  %v1044_v12 = vmax.f32 %v964_v2, 0.0 }
 0x186   : > { %v1013_v13 = vmax.f32 %v839_v7, 0.0  ;;  %v1045_v14 = vmax.f32 %v967_v8, 0.0 }
 0x188   : > { %v1716_v15 = vpack.c.bf16 %v1013_v13, %v1012_v11  ;;  %v1796_v16 = vpack.c.bf16 %v1045_v14, %v1044_v12 }
 0x189   : > { %v843_v18 = vpop.f32.mrb[56].mxu0  ;;  %v971_v19 = vpop.f32.mrb[56].mxu1 }
 0x18a   : > { %1820 = vst [vmem:[%s2194_s4 + $0x68] sm:$0xff] %v1716_v15   ;;  %1836 = vst [vmem:[%s2194_s4 + $0xe8] sm:$0xff] %v1796_v16   ;;  %v844_v20 = vadd.f32 %v2184_v17, %v843_v18  ;;  %v972_v21 = vadd.f32 %v2184_v17, %v971_v19  ;;  %v845_v22 = vpop.f32.mrb[57].mxu0  ;;  %v973_v23 = vpop.f32.mrb[57].mxu1 }
 0x18b   : > { %v846_v24 = vpop.f32.mrb[58].mxu0  ;;  %v974_v25 = vpop.f32.mrb[58].mxu1 }
 0x18c   : > { %v847_v26 = vadd.f32 %v2184_v17, %v846_v24  ;;  %v975_v27 = vadd.f32 %v2184_v17, %v974_v25  ;;  %v848_v28 = vpop.f32.mrb[59].mxu0  ;;  %v976_v29 = vpop.f32.mrb[59].mxu1  ;;  %v1014_v30 = vmax.f32 %v844_v20, 0.0  ;;  %v1046_v31 = vmax.f32 %v972_v21, 0.0 }
 0x18e   : > { %v1015_v32 = vmax.f32 %v847_v26, 0.0  ;;  %v1047_v33 = vmax.f32 %v975_v27, 0.0 }
 0x190   : > { %v1721_v34 = vpack.c.bf16 %v1015_v32, %v1014_v30  ;;  %v1801_v35 = vpack.c.bf16 %v1047_v33, %v1046_v31 }
 0x191   : > { %v851_v36 = vpop.f32.mrb[60].mxu0  ;;  %v979_v37 = vpop.f32.mrb[60].mxu1 }
 0x192   : > { %1821 = vst [vmem:[%s2194_s4 + $0x70] sm:$0xff] %v1721_v34   ;;  %1837 = vst [vmem:[%s2194_s4 + $0xf0] sm:$0xff] %v1801_v35   ;;  %v852_v38 = vadd.f32 %v2184_v17, %v851_v36  ;;  %v980_v39 = vadd.f32 %v2184_v17, %v979_v37  ;;  %v853_v40 = vpop.f32.mrb[61].mxu0  ;;  %v981_v41 = vpop.f32.mrb[61].mxu1 }
 0x193   : > { %v854_v42 = vpop.f32.mrb[62].mxu0  ;;  %v982_v43 = vpop.f32.mrb[62].mxu1 }
 0x194   : > { %v855_v44 = vadd.f32 %v2184_v17, %v854_v42  ;;  %v983_v45 = vadd.f32 %v2184_v17, %v982_v43  ;;  %v856_v46 = vpop.f32.mrb[63].mxu0  ;;  %v984_v47 = vpop.f32.mrb[63].mxu1  ;;  %v1016_v48 = vmax.f32 %v852_v38, 0.0  ;;  %v1048_v49 = vmax.f32 %v980_v39, 0.0 }
 0x196   : > { %v1017_v50 = vmax.f32 %v855_v44, 0.0  ;;  %v1049_v51 = vmax.f32 %v983_v45, 0.0 }
 0x198   : > { %v1726_v52 = vpack.c.bf16 %v1017_v50, %v1016_v48  ;;  %v1806_v53 = vpack.c.bf16 %v1049_v51, %v1048_v49 }
 0x19a   : > { %1822 = vst [vmem:[%s2194_s4 + $0x78] sm:$0xff] %v1726_v52   ;;  %1838 = vst [vmem:[%s2194_s4 + $0xf8] sm:$0xff] %v1806_v53  }
 0x19b PF: > { %s13_s12 = sadd.s32 1, %s1998_s12  }
 0x19c   : > { %p10_p4 = scmp.ge.s32.totalorder %s13_s12, 6  }
 0x19e   :  { %12 = sbr.rel (!%p10_p4) target bundleno = 1 (0x1), region = 62 }

// kernel: _lambda_.35
= control target key start
LH: loop header
LB: loop body
LE: loop exit
PB: predicated region body
PF: predicated region fallthrough
CT: control target
= control target key end

     0   :  { %s1126_s12 = smov 0   ;;  %s1247_s0 = inlined_call_operand.vmem [shape: bf16[512,128], index: 0, kind: input, shape index: {}]   ;;  %s1248_s1 = inlined_call_operand.vmem [shape: bf16[128,128], index: 1, kind: input, shape index: {}]   ;;  %s1249_s2 = inlined_call_operand.vmem [shape: f32[1,128], index: 2, kind: input, shape index: {}]   ;;  %s1250_s3 = inlined_call_operand.vmem [shape: bf16[512,128], index: 3, kind: output, shape index: {}]  }
   0x1 LB: > { %s783_s13 = sadd.s32 4294967295, %s1104_s12   ;;  %p787_p0 = scmp.ge.s32.totalorder %s1104_s12, 1  ;;  %s1104_s12 = sphi %s1126_s12, %s13_s12  }
   0x2   : > { %p138_p1 = scmp.lt.s32.totalorder %s1104_s12, 3 }
   0x4   : > { %p139_p2 = pnand %p787_p0, %p138_p1 }
   0x5   : > { %v1074_v0 = vld [vmem:[%s1248_s1] sm:$0xff] (!%p139_p2)   ;;  %s788_s16 = sshll.u32 (!%p139_p2), %s783_s13, 5  ;;  %v1075_v1 = vld [vmem:[%s1248_s1 + $0x8] sm:$0xff] (!%p139_p2)   ;;  %v1076_v2 = vld [vmem:[%s1248_s1 + $0x10] sm:$0xff] (!%p139_p2)  }
   0x6   : > { %142 = sbr.rel (%p139_p2) target bundleno = 284 (0x11c), region = 32  ;;  %p163_p3 = scmp.lt.s32.totalorder (!%p139_p2), %s788_s16, 63  ;;  %1002 = vmatprep.subr.bf16.mxu0 (!%p139_p2), %v1074_v0  ;;  %1050 = vmatprep.subr.bf16.mxu1 (!%p139_p2), %v1074_v0  ;;  %v1077_v3 = vld [vmem:[%s1248_s1 + $0x18] sm:$0xff] (!%p139_p2)   ;;  %v1078_v6 = vld [vmem:[%s1248_s1 + $0x20] sm:$0xff] (!%p139_p2)   ;;  %v1079_v7 = vld [vmem:[%s1248_s1 + $0x28] sm:$0xff] (!%p139_p2)  }
   0x7   : > { %1003 = vmatpush3.bf16.msra.mxu0 (!%p139_p2), %v1074_v0  ;;  %1058 = vmatpush3.bf16.msra.mxu1 (!%p139_p2), %v1074_v0  ;;  %v1080_v8 = vld [vmem:[%s1248_s1 + $0x30] sm:$0xff] (!%p139_p2)   ;;  %v1081_v9 = vld [vmem:[%s1248_s1 + $0x38] sm:$0xff] (!%p139_p2)   ;;  %v1187_v24 = vld [vmem:[%s1249_s2] ss:$0 sm:$0xff] (!%p139_p2) }
   0x8   : > { %1004 = vmatprep.subr.bf16.mxu0 (!%p139_p2), %v1075_v1  ;;  %1051 = vmatprep.subr.bf16.mxu1 (!%p139_p2), %v1075_v1 }
   0xb   : > { %1005 = vmatpush3.bf16.msra.mxu0 (!%p139_p2), %v1075_v1  ;;  %1059 = vmatpush3.bf16.msra.mxu1 (!%p139_p2), %v1075_v1 }
   0xc   : > { %1006 = vmatprep.subr.bf16.mxu0 (!%p139_p2), %v1076_v2  ;;  %1052 = vmatprep.subr.bf16.mxu1 (!%p139_p2), %v1076_v2 }
   0xd   : > { %s1252_s16 = smov (!%p163_p3, %s788_s16), 63 }
   0xe   : > { %s789_s21 = sshll.u32 %s1252_s16, 2 }
   0xf   : > { %s1151_s24 = scalar_lea.vmem %s1247_s0, %s789_s21  ;;  %1007 = vmatpush3.bf16.msra.mxu0 %v1076_v2  ;;  %1060 = vmatpush3.bf16.msra.mxu1 %v1076_v2  ;;  %s1202_s13 = scalar_lea.vmem %s1250_s3, %s789_s21 }
  0x10   : > { %v1082_v4 = vld [vmem:[%s1151_s24] sm:$0xff]   ;;  %1008 = vmatprep.subr.bf16.mxu0 %v1077_v3  ;;  %1053 = vmatprep.subr.bf16.mxu1 %v1077_v3  ;;  %v1084_v10 = vld [vmem:[%s1151_s24 + $0x8] sm:$0xff]   ;;  %v1086_v12 = vld [vmem:[%s1151_s24 + $0x10] sm:$0xff]  }
  0x11   : > { %v1083_v5 = vld [vmem:[%s1151_s24 + $0x40] sm:$0xff]   ;;  %1018 = vmatprep.mubr.bf16.mxu0 %v1082_v4  ;;  %v1085_v11 = vld [vmem:[%s1151_s24 + $0x48] sm:$0xff]   ;;  %v1087_v13 = vld [vmem:[%s1151_s24 + $0x50] sm:$0xff]  }
  0x12   : > { %1034 = vmatprep.mubr.bf16.mxu1 %v1083_v5  ;;  %v1088_v14 = vld [vmem:[%s1151_s24 + $0x18] sm:$0xff]   ;;  %v1090_v16 = vld [vmem:[%s1151_s24 + $0x20] sm:$0xff]   ;;  %v1092_v18 = vld [vmem:[%s1151_s24 + $0x28] sm:$0xff]  }
  0x13   : > { %1009 = vmatpush3.bf16.msra.mxu0 %v1077_v3  ;;  %1061 = vmatpush3.bf16.msra.mxu1 %v1077_v3  ;;  %v1089_v15 = vld [vmem:[%s1151_s24 + $0x58] sm:$0xff]   ;;  %v1091_v17 = vld [vmem:[%s1151_s24 + $0x60] sm:$0xff]   ;;  %v1093_v19 = vld [vmem:[%s1151_s24 + $0x68] sm:$0xff]  }
  0x14   : > { %1010 = vmatprep.subr.bf16.mxu0 %v1078_v6  ;;  %1054 = vmatprep.subr.bf16.mxu1 %v1078_v6  ;;  %v1094_v20 = vld [vmem:[%s1151_s24 + $0x30] sm:$0xff]   ;;  %v1096_v22 = vld [vmem:[%s1151_s24 + $0x38] sm:$0xff]  }
  0x15   : > { %v1095_v21 = vld [vmem:[%s1151_s24 + $0x70] sm:$0xff]   ;;  %v1097_v23 = vld [vmem:[%s1151_s24 + $0x78] sm:$0xff]  }
  0x17   : > { %1011 = vmatpush3.bf16.msra.mxu0 %v1078_v6  ;;  %1062 = vmatpush3.bf16.msra.mxu1 %v1078_v6 }
  0x18   : > { %1012 = vmatprep.subr.bf16.mxu0 %v1079_v7  ;;  %1055 = vmatprep.subr.bf16.mxu1 %v1079_v7 }
  0x1b   : > { %1013 = vmatpush3.bf16.msra.mxu0 %v1079_v7  ;;  %1063 = vmatpush3.bf16.msra.mxu1 %v1079_v7 }
  0x1c   : > { %1014 = vmatprep.subr.bf16.mxu0 %v1080_v8  ;;  %1056 = vmatprep.subr.bf16.mxu1 %v1080_v8 }
  0x1f   : > { %1015 = vmatpush3.bf16.msra.mxu0 %v1080_v8  ;;  %1064 = vmatpush3.bf16.msra.mxu1 %v1080_v8 }
  0x20   : > { %1016 = vmatprep.subr.bf16.mxu0 %v1081_v9  ;;  %1057 = vmatprep.subr.bf16.mxu1 %v1081_v9 }
  0x23   : > { %1017 = vmatpush3.bf16.msra.mxu0 %v1081_v9  ;;  %1065 = vmatpush3.bf16.msra.mxu1 %v1081_v9 }
  0x26   : > { %1019 = vmatmul.mubr.bf16.vlgmr.msra.gmra.mrb[0].mxu0 %v1084_v10  ;;  %1035 = vmatmul.mubr.bf16.vlgmr.msra.gmra.mrb[0].mxu1 %v1085_v11 }
  0x27   : > { %1022 = vmatprep.mubr.bf16.mxu0 %v1086_v12  ;;  %1038 = vmatprep.mubr.bf16.mxu1 %v1087_v13 }
  0x2e   : > { %1023 = vmatmul.mubr.bf16.gmra.mrb[4].mxu0 %v1088_v14  ;;  %1039 = vmatmul.mubr.bf16.gmra.mrb[4].mxu1 %v1089_v15 }
  0x2f   : > { %1026 = vmatprep.mubr.bf16.mxu0 %v1090_v16  ;;  %1042 = vmatprep.mubr.bf16.mxu1 %v1091_v17 }
  0x36   : > { %1027 = vmatmul.mubr.bf16.gmra.mrb[8].mxu0 %v1092_v18  ;;  %1043 = vmatmul.mubr.bf16.gmra.mrb[8].mxu1 %v1093_v19 }
  0x37   : > { %1030 = vmatprep.mubr.bf16.mxu0 %v1094_v20  ;;  %1046 = vmatprep.mubr.bf16.mxu1 %v1095_v21 }
  0x3e   : > { %1031 = vmatmul.mubr.bf16.gmra.mrb[12].mxu0 %v1096_v22  ;;  %1047 = vmatmul.mubr.bf16.gmra.mrb[12].mxu1 %v1097_v23 }
  0xf9   : > { %v1020_v25 = vpop.f32.mrb[0].mxu0  ;;  %v1036_v26 = vpop.f32.mrb[0].mxu1 }
  0xfa   : > { %v417_v27 = vadd.f32 %v1020_v25, %v1187_v24  ;;  %v481_v28 = vadd.f32 %v1036_v26, %v1187_v24  ;;  %v408_v29 = vpop.f32.mrb[1].mxu0  ;;  %v472_v30 = vpop.f32.mrb[1].mxu1 }
  0xfb   : > { %v409_v31 = vadd.f32 %v1187_v24, %v408_v29  ;;  %v473_v32 = vadd.f32 %v1187_v24, %v472_v30  ;;  %v1021_v33 = vpop.f32.mrb[2].mxu0  ;;  %v1037_v34 = vpop.f32.mrb[2].mxu1 }
  0xfc   : > { %v420_v35 = vadd.f32 %v1021_v33, %v1187_v24  ;;  %v484_v36 = vadd.f32 %v1037_v34, %v1187_v24  ;;  %v411_v37 = vpop.f32.mrb[3].mxu0  ;;  %v475_v38 = vpop.f32.mrb[3].mxu1  ;;  %v537_v41 = vmax.f32 %v417_v27, 0.0  ;;  %v553_v42 = vmax.f32 %v481_v28, 0.0 }
  0xfd   : > { %v412_v39 = vadd.f32 %v1187_v24, %v411_v37  ;;  %v476_v40 = vadd.f32 %v1187_v24, %v475_v38  ;;  %v535_v45 = vmax.f32 %v409_v31, 0.0  ;;  %v551_v46 = vmax.f32 %v473_v32, 0.0 }
  0xfe   : > { %v538_v43 = vmax.f32 %v420_v35, 0.0  ;;  %v554_v44 = vmax.f32 %v484_v36, 0.0 }
  0xff   : > { %v536_v47 = vmax.f32 %v412_v39, 0.0  ;;  %v552_v48 = vmax.f32 %v476_v40, 0.0 }
 0x100   : > { %v891_v49 = vpack.c.bf16 %v538_v43, %v537_v41  ;;  %v931_v50 = vpack.c.bf16 %v554_v44, %v553_v42 }
 0x101   : > { %v886_v51 = vpack.c.bf16 %v536_v47, %v535_v45  ;;  %v926_v52 = vpack.c.bf16 %v552_v48, %v551_v46  ;;  %v1024_v53 = vpop.f32.mrb[4].mxu0  ;;  %v1040_v54 = vpop.f32.mrb[4].mxu1 }
 0x102   : > { %963 = vst [vmem:[%s1202_s13 + $0x8] sm:$0xff] %v891_v49   ;;  %971 = vst [vmem:[%s1202_s13 + $0x48] sm:$0xff] %v931_v50   ;;  %v433_v55 = vadd.f32 %v1024_v53, %v1187_v24  ;;  %v497_v56 = vadd.f32 %v1040_v54, %v1187_v24  ;;  %v424_v57 = vpop.f32.mrb[5].mxu0  ;;  %v488_v58 = vpop.f32.mrb[5].mxu1 }
 0x103   : > { %887 = vst [vmem:[%s1202_s13] sm:$0xff] %v886_v51   ;;  %970 = vst [vmem:[%s1202_s13 + $0x40] sm:$0xff] %v926_v52   ;;  %v425_v59 = vadd.f32 %v1187_v24, %v424_v57  ;;  %v489_v60 = vadd.f32 %v1187_v24, %v488_v58  ;;  %v1025_v61 = vpop.f32.mrb[6].mxu0  ;;  %v1041_v62 = vpop.f32.mrb[6].mxu1 }
 0x104   : > { %v436_v63 = vadd.f32 %v1025_v61, %v1187_v24  ;;  %v500_v0 = vadd.f32 %v1041_v62, %v1187_v24  ;;  %v427_v1 = vpop.f32.mrb[7].mxu0  ;;  %v491_v2 = vpop.f32.mrb[7].mxu1  ;;  %v541_v5 = vmax.f32 %v433_v55, 0.0  ;;  %v557_v6 = vmax.f32 %v497_v56, 0.0 }
 0x105   : > { %v428_v3 = vadd.f32 %v1187_v24, %v427_v1  ;;  %v492_v4 = vadd.f32 %v1187_v24, %v491_v2  ;;  %v539_v9 = vmax.f32 %v425_v59, 0.0  ;;  %v555_v10 = vmax.f32 %v489_v60, 0.0 }
 0x106   : > { %v542_v7 = vmax.f32 %v436_v63, 0.0  ;;  %v558_v8 = vmax.f32 %v500_v0, 0.0 }
 0x107   : > { %v540_v11 = vmax.f32 %v428_v3, 0.0  ;;  %v556_v12 = vmax.f32 %v492_v4, 0.0 }
 0x108   : > { %v901_v13 = vpack.c.bf16 %v542_v7, %v541_v5  ;;  %v941_v14 = vpack.c.bf16 %v558_v8, %v557_v6 }
 0x109   : > { %v896_v15 = vpack.c.bf16 %v540_v11, %v539_v9  ;;  %v936_v16 = vpack.c.bf16 %v556_v12, %v555_v10  ;;  %v1028_v17 = vpop.f32.mrb[8].mxu0  ;;  %v1044_v18 = vpop.f32.mrb[8].mxu1 }
 0x10a   : > { %965 = vst [vmem:[%s1202_s13 + $0x18] sm:$0xff] %v901_v13   ;;  %973 = vst [vmem:[%s1202_s13 + $0x58] sm:$0xff] %v941_v14   ;;  %v449_v19 = vadd.f32 %v1028_v17, %v1187_v24  ;;  %v513_v20 = vadd.f32 %v1044_v18, %v1187_v24  ;;  %v440_v21 = vpop.f32.mrb[9].mxu0  ;;  %v504_v22 = vpop.f32.mrb[9].mxu1 }
 0x10b   : > { %964 = vst [vmem:[%s1202_s13 + $0x10] sm:$0xff] %v896_v15   ;;  %972 = vst [vmem:[%s1202_s13 + $0x50] sm:$0xff] %v936_v16   ;;  %v441_v23 = vadd.f32 %v1187_v24, %v440_v21  ;;  %v505_v25 = vadd.f32 %v1187_v24, %v504_v22  ;;  %v1029_v26 = vpop.f32.mrb[10].mxu0  ;;  %v1045_v27 = vpop.f32.mrb[10].mxu1 }
 0x10c   : > { %v452_v28 = vadd.f32 %v1029_v26, %v1187_v24  ;;  %v516_v29 = vadd.f32 %v1045_v27, %v1187_v24  ;;  %v443_v30 = vpop.f32.mrb[11].mxu0  ;;  %v507_v31 = vpop.f32.mrb[11].mxu1  ;;  %v545_v34 = vmax.f32 %v449_v19, 0.0  ;;  %v561_v35 = vmax.f32 %v513_v20, 0.0 }
 0x10d   : > { %v444_v32 = vadd.f32 %v1187_v24, %v443_v30  ;;  %v508_v33 = vadd.f32 %v1187_v24, %v507_v31  ;;  %v543_v38 = vmax.f32 %v441_v23, 0.0  ;;  %v559_v39 = vmax.f32 %v505_v25, 0.0 }
 0x10e   : > { %v546_v36 = vmax.f32 %v452_v28, 0.0  ;;  %v562_v37 = vmax.f32 %v516_v29, 0.0 }
 0x10f   : > { %v544_v40 = vmax.f32 %v444_v32, 0.0  ;;  %v560_v41 = vmax.f32 %v508_v33, 0.0 }
 0x110   : > { %v911_v42 = vpack.c.bf16 %v546_v36, %v545_v34  ;;  %v951_v43 = vpack.c.bf16 %v562_v37, %v561_v35 }
 0x111   : > { %v906_v44 = vpack.c.bf16 %v544_v40, %v543_v38  ;;  %v946_v45 = vpack.c.bf16 %v560_v41, %v559_v39  ;;  %v1032_v46 = vpop.f32.mrb[12].mxu0  ;;  %v1048_v47 = vpop.f32.mrb[12].mxu1 }
 0x112   : > { %967 = vst [vmem:[%s1202_s13 + $0x28] sm:$0xff] %v911_v42   ;;  %975 = vst [vmem:[%s1202_s13 + $0x68] sm:$0xff] %v951_v43   ;;  %v465_v48 = vadd.f32 %v1032_v46, %v1187_v24  ;;  %v529_v49 = vadd.f32 %v1048_v47, %v1187_v24  ;;  %v456_v50 = vpop.f32.mrb[13].mxu0  ;;  %v520_v51 = vpop.f32.mrb[13].mxu1 }
 0x113   : > { %966 = vst [vmem:[%s1202_s13 + $0x20] sm:$0xff] %v906_v44   ;;  %974 = vst [vmem:[%s1202_s13 + $0x60] sm:$0xff] %v946_v45   ;;  %v457_v52 = vadd.f32 %v1187_v24, %v456_v50  ;;  %v521_v53 = vadd.f32 %v1187_v24, %v520_v51  ;;  %v1033_v54 = vpop.f32.mrb[14].mxu0  ;;  %v1049_v55 = vpop.f32.mrb[14].mxu1 }
 0x114   : > { %v468_v56 = vadd.f32 %v1033_v54, %v1187_v24  ;;  %v532_v57 = vadd.f32 %v1049_v55, %v1187_v24  ;;  %v459_v58 = vpop.f32.mrb[15].mxu0  ;;  %v523_v59 = vpop.f32.mrb[15].mxu1  ;;  %v549_v62 = vmax.f32 %v465_v48, 0.0  ;;  %v565_v63 = vmax.f32 %v529_v49, 0.0 }
 0x115   : > { %v460_v60 = vadd.f32 %v1187_v24, %v459_v58  ;;  %v524_v61 = vadd.f32 %v1187_v24, %v523_v59  ;;  %v547_v2 = vmax.f32 %v457_v52, 0.0  ;;  %v563_v3 = vmax.f32 %v521_v53, 0.0 }
 0x116   : > { %v550_v0 = vmax.f32 %v468_v56, 0.0  ;;  %v566_v1 = vmax.f32 %v532_v57, 0.0 }
 0x117   : > { %v548_v4 = vmax.f32 %v460_v60, 0.0  ;;  %v564_v5 = vmax.f32 %v524_v61, 0.0 }
 0x118   : > { %v921_v6 = vpack.c.bf16 %v550_v0, %v549_v62  ;;  %v961_v7 = vpack.c.bf16 %v566_v1, %v565_v63 }
 0x119   : > { %v916_v8 = vpack.c.bf16 %v548_v4, %v547_v2  ;;  %v956_v9 = vpack.c.bf16 %v564_v5, %v563_v3 }
 0x11a   : > { %969 = vst [vmem:[%s1202_s13 + $0x38] sm:$0xff] %v921_v6   ;;  %977 = vst [vmem:[%s1202_s13 + $0x78] sm:$0xff] %v961_v7  }
 0x11b   : > { %968 = vst [vmem:[%s1202_s13 + $0x30] sm:$0xff] %v916_v8   ;;  %976 = vst [vmem:[%s1202_s13 + $0x70] sm:$0xff] %v956_v9  }
 0x11c PF: > { %s13_s12 = sadd.s32 1, %s1104_s12  }
 0x11d   : > { %p10_p4 = scmp.ge.s32.totalorder %s13_s12, 4  }
 0x11f   :  { %12 = sbr.rel (!%p10_p4) target bundleno = 1 (0x1), region = 62 }

// kernel: _lambda_.36
= control target key start
LH: loop header
LB: loop body
LE: loop exit
PB: predicated region body
PF: predicated region fallthrough
CT: control target
= control target key end

     0   :  { %s1369_s15 = smov 0   ;;  %s1597_s0 = inlined_call_operand.vmem [shape: bf16[512,128], index: 0, kind: input, shape index: {}]   ;;  %s1598_s1 = inlined_call_operand.vmem [shape: bf16[128,128], index: 1, kind: input, shape index: {}]   ;;  %s1599_s2 = inlined_call_operand.vmem [shape: f32[1,128], index: 2, kind: input, shape index: {}]   ;;  %s1600_s3 = inlined_call_operand.vmem [shape: bf16[512,128], index: 3, kind: input, shape index: {}]   ;;  %s1601_s4 = inlined_call_operand.vmem [shape: bf16[512,128], index: 4, kind: output, shape index: {}]  }
   0x1 LB: > { %s940_s16 = sadd.s32 4294967295, %s1342_s15   ;;  %p944_p0 = scmp.ge.s32.totalorder %s1342_s15, 1  ;;  %s1342_s15 = sphi %s1369_s15, %s14_s15  }
   0x2   : > { %p174_p1 = scmp.lt.s32.totalorder %s1342_s15, 3 }
   0x4   : > { %p175_p2 = pnand %p944_p0, %p174_p1 }
   0x5   : > { %v1312_v0 = vld [vmem:[%s1598_s1] sm:$0xff] (!%p175_p2)   ;;  %s945_s19 = sshll.u32 (!%p175_p2), %s940_s16, 5  ;;  %v1313_v1 = vld [vmem:[%s1598_s1 + $0x8] sm:$0xff] (!%p175_p2)   ;;  %v1314_v2 = vld [vmem:[%s1598_s1 + $0x10] sm:$0xff] (!%p175_p2)  }
   0x6   : > { %178 = sbr.rel (%p175_p2) target bundleno = 287 (0x11f), region = 36  ;;  %p206_p3 = scmp.lt.s32.totalorder (!%p175_p2), %s945_s19, 63  ;;  %1240 = vmatprep.subr.bf16.mxu0 (!%p175_p2), %v1312_v0  ;;  %1288 = vmatprep.subr.bf16.mxu1 (!%p175_p2), %v1312_v0  ;;  %v1315_v3 = vld [vmem:[%s1598_s1 + $0x18] sm:$0xff] (!%p175_p2)   ;;  %v1316_v6 = vld [vmem:[%s1598_s1 + $0x20] sm:$0xff] (!%p175_p2)   ;;  %v1317_v7 = vld [vmem:[%s1598_s1 + $0x28] sm:$0xff] (!%p175_p2)  }
   0x7   : > { %1241 = vmatpush3.bf16.msra.mxu0 (!%p175_p2), %v1312_v0  ;;  %1296 = vmatpush3.bf16.msra.mxu1 (!%p175_p2), %v1312_v0  ;;  %v1318_v8 = vld [vmem:[%s1598_s1 + $0x30] sm:$0xff] (!%p175_p2)   ;;  %v1319_v9 = vld [vmem:[%s1598_s1 + $0x38] sm:$0xff] (!%p175_p2)   ;;  %v1450_v36 = vld [vmem:[%s1599_s2] ss:$0 sm:$0xff] (!%p175_p2) }
   0x8   : > { %1242 = vmatprep.subr.bf16.mxu0 (!%p175_p2), %v1313_v1  ;;  %1289 = vmatprep.subr.bf16.mxu1 (!%p175_p2), %v1313_v1 }
   0xb   : > { %1243 = vmatpush3.bf16.msra.mxu0 (!%p175_p2), %v1313_v1  ;;  %1297 = vmatpush3.bf16.msra.mxu1 (!%p175_p2), %v1313_v1 }
   0xc   : > { %1244 = vmatprep.subr.bf16.mxu0 (!%p175_p2), %v1314_v2  ;;  %1290 = vmatprep.subr.bf16.mxu1 (!%p175_p2), %v1314_v2 }
   0xd   : > { %s1603_s19 = smov (!%p206_p3, %s945_s19), 63 }
   0xe   : > { %s1386_s24 = sshll.u32 %s1603_s19, 2 }
   0xf   : > { %s1392_s27 = scalar_lea.vmem %s1597_s0, %s1386_s24  ;;  %1245 = vmatpush3.bf16.msra.mxu0 %v1314_v2  ;;  %1298 = vmatpush3.bf16.msra.mxu1 %v1314_v2  ;;  %s1429_s14 = scalar_lea.vmem %s1600_s3, %s1386_s24 }
  0x10   : > { %v1320_v4 = vld [vmem:[%s1392_s27] sm:$0xff]   ;;  %1246 = vmatprep.subr.bf16.mxu0 %v1315_v3  ;;  %1291 = vmatprep.subr.bf16.mxu1 %v1315_v3  ;;  %v1322_v10 = vld [vmem:[%s1392_s27 + $0x8] sm:$0xff]   ;;  %v1324_v12 = vld [vmem:[%s1392_s27 + $0x10] sm:$0xff]   ;;  %s1492_s20 = scalar_lea.vmem %s1601_s4, %s1386_s24 }
  0x11   : > { %v1321_v5 = vld [vmem:[%s1392_s27 + $0x40] sm:$0xff]   ;;  %1256 = vmatprep.mubr.bf16.mxu0 %v1320_v4  ;;  %v1323_v11 = vld [vmem:[%s1392_s27 + $0x48] sm:$0xff]   ;;  %v1325_v13 = vld [vmem:[%s1392_s27 + $0x50] sm:$0xff]  }
  0x12   : > { %1272 = vmatprep.mubr.bf16.mxu1 %v1321_v5  ;;  %v1326_v14 = vld [vmem:[%s1392_s27 + $0x18] sm:$0xff]   ;;  %v1328_v16 = vld [vmem:[%s1392_s27 + $0x20] sm:$0xff]   ;;  %v1330_v18 = vld [vmem:[%s1392_s27 + $0x28] sm:$0xff]  }
  0x13   : > { %1247 = vmatpush3.bf16.msra.mxu0 %v1315_v3  ;;  %1299 = vmatpush3.bf16.msra.mxu1 %v1315_v3  ;;  %v1327_v15 = vld [vmem:[%s1392_s27 + $0x58] sm:$0xff]   ;;  %v1329_v17 = vld [vmem:[%s1392_s27 + $0x60] sm:$0xff]   ;;  %v1331_v19 = vld [vmem:[%s1392_s27 + $0x68] sm:$0xff]  }
  0x14   : > { %1248 = vmatprep.subr.bf16.mxu0 %v1316_v6  ;;  %1292 = vmatprep.subr.bf16.mxu1 %v1316_v6  ;;  %v1332_v20 = vld [vmem:[%s1392_s27 + $0x30] sm:$0xff]   ;;  %v1334_v22 = vld [vmem:[%s1392_s27 + $0x38] sm:$0xff]   ;;  %v1186_v24 = vld [vmem:[%s1429_s14 + $0x8] sm:$0xff]  }
  0x15   : > { %v1333_v21 = vld [vmem:[%s1392_s27 + $0x70] sm:$0xff]   ;;  %v1335_v23 = vld [vmem:[%s1392_s27 + $0x78] sm:$0xff]   ;;  %v1194_v25 = vld [vmem:[%s1429_s14 + $0x48] sm:$0xff]   ;;  %v1048_v32 = vunpack.c.l.bf16 %v1186_v24  ;;  %v1049_v37 = vunpack.c.h.bf16 %v1186_v24 }
  0x16   : > { %v1043_v26 = vld [vmem:[%s1429_s14] sm:$0xff]   ;;  %v1436_v28 = vld [vmem:[%s1429_s14 + $0x18] sm:$0xff]   ;;  %v1442_v30 = vld [vmem:[%s1429_s14 + $0x10] sm:$0xff]   ;;  %v1080_v33 = vunpack.c.l.bf16 %v1194_v25  ;;  %v1081_v38 = vunpack.c.h.bf16 %v1194_v25 }
  0x17   : > { %1249 = vmatpush3.bf16.msra.mxu0 %v1316_v6  ;;  %1300 = vmatpush3.bf16.msra.mxu1 %v1316_v6  ;;  %v1193_v27 = vld [vmem:[%s1429_s14 + $0x40] sm:$0xff]   ;;  %v1439_v29 = vld [vmem:[%s1429_s14 + $0x58] sm:$0xff]   ;;  %v1445_v31 = vld [vmem:[%s1429_s14 + $0x50] sm:$0xff]   ;;  %v1044_v34 = vunpack.c.l.bf16 %v1043_v26  ;;  %v1045_v39 = vunpack.c.h.bf16 %v1043_v26  ;;  %v1056_v43 = vunpack.c.l.bf16 %v1436_v28  ;;  %v1052_v45 = vunpack.c.l.bf16 %v1442_v30 }
  0x18   : > { %1250 = vmatprep.subr.bf16.mxu0 %v1317_v7  ;;  %1293 = vmatprep.subr.bf16.mxu1 %v1317_v7  ;;  %v1076_v35 = vunpack.c.l.bf16 %v1193_v27  ;;  %v1077_v40 = vunpack.c.h.bf16 %v1193_v27  ;;  %v1453_v41 = vld [vmem:[%s1429_s14 + $0x28] sm:$0xff]   ;;  %v1088_v44 = vunpack.c.l.bf16 %v1439_v29  ;;  %v1084_v46 = vunpack.c.l.bf16 %v1445_v31  ;;  %v1463_v47 = vld [vmem:[%s1429_s14 + $0x20] sm:$0xff]  }
  0x19   : > { %v1456_v42 = vld [vmem:[%s1429_s14 + $0x68] sm:$0xff]   ;;  %v1466_v48 = vld [vmem:[%s1429_s14 + $0x60] sm:$0xff]   ;;  %v1057_v51 = vunpack.c.h.bf16 %v1436_v28  ;;  %v1089_v52 = vunpack.c.h.bf16 %v1439_v29  ;;  %v1053_v53 = vunpack.c.h.bf16 %v1442_v30  ;;  %v1085_v54 = vunpack.c.h.bf16 %v1445_v31 }
  0x1a   : > { %v1064_v59 = vunpack.c.l.bf16 %v1453_v41  ;;  %v1096_v60 = vunpack.c.l.bf16 %v1456_v42  ;;  %v1060_v1 = vunpack.c.l.bf16 %v1463_v47  ;;  %v1092_v2 = vunpack.c.l.bf16 %v1466_v48 }
  0x1b   : > { %1251 = vmatpush3.bf16.msra.mxu0 %v1317_v7  ;;  %1301 = vmatpush3.bf16.msra.mxu1 %v1317_v7 }
  0x1c   : > { %1252 = vmatprep.subr.bf16.mxu0 %v1318_v8  ;;  %1294 = vmatprep.subr.bf16.mxu1 %v1318_v8 }
  0x1f   : > { %1253 = vmatpush3.bf16.msra.mxu0 %v1318_v8  ;;  %1302 = vmatpush3.bf16.msra.mxu1 %v1318_v8 }
  0x20   : > { %1254 = vmatprep.subr.bf16.mxu0 %v1319_v9  ;;  %1295 = vmatprep.subr.bf16.mxu1 %v1319_v9 }
  0x23   : > { %1255 = vmatpush3.bf16.msra.mxu0 %v1319_v9  ;;  %1303 = vmatpush3.bf16.msra.mxu1 %v1319_v9 }
  0x26   : > { %1257 = vmatmul.mubr.bf16.vlgmr.msra.gmra.mrb[0].mxu0 %v1322_v10  ;;  %1273 = vmatmul.mubr.bf16.vlgmr.msra.gmra.mrb[0].mxu1 %v1323_v11 }
  0x27   : > { %1260 = vmatprep.mubr.bf16.mxu0 %v1324_v12  ;;  %1276 = vmatprep.mubr.bf16.mxu1 %v1325_v13 }
  0x2e   : > { %1261 = vmatmul.mubr.bf16.gmra.mrb[4].mxu0 %v1326_v14  ;;  %1277 = vmatmul.mubr.bf16.gmra.mrb[4].mxu1 %v1327_v15  ;;  %v1065_v15 = vunpack.c.h.bf16 %v1453_v41 }
  0x2f   : > { %1264 = vmatprep.mubr.bf16.mxu0 %v1328_v16  ;;  %1280 = vmatprep.mubr.bf16.mxu1 %v1329_v17  ;;  %v1097_v16 = vunpack.c.h.bf16 %v1456_v42 }
  0x36   : > { %1265 = vmatmul.mubr.bf16.gmra.mrb[8].mxu0 %v1330_v18  ;;  %1281 = vmatmul.mubr.bf16.gmra.mrb[8].mxu1 %v1331_v19  ;;  %v1061_v19 = vunpack.c.h.bf16 %v1463_v47 }
  0x37   : > { %1268 = vmatprep.mubr.bf16.mxu0 %v1332_v20  ;;  %1284 = vmatprep.mubr.bf16.mxu1 %v1333_v21  ;;  %v1093_v20 = vunpack.c.h.bf16 %v1466_v48 }
  0x3e   : > { %1269 = vmatmul.mubr.bf16.gmra.mrb[12].mxu0 %v1334_v22  ;;  %1285 = vmatmul.mubr.bf16.gmra.mrb[12].mxu1 %v1335_v23 }
  0xf9   : > { %v1258_v49 = vpop.f32.mrb[0].mxu0  ;;  %v1274_v50 = vpop.f32.mrb[0].mxu1 }
  0xfa   : > { %v466_v55 = vadd.f32 %v1258_v49, %v1450_v36  ;;  %v530_v56 = vadd.f32 %v1274_v50, %v1450_v36  ;;  %v457_v57 = vpop.f32.mrb[1].mxu0  ;;  %v521_v58 = vpop.f32.mrb[1].mxu1 }
  0xfb   : > { %v458_v61 = vadd.f32 %v1450_v36, %v457_v57  ;;  %v522_v62 = vadd.f32 %v1450_v36, %v521_v58  ;;  %v1259_v63 = vpop.f32.mrb[2].mxu0  ;;  %v1275_v0 = vpop.f32.mrb[2].mxu1 }
  0xfc   : > { %v650_v3 = vadd.f32 %v1048_v32, %v466_v55  ;;  %v666_v4 = vadd.f32 %v1080_v33, %v530_v56  ;;  %v469_v5 = vadd.f32 %v1259_v63, %v1450_v36  ;;  %v533_v6 = vadd.f32 %v1275_v0, %v1450_v36  ;;  %v460_v7 = vpop.f32.mrb[3].mxu0  ;;  %v524_v8 = vpop.f32.mrb[3].mxu1  ;;  %v1502_v63 = vld [vmem:[%s1429_s14 + $0x78] sm:$0xff]  }
  0xfd   : > { %v648_v9 = vadd.f32 %v1044_v34, %v458_v61  ;;  %v664_v10 = vadd.f32 %v1076_v35, %v522_v62  ;;  %v461_v11 = vadd.f32 %v1450_v36, %v460_v7  ;;  %v525_v12 = vadd.f32 %v1450_v36, %v524_v8  ;;  %v1499_v62 = vld [vmem:[%s1429_s14 + $0x38] sm:$0xff]   ;;  %v1513_v8 = vld [vmem:[%s1429_s14 + $0x30] sm:$0xff]  }
  0xfe   : > { %v651_v13 = vadd.f32 %v1049_v37, %v469_v5  ;;  %v667_v14 = vadd.f32 %v1081_v38, %v533_v6  ;;  %v682_v21 = vmax.f32 %v650_v3, 0.0  ;;  %v698_v22 = vmax.f32 %v666_v4, 0.0 }
  0xff   : > { %v649_v17 = vadd.f32 %v1045_v39, %v461_v11  ;;  %v665_v18 = vadd.f32 %v1077_v40, %v525_v12  ;;  %v680_v25 = vmax.f32 %v648_v9, 0.0  ;;  %v696_v26 = vmax.f32 %v664_v10, 0.0  ;;  %v1516_v9 = vld [vmem:[%s1429_s14 + $0x70] sm:$0xff]  }
 0x100   : > { %v683_v23 = vmax.f32 %v651_v13, 0.0  ;;  %v699_v24 = vmax.f32 %v667_v14, 0.0  ;;  %v1072_v14 = vunpack.c.l.bf16 %v1499_v62 }
 0x101   : > { %v681_v27 = vmax.f32 %v649_v17, 0.0  ;;  %v697_v32 = vmax.f32 %v665_v18, 0.0  ;;  %v1262_v33 = vpop.f32.mrb[4].mxu0  ;;  %v1278_v34 = vpop.f32.mrb[4].mxu1  ;;  %v1104_v17 = vunpack.c.l.bf16 %v1502_v63  ;;  %v1068_v18 = vunpack.c.l.bf16 %v1513_v8 }
 0x102   : > { %v1114_v35 = vpack.c.bf16 %v683_v23, %v682_v21  ;;  %v1154_v37 = vpack.c.bf16 %v699_v24, %v698_v22  ;;  %v482_v38 = vadd.f32 %v1262_v33, %v1450_v36  ;;  %v546_v39 = vadd.f32 %v1278_v34, %v1450_v36  ;;  %v473_v40 = vpop.f32.mrb[5].mxu0  ;;  %v537_v49 = vpop.f32.mrb[5].mxu1 }
 0x103   : > { %v1109_v50 = vpack.c.bf16 %v681_v27, %v680_v25  ;;  %v1149_v55 = vpack.c.bf16 %v697_v32, %v696_v26  ;;  %v474_v56 = vadd.f32 %v1450_v36, %v473_v40  ;;  %v538_v57 = vadd.f32 %v1450_v36, %v537_v49  ;;  %v1263_v58 = vpop.f32.mrb[6].mxu0  ;;  %v1279_v61 = vpop.f32.mrb[6].mxu1 }
 0x104   : > { %1201 = vst [vmem:[%s1492_s20 + $0x8] sm:$0xff] %v1114_v35   ;;  %1209 = vst [vmem:[%s1492_s20 + $0x48] sm:$0xff] %v1154_v37   ;;  %v654_v0 = vadd.f32 %v1056_v43, %v482_v38  ;;  %v670_v3 = vadd.f32 %v1088_v44, %v546_v39  ;;  %v485_v4 = vadd.f32 %v1263_v58, %v1450_v36  ;;  %v476_v6 = vpop.f32.mrb[7].mxu0  ;;  %v540_v7 = vpop.f32.mrb[7].mxu1  ;;  %v1100_v21 = vunpack.c.l.bf16 %v1516_v9 }
 0x105   : > { %v549_v5 = vadd.f32 %v1279_v61, %v1450_v36  ;;  %1110 = vst [vmem:[%s1492_s20] sm:$0xff] %v1109_v50   ;;  %1208 = vst [vmem:[%s1492_s20 + $0x40] sm:$0xff] %v1149_v55   ;;  %v652_v10 = vadd.f32 %v1052_v45, %v474_v56  ;;  %v668_v43 = vadd.f32 %v1084_v46, %v538_v57 }
 0x106   : > { %v477_v44 = vadd.f32 %v1450_v36, %v476_v6  ;;  %v541_v11 = vadd.f32 %v1450_v36, %v540_v7  ;;  %v655_v12 = vadd.f32 %v1057_v51, %v485_v4  ;;  %v686_v22 = vmax.f32 %v654_v0, 0.0 }
 0x107   : > { %v671_v13 = vadd.f32 %v1089_v52, %v549_v5  ;;  %v702_v28 = vmax.f32 %v670_v3, 0.0  ;;  %v684_v29 = vmax.f32 %v652_v10, 0.0  ;;  %v700_v52 = vmax.f32 %v668_v43, 0.0 }
 0x108   : > { %v653_v45 = vadd.f32 %v1053_v53, %v477_v44  ;;  %v669_v46 = vadd.f32 %v1085_v54, %v541_v11  ;;  %v687_v51 = vmax.f32 %v655_v12, 0.0  ;;  %v1073_v5 = vunpack.c.h.bf16 %v1499_v62 }
 0x109   : > { %v703_v23 = vmax.f32 %v671_v13, 0.0  ;;  %v1266_v26 = vpop.f32.mrb[8].mxu0  ;;  %v1282_v30 = vpop.f32.mrb[8].mxu1  ;;  %v1105_v6 = vunpack.c.h.bf16 %v1502_v63  ;;  %v1069_v7 = vunpack.c.h.bf16 %v1513_v8  ;;  %v1101_v10 = vunpack.c.h.bf16 %v1516_v9 }
 0x10a   : > { %v685_v24 = vmax.f32 %v653_v45, 0.0  ;;  %v701_v25 = vmax.f32 %v669_v46, 0.0  ;;  %v1124_v53 = vpack.c.bf16 %v687_v51, %v686_v22  ;;  %v498_v31 = vadd.f32 %v1266_v26, %v1450_v36  ;;  %v489_v32 = vpop.f32.mrb[9].mxu0  ;;  %v553_v33 = vpop.f32.mrb[9].mxu1 }
 0x10b   : > { %v1164_v27 = vpack.c.bf16 %v703_v23, %v702_v28  ;;  %v562_v54 = vadd.f32 %v1282_v30, %v1450_v36  ;;  %v490_v37 = vadd.f32 %v1450_v36, %v489_v32  ;;  %v554_v38 = vadd.f32 %v1450_v36, %v553_v33  ;;  %v1267_v39 = vpop.f32.mrb[10].mxu0  ;;  %v1283_v40 = vpop.f32.mrb[10].mxu1 }
 0x10c   : > { %v1119_v34 = vpack.c.bf16 %v685_v24, %v684_v29  ;;  %v1159_v35 = vpack.c.bf16 %v701_v25, %v700_v52  ;;  %1203 = vst [vmem:[%s1492_s20 + $0x18] sm:$0xff] %v1124_v53   ;;  %v658_v49 = vadd.f32 %v1064_v59, %v498_v31  ;;  %v501_v55 = vadd.f32 %v1267_v39, %v1450_v36  ;;  %v492_v57 = vpop.f32.mrb[11].mxu0  ;;  %v556_v58 = vpop.f32.mrb[11].mxu1 }
 0x10d   : > { %1211 = vst [vmem:[%s1492_s20 + $0x58] sm:$0xff] %v1164_v27   ;;  %v674_v50 = vadd.f32 %v1096_v60, %v562_v54  ;;  %v565_v56 = vadd.f32 %v1283_v40, %v1450_v36  ;;  %v656_v61 = vadd.f32 %v1060_v1, %v490_v37  ;;  %v672_v0 = vadd.f32 %v1092_v2, %v554_v38 }
 0x10e   : > { %1202 = vst [vmem:[%s1492_s20 + $0x10] sm:$0xff] %v1119_v34   ;;  %1210 = vst [vmem:[%s1492_s20 + $0x50] sm:$0xff] %v1159_v35   ;;  %v493_v3 = vadd.f32 %v1450_v36, %v492_v57  ;;  %v557_v59 = vadd.f32 %v1450_v36, %v556_v58  ;;  %v659_v60 = vadd.f32 %v1065_v15, %v501_v55  ;;  %v690_v43 = vmax.f32 %v658_v49, 0.0 }
 0x10f   : > { %v675_v4 = vadd.f32 %v1097_v16, %v565_v56  ;;  %v706_v41 = vmax.f32 %v674_v50, 0.0  ;;  %v688_v42 = vmax.f32 %v656_v61, 0.0  ;;  %v704_v16 = vmax.f32 %v672_v0, 0.0 }
 0x110   : > { %v657_v1 = vadd.f32 %v1061_v19, %v493_v3  ;;  %v673_v2 = vadd.f32 %v1093_v20, %v557_v59  ;;  %v691_v15 = vmax.f32 %v659_v60, 0.0 }
 0x111   : > { %v707_v44 = vmax.f32 %v675_v4, 0.0  ;;  %v1270_v13 = vpop.f32.mrb[12].mxu0  ;;  %v1286_v47 = vpop.f32.mrb[12].mxu1 }
 0x112   : > { %v689_v11 = vmax.f32 %v657_v1, 0.0  ;;  %v705_v12 = vmax.f32 %v673_v2, 0.0  ;;  %v1134_v19 = vpack.c.bf16 %v691_v15, %v690_v43  ;;  %v514_v48 = vadd.f32 %v1270_v13, %v1450_v36  ;;  %v505_v46 = vpop.f32.mrb[13].mxu0  ;;  %v569_v22 = vpop.f32.mrb[13].mxu1 }
 0x113   : > { %v1174_v45 = vpack.c.bf16 %v707_v44, %v706_v41  ;;  %v578_v20 = vadd.f32 %v1286_v47, %v1450_v36  ;;  %v506_v23 = vadd.f32 %v1450_v36, %v505_v46  ;;  %v570_v29 = vadd.f32 %v1450_v36, %v569_v22  ;;  %v1271_v52 = vpop.f32.mrb[14].mxu0  ;;  %v1287_v24 = vpop.f32.mrb[14].mxu1 }
 0x114   : > { %v1129_v28 = vpack.c.bf16 %v689_v11, %v688_v42  ;;  %v1169_v51 = vpack.c.bf16 %v705_v12, %v704_v16  ;;  %1205 = vst [vmem:[%s1492_s20 + $0x28] sm:$0xff] %v1134_v19   ;;  %v662_v25 = vadd.f32 %v1072_v14, %v514_v48  ;;  %v517_v30 = vadd.f32 %v1271_v52, %v1450_v36  ;;  %v508_v27 = vpop.f32.mrb[15].mxu0  ;;  %v572_v31 = vpop.f32.mrb[15].mxu1 }
 0x115   : > { %1213 = vst [vmem:[%s1492_s20 + $0x68] sm:$0xff] %v1174_v45   ;;  %v678_v26 = vadd.f32 %v1104_v17, %v578_v20  ;;  %v581_v53 = vadd.f32 %v1287_v24, %v1450_v36  ;;  %v660_v54 = vadd.f32 %v1068_v18, %v506_v23  ;;  %v676_v32 = vadd.f32 %v1100_v21, %v570_v29 }
 0x116   : > { %1204 = vst [vmem:[%s1492_s20 + $0x20] sm:$0xff] %v1129_v28   ;;  %1212 = vst [vmem:[%s1492_s20 + $0x60] sm:$0xff] %v1169_v51   ;;  %v509_v62 = vadd.f32 %v1450_v36, %v508_v27  ;;  %v573_v14 = vadd.f32 %v1450_v36, %v572_v31  ;;  %v663_v63 = vadd.f32 %v1073_v5, %v517_v30  ;;  %v694_v35 = vmax.f32 %v662_v25, 0.0 }
 0x117   : > { %v679_v17 = vadd.f32 %v1105_v6, %v581_v53  ;;  %v710_v37 = vmax.f32 %v678_v26, 0.0  ;;  %v692_v18 = vmax.f32 %v660_v54, 0.0  ;;  %v708_v39 = vmax.f32 %v676_v32, 0.0 }
 0x118   : > { %v661_v33 = vadd.f32 %v1069_v7, %v509_v62  ;;  %v677_v34 = vadd.f32 %v1101_v10, %v573_v14  ;;  %v695_v38 = vmax.f32 %v663_v63, 0.0 }
 0x119   : > { %v711_v8 = vmax.f32 %v679_v17, 0.0 }
 0x11a   : > { %v693_v9 = vmax.f32 %v661_v33, 0.0  ;;  %v709_v21 = vmax.f32 %v677_v34, 0.0  ;;  %v1144_v40 = vpack.c.bf16 %v695_v38, %v694_v35 }
 0x11b   : > { %v1184_v49 = vpack.c.bf16 %v711_v8, %v710_v37 }
 0x11c   : > { %v1139_v50 = vpack.c.bf16 %v693_v9, %v692_v18  ;;  %v1179_v36 = vpack.c.bf16 %v709_v21, %v708_v39  ;;  %1207 = vst [vmem:[%s1492_s20 + $0x38] sm:$0xff] %v1144_v40  }
 0x11d   : > { %1215 = vst [vmem:[%s1492_s20 + $0x78] sm:$0xff] %v1184_v49  }
 0x11e   : > { %1206 = vst [vmem:[%s1492_s20 + $0x30] sm:$0xff] %v1139_v50   ;;  %1214 = vst [vmem:[%s1492_s20 + $0x70] sm:$0xff] %v1179_v36  }
 0x11f PF: > { %s14_s15 = sadd.s32 1, %s1342_s15  }
 0x120   : > { %p11_p4 = scmp.ge.s32.totalorder %s14_s15, 4  }
 0x122   :  { %13 = sbr.rel (!%p11_p4) target bundleno = 1 (0x1), region = 69 }

// kernel: _lambda_.41
= control target key start
LH: loop header
LB: loop body
LE: loop exit
PB: predicated region body
PF: predicated region fallthrough
CT: control target
= control target key end

     0   :  { %s672_s12 = smov 0   ;;  %s760_s0 = inlined_call_operand.vmem [shape: bf16[128,128], index: 0, kind: input, shape index: {}]   ;;  %s761_s1 = inlined_call_operand.vmem [shape: bf16[128,256], index: 1, kind: input, shape index: {}]   ;;  %s762_s2 = inlined_call_operand.vmem [shape: f32[1,256], index: 2, kind: input, shape index: {}]   ;;  %s763_s3 = inlined_call_operand.vmem [shape: bf16[128,256], index: 3, kind: output, shape index: {}]  }
   0x1 LB: > { %s541_s13 = sadd.s32 4294967295, %s649_s12   ;;  %p545_p0 = scmp.ge.s32.totalorder %s649_s12, 1  ;;  %s649_s12 = sphi %s672_s12, %s13_s12  }
   0x2   : > { %p138_p1 = scmp.lt.s32.totalorder %s649_s12, 3 }
   0x4   : > { %p139_p2 = pnand %p545_p0, %p138_p1 }
   0x5   : > { %v615_v0 = vld [vmem:[%s761_s1 + $0x4] ss:$8 sps:$4 sm:$0xff] (!%p139_p2)   ;;  %s546_s16 = sshll.u32 (!%p139_p2), %s541_s13, 3  ;;  %v617_v1 = vld [vmem:[%s761_s1] ss:$8 sps:$4 sm:$0xff] (!%p139_p2)   ;;  %v651_v2 = vmov (!%p139_p2), 0   ;;  %v203_v21 = vlaneseq (!%p139_p2) }
   0x6   : > { %142 = sbr.rel (%p139_p2) target bundleno = 268 (0x10c), region = 32  ;;  %349 = vmatprep.mubr.bf16.mxu0 (!%p139_p2), %v651_v2  ;;  %369 = vmatprep.mubr.bf16.mxu1 (!%p139_p2), %v651_v2  ;;  %p164_p3 = scmp.lt.s32.totalorder (!%p139_p2), %s546_s16, 15  ;;  %v618_v3 = vld [vmem:[%s761_s1 + $0x14] ss:$8 sps:$4 sm:$0xff] (!%p139_p2)   ;;  %v620_v4 = vld [vmem:[%s761_s1 + $0x10] ss:$8 sps:$4 sm:$0xff] (!%p139_p2)  }
   0x7   : > { %317 = vmatprep.subr.bf16.mxu0 (!%p139_p2), %v615_v0  ;;  %590 = vmatprep.subr.bf16.mxu1 (!%p139_p2), %v615_v0  ;;  %v621_v5 = vld [vmem:[%s761_s1 + $0x24] ss:$8 sps:$4 sm:$0xff] (!%p139_p2)   ;;  %v623_v6 = vld [vmem:[%s761_s1 + $0x20] ss:$8 sps:$4 sm:$0xff] (!%p139_p2)   ;;  %v624_v7 = vld [vmem:[%s761_s1 + $0x34] ss:$8 sps:$4 sm:$0xff] (!%p139_p2)  }
   0x8   : > { %318 = vmatpush1.bf16.msra.mxu0 (!%p139_p2), %v617_v1  ;;  %598 = vmatpush1.bf16.msra.mxu1 (!%p139_p2), %v617_v1  ;;  %v626_v8 = vld [vmem:[%s761_s1 + $0x30] ss:$8 sps:$4 sm:$0xff] (!%p139_p2)   ;;  %v627_v9 = vld [vmem:[%s761_s1 + $0x44] ss:$8 sps:$4 sm:$0xff] (!%p139_p2)   ;;  %v629_v10 = vld [vmem:[%s761_s1 + $0x40] ss:$8 sps:$4 sm:$0xff] (!%p139_p2)  }
   0x9   : > { %319 = vmatprep.subr.bf16.mxu0 (!%p139_p2), %v618_v3  ;;  %591 = vmatprep.subr.bf16.mxu1 (!%p139_p2), %v618_v3  ;;  %v630_v11 = vld [vmem:[%s761_s1 + $0x54] ss:$8 sps:$4 sm:$0xff] (!%p139_p2)   ;;  %v632_v12 = vld [vmem:[%s761_s1 + $0x50] ss:$8 sps:$4 sm:$0xff] (!%p139_p2)   ;;  %v633_v13 = vld [vmem:[%s761_s1 + $0x64] ss:$8 sps:$4 sm:$0xff] (!%p139_p2)  }
   0xa   : > { %v635_v14 = vld [vmem:[%s761_s1 + $0x60] ss:$8 sps:$4 sm:$0xff] (!%p139_p2)   ;;  %v636_v15 = vld [vmem:[%s761_s1 + $0x74] ss:$8 sps:$4 sm:$0xff] (!%p139_p2)   ;;  %v638_v16 = vld [vmem:[%s761_s1 + $0x70] ss:$8 sps:$4 sm:$0xff] (!%p139_p2)  }
   0xb   : > { %v204_v22 = vshrl.u32 (!%p139_p2), %v203_v21, 7  ;;  %v201_v24 = vld [vmem:[%s762_s2] sm:$0x3] (!%p139_p2) }
   0xc   : > { %320 = vmatpush1.bf16.msra.mxu0 (!%p139_p2), %v620_v4  ;;  %599 = vmatpush1.bf16.msra.mxu1 (!%p139_p2), %v620_v4 }
   0xd   : > { %s765_s16 = smov (!%p164_p3, %s546_s16), 15  ;;  %321 = vmatprep.subr.bf16.mxu0 %v621_v5  ;;  %592 = vmatprep.subr.bf16.mxu1 %v621_v5  ;;  %v205_v23 = vsub.s32 0, %v204_v22  ;;  %v209_v25 = vsub.s32 1, %v204_v22 }
   0xe   : > { %s547_s25 = sshll.u32 %s765_s16, 2  ;;  %s581_s28 = sshll.u32 %s765_s16, 3 }
   0xf   : > { %s707_s5 = scalar_lea.vmem %s760_s0, %s547_s25  ;;  %v206_v26 = vrot.slane %v201_v24, %v205_v23  ;;  %v210_v27 = vrot.slane %v201_v24, %v209_v25  ;;  %s747_s4 = scalar_lea.vmem %s763_s3, %s581_s28 }
  0x10   : > { %322 = vmatpush1.bf16.msra.mxu0 %v623_v6  ;;  %600 = vmatpush1.bf16.msra.mxu1 %v623_v6  ;;  %v639_v17 = vld [vmem:[%s707_s5] sm:$0xff]   ;;  %v640_v18 = vld [vmem:[%s707_s5 + $0x10] sm:$0xff]   ;;  %v641_v19 = vld [vmem:[%s707_s5 + $0x8] sm:$0xff]  }
  0x11   : > { %323 = vmatprep.subr.bf16.mxu0 %v624_v7  ;;  %593 = vmatprep.subr.bf16.mxu1 %v624_v7  ;;  %v642_v20 = vld [vmem:[%s707_s5 + $0x18] sm:$0xff]  }
  0x14   : > { %324 = vmatpush1.bf16.msra.mxu0 %v626_v8  ;;  %601 = vmatpush1.bf16.msra.mxu1 %v626_v8 }
  0x15   : > { %325 = vmatprep.subr.bf16.mxu0 %v627_v9  ;;  %594 = vmatprep.subr.bf16.mxu1 %v627_v9 }
  0x18   : > { %326 = vmatpush1.bf16.msra.mxu0 %v629_v10  ;;  %602 = vmatpush1.bf16.msra.mxu1 %v629_v10 }
  0x19   : > { %327 = vmatprep.subr.bf16.mxu0 %v630_v11  ;;  %595 = vmatprep.subr.bf16.mxu1 %v630_v11 }
  0x1c   : > { %328 = vmatpush1.bf16.msra.mxu0 %v632_v12  ;;  %603 = vmatpush1.bf16.msra.mxu1 %v632_v12 }
  0x1d   : > { %329 = vmatprep.subr.bf16.mxu0 %v633_v13  ;;  %596 = vmatprep.subr.bf16.mxu1 %v633_v13 }
  0x20   : > { %330 = vmatpush1.bf16.msra.mxu0 %v635_v14  ;;  %604 = vmatpush1.bf16.msra.mxu1 %v635_v14 }
  0x21   : > { %331 = vmatprep.subr.bf16.mxu0 %v636_v15  ;;  %597 = vmatprep.subr.bf16.mxu1 %v636_v15 }
  0x24   : > { %332 = vmatpush1.bf16.msra.mxu0 %v638_v16  ;;  %605 = vmatpush1.bf16.msra.mxu1 %v638_v16 }
  0x27   : > { %350 = vmatmul.mubr.bf16.vlgmr.msra.gmra.mrb[0].mxu0 %v639_v17  ;;  %370 = vmatmul.mubr.bf16.vlgmr.msra.gmra.mrb[0].mxu1 %v640_v18 }
  0x28   : > { %359 = vmatprep.mubr.bf16.mxu0 %v651_v2  ;;  %379 = vmatprep.mubr.bf16.mxu1 %v651_v2 }
  0x2f   : > { %360 = vmatmul.mubr.bf16.gmra.mrb[4].mxu0 %v641_v19  ;;  %380 = vmatmul.mubr.bf16.gmra.mrb[4].mxu1 %v642_v20 }
  0xfa   : > { %v351_v28 = vpop.f32.mrb[0].mxu0  ;;  %v371_v29 = vpop.f32.mrb[0].mxu1 }
  0xfb   : > { %v352_v30 = vadd.f32 %v351_v28, %v206_v26  ;;  %v372_v31 = vadd.f32 %v371_v29, %v206_v26  ;;  %v353_v32 = vpop.f32.mrb[1].mxu0  ;;  %v373_v33 = vpop.f32.mrb[1].mxu1 }
  0xfc   : > { %v354_v34 = vadd.f32 %v353_v32, %v210_v27  ;;  %v374_v35 = vadd.f32 %v373_v33, %v210_v27  ;;  %v355_v36 = vpop.f32.mrb[2].mxu0  ;;  %v375_v37 = vpop.f32.mrb[2].mxu1 }
  0xfd   : > { %v395_v38 = vmax.f32 %v352_v30, 0.0  ;;  %v403_v39 = vmax.f32 %v372_v31, 0.0  ;;  %v356_v40 = vadd.f32 %v355_v36, %v206_v26  ;;  %v376_v41 = vadd.f32 %v375_v37, %v206_v26  ;;  %v357_v42 = vpop.f32.mrb[3].mxu0  ;;  %v377_v43 = vpop.f32.mrb[3].mxu1 }
  0xfe   : > { %v358_v44 = vadd.f32 %v357_v42, %v210_v27  ;;  %v378_v45 = vadd.f32 %v377_v43, %v210_v27 }
  0xff   : > { %v582_v46 = vpack.c.bf16 %v354_v34, %v395_v38  ;;  %v586_v47 = vpack.c.bf16 %v374_v35, %v403_v39  ;;  %v397_v48 = vmax.f32 %v356_v40, 0.0  ;;  %v405_v49 = vmax.f32 %v376_v41, 0.0 }
 0x101   : > { %475 = vst [vmem:[%s747_s4] sm:$0xff] %v582_v46  ;;  %479 = vst [vmem:[%s747_s4 + $0x20] sm:$0xff] %v586_v47  ;;  %v583_v50 = vpack.c.bf16 %v358_v44, %v397_v48  ;;  %v587_v51 = vpack.c.bf16 %v378_v45, %v405_v49 }
 0x102   : > { %v361_v52 = vpop.f32.mrb[4].mxu0  ;;  %v381_v53 = vpop.f32.mrb[4].mxu1 }
 0x103   : > { %476 = vst [vmem:[%s747_s4 + $0x8] sm:$0xff] %v583_v50  ;;  %480 = vst [vmem:[%s747_s4 + $0x28] sm:$0xff] %v587_v51  ;;  %v362_v54 = vadd.f32 %v361_v52, %v206_v26  ;;  %v382_v55 = vadd.f32 %v381_v53, %v206_v26  ;;  %v363_v56 = vpop.f32.mrb[5].mxu0  ;;  %v383_v57 = vpop.f32.mrb[5].mxu1 }
 0x104   : > { %v364_v58 = vadd.f32 %v363_v56, %v210_v27  ;;  %v384_v59 = vadd.f32 %v383_v57, %v210_v27  ;;  %v365_v60 = vpop.f32.mrb[6].mxu0  ;;  %v385_v61 = vpop.f32.mrb[6].mxu1 }
 0x105   : > { %v399_v62 = vmax.f32 %v362_v54, 0.0  ;;  %v407_v63 = vmax.f32 %v382_v55, 0.0  ;;  %v366_v0 = vadd.f32 %v365_v60, %v206_v26  ;;  %v386_v1 = vadd.f32 %v385_v61, %v206_v26  ;;  %v367_v2 = vpop.f32.mrb[7].mxu0  ;;  %v387_v3 = vpop.f32.mrb[7].mxu1 }
 0x106   : > { %v368_v4 = vadd.f32 %v367_v2, %v210_v27  ;;  %v388_v5 = vadd.f32 %v387_v3, %v210_v27 }
 0x107   : > { %v584_v6 = vpack.c.bf16 %v364_v58, %v399_v62  ;;  %v588_v7 = vpack.c.bf16 %v384_v59, %v407_v63  ;;  %v401_v8 = vmax.f32 %v366_v0, 0.0  ;;  %v409_v9 = vmax.f32 %v386_v1, 0.0 }
 0x109   : > { %477 = vst [vmem:[%s747_s4 + $0x10] sm:$0xff] %v584_v6  ;;  %481 = vst [vmem:[%s747_s4 + $0x30] sm:$0xff] %v588_v7  ;;  %v585_v10 = vpack.c.bf16 %v368_v4, %v401_v8  ;;  %v589_v11 = vpack.c.bf16 %v388_v5, %v409_v9 }
 0x10b   : > { %478 = vst [vmem:[%s747_s4 + $0x18] sm:$0xff] %v585_v10  ;;  %482 = vst [vmem:[%s747_s4 + $0x38] sm:$0xff] %v589_v11 }
 0x10c PF: > { %s13_s12 = sadd.s32 1, %s649_s12  }
 0x10d   : > { %p10_p4 = scmp.ge.s32.totalorder %s13_s12, 4  }
 0x10f   :  { %12 = sbr.rel (!%p10_p4) target bundleno = 1 (0x1), region = 62 }

// kernel: _lambda_.42
= control target key start
LH: loop header
LB: loop body
LE: loop exit
PB: predicated region body
PF: predicated region fallthrough
CT: control target
= control target key end

     0   :  { %s838_s15 = smov 0   ;;  %s933_s0 = inlined_call_operand.vmem [shape: bf16[128,256], index: 0, kind: input, shape index: {}]   ;;  %s934_s1 = inlined_call_operand.vmem [shape: bf16[256,128], index: 1, kind: input, shape index: {}]   ;;  %s935_s2 = inlined_call_operand.vmem [shape: f32[1,128], index: 2, kind: input, shape index: {}]   ;;  %s936_s3 = inlined_call_operand.vmem [shape: bf16[128,128], index: 3, kind: input, shape index: {}]   ;;  %s937_s4 = inlined_call_operand.vmem [shape: bf16[128,128], index: 4, kind: output, shape index: {}]  }
   0x1 LB: > { %s615_s16 = sadd.s32 4294967295, %s811_s15   ;;  %p619_p0 = scmp.ge.s32.totalorder %s811_s15, 1  ;;  %s811_s15 = sphi %s838_s15, %s14_s15  }
   0x2   : > { %p175_p1 = scmp.lt.s32.totalorder %s811_s15, 3 }
   0x4   : > { %p176_p2 = pnand %p619_p0, %p175_p1 }
   0x5   : > { %v777_v0 = vld [vmem:[%s934_s1 + $0x40] sm:$0xff] (!%p176_p2)   ;;  %s620_s19 = sshll.u32 (!%p176_p2), %s615_s16, 3  ;;  %v779_v2 = vld [vmem:[%s934_s1 + $0x48] sm:$0xff] (!%p176_p2)   ;;  %v781_v4 = vld [vmem:[%s934_s1 + $0x50] sm:$0xff] (!%p176_p2)  }
   0x6   : > { %179 = sbr.rel (%p176_p2) target bundleno = 273 (0x111), region = 36  ;;  %v778_v1 = vld [vmem:[%s934_s1] sm:$0xff] (!%p176_p2)   ;;  %713 = vmatprep.subr.bf16.mxu0 (!%p176_p2), %v777_v0  ;;  %753 = vmatprep.subr.bf16.mxu1 (!%p176_p2), %v777_v0  ;;  %v780_v3 = vld [vmem:[%s934_s1 + $0x8] sm:$0xff] (!%p176_p2)   ;;  %p208_p3 = scmp.lt.s32.totalorder (!%p176_p2), %s620_s19, 15  ;;  %v782_v5 = vld [vmem:[%s934_s1 + $0x10] sm:$0xff] (!%p176_p2)  }
   0x7   : > { %714 = vmatpush3.bf16.msra.mxu0 (!%p176_p2), %v778_v1  ;;  %761 = vmatpush3.bf16.msra.mxu1 (!%p176_p2), %v778_v1  ;;  %v783_v6 = vld [vmem:[%s934_s1 + $0x58] sm:$0xff] (!%p176_p2)   ;;  %v785_v8 = vld [vmem:[%s934_s1 + $0x60] sm:$0xff] (!%p176_p2)   ;;  %v787_v10 = vld [vmem:[%s934_s1 + $0x68] sm:$0xff] (!%p176_p2)  }
   0x8   : > { %715 = vmatprep.subr.bf16.mxu0 (!%p176_p2), %v779_v2  ;;  %754 = vmatprep.subr.bf16.mxu1 (!%p176_p2), %v779_v2  ;;  %v784_v7 = vld [vmem:[%s934_s1 + $0x18] sm:$0xff] (!%p176_p2)   ;;  %v786_v9 = vld [vmem:[%s934_s1 + $0x20] sm:$0xff] (!%p176_p2)   ;;  %v788_v13 = vld [vmem:[%s934_s1 + $0x28] sm:$0xff] (!%p176_p2)  }
   0x9   : > { %v789_v14 = vld [vmem:[%s934_s1 + $0x70] sm:$0xff] (!%p176_p2)   ;;  %v791_v16 = vld [vmem:[%s934_s1 + $0x78] sm:$0xff] (!%p176_p2)   ;;  %v627_v28 = vld [vmem:[%s935_s2] ss:$0 sm:$0xff] (!%p176_p2) }
   0xa   : > { %v790_v15 = vld [vmem:[%s934_s1 + $0x30] sm:$0xff] (!%p176_p2)   ;;  %v792_v17 = vld [vmem:[%s934_s1 + $0x38] sm:$0xff] (!%p176_p2)  }
   0xb   : > { %716 = vmatpush3.bf16.msra.mxu0 (!%p176_p2), %v780_v3  ;;  %762 = vmatpush3.bf16.msra.mxu1 (!%p176_p2), %v780_v3 }
   0xc   : > { %717 = vmatprep.subr.bf16.mxu0 (!%p176_p2), %v781_v4  ;;  %755 = vmatprep.subr.bf16.mxu1 (!%p176_p2), %v781_v4 }
   0xd   : > { %s939_s19 = smov (!%p208_p3, %s620_s19), 15 }
   0xe   : > { %s662_s8 = sshll.u32 %s939_s19, 3  ;;  %s624_s30 = sshll.u32 %s939_s19, 2 }
   0xf   : > { %718 = vmatpush3.bf16.msra.mxu0 %v782_v5  ;;  %763 = vmatpush3.bf16.msra.mxu1 %v782_v5  ;;  %s879_s13 = scalar_lea.vmem %s933_s0, %s662_s8  ;;  %s916_s7 = scalar_lea.vmem %s936_s3, %s624_s30 }
  0x10   : > { %719 = vmatprep.subr.bf16.mxu0 %v783_v6  ;;  %756 = vmatprep.subr.bf16.mxu1 %v783_v6  ;;  %v795_v11 = vld [vmem:[%s879_s13 + $0x4] ss:$8 sps:$4 sm:$0xff]   ;;  %v793_v18 = vld [vmem:[%s879_s13] ss:$8 sps:$4 sm:$0xff]   ;;  %v799_v20 = vld [vmem:[%s879_s13 + $0x14] ss:$8 sps:$4 sm:$0xff]   ;;  %s224_s12 = scalar_lea.vmem %s937_s4, %s624_s30 }
  0x11   : > { %v798_v12 = vld [vmem:[%s879_s13 + $0x24] ss:$8 sps:$4 sm:$0xff]   ;;  %442 = vmatprep.mubr.bf16.mxu0 %v795_v11  ;;  %v796_v19 = vld [vmem:[%s879_s13 + $0x20] ss:$8 sps:$4 sm:$0xff]   ;;  %v801_v21 = vld [vmem:[%s879_s13 + $0x34] ss:$8 sps:$4 sm:$0xff]  }
  0x12   : > { %458 = vmatprep.mubr.bf16.mxu1 %v798_v12  ;;  %v803_v22 = vld [vmem:[%s879_s13 + $0x10] ss:$8 sps:$4 sm:$0xff]   ;;  %v672_v24 = vld [vmem:[%s916_s7] sm:$0xff]   ;;  %v707_v53 = vld [vmem:[%s916_s7 + $0x8] sm:$0xff]  }
  0x13   : > { %720 = vmatpush3.bf16.msra.mxu0 %v784_v7  ;;  %764 = vmatpush3.bf16.msra.mxu1 %v784_v7  ;;  %v804_v23 = vld [vmem:[%s879_s13 + $0x30] ss:$8 sps:$4 sm:$0xff]   ;;  %v673_v32 = vunpack.c.l.bf16 %v672_v24  ;;  %v674_v38 = vunpack.c.h.bf16 %v672_v24  ;;  %v677_v1 = vunpack.c.l.bf16 %v707_v53 }
  0x14   : > { %721 = vmatprep.subr.bf16.mxu0 %v785_v8  ;;  %757 = vmatprep.subr.bf16.mxu1 %v785_v8  ;;  %v708_v25 = vld [vmem:[%s916_s7 + $0x10] sm:$0xff]   ;;  %v709_v54 = vld [vmem:[%s916_s7 + $0x18] sm:$0xff]  }
  0x15   : > { %v681_v34 = vunpack.c.l.bf16 %v708_v25  ;;  %v682_v40 = vunpack.c.h.bf16 %v708_v25  ;;  %v685_v2 = vunpack.c.l.bf16 %v709_v54  ;;  %v686_v12 = vunpack.c.h.bf16 %v709_v54 }
  0x17   : > { %722 = vmatpush3.bf16.msra.mxu0 %v786_v9  ;;  %765 = vmatpush3.bf16.msra.mxu1 %v786_v9 }
  0x18   : > { %723 = vmatprep.subr.bf16.mxu0 %v787_v10  ;;  %758 = vmatprep.subr.bf16.mxu1 %v787_v10  ;;  %v678_v10 = vunpack.c.h.bf16 %v707_v53 }
  0x1b   : > { %724 = vmatpush3.bf16.msra.mxu0 %v788_v13  ;;  %766 = vmatpush3.bf16.msra.mxu1 %v788_v13 }
  0x1c   : > { %725 = vmatprep.subr.bf16.mxu0 %v789_v14  ;;  %759 = vmatprep.subr.bf16.mxu1 %v789_v14 }
  0x1f   : > { %726 = vmatpush3.bf16.msra.mxu0 %v790_v15  ;;  %767 = vmatpush3.bf16.msra.mxu1 %v790_v15 }
  0x20   : > { %727 = vmatprep.subr.bf16.mxu0 %v791_v16  ;;  %760 = vmatprep.subr.bf16.mxu1 %v791_v16 }
  0x23   : > { %728 = vmatpush3.bf16.msra.mxu0 %v792_v17  ;;  %768 = vmatpush3.bf16.msra.mxu1 %v792_v17 }
  0x26   : > { %443 = vmatmul.mubr.bf16.vlgmr.msra.gmra.mrb[0].mxu0 %v793_v18  ;;  %459 = vmatmul.mubr.bf16.vlgmr.msra.gmra.mrb[0].mxu1 %v796_v19 }
  0x27   : > { %450 = vmatprep.mubr.bf16.mxu0 %v799_v20  ;;  %466 = vmatprep.mubr.bf16.mxu1 %v801_v21 }
  0x2e   : > { %451 = vmatmul.mubr.bf16.gmra.mrb[4].mxu0 %v803_v22  ;;  %467 = vmatmul.mubr.bf16.gmra.mrb[4].mxu1 %v804_v23 }
  0xf9   : > { %v729_v26 = vpop.f32.mrb[0].mxu0  ;;  %v741_v27 = vpop.f32.mrb[0].mxu1 }
  0xfa   : > { %v730_v29 = vpop.f32.mrb[1].mxu0  ;;  %v742_v30 = vpop.f32.mrb[1].mxu1 }
  0xfb   : > { %v731_v31 = vadd.f32 %v730_v29, %v729_v26  ;;  %v743_v33 = vadd.f32 %v742_v30, %v741_v27  ;;  %v732_v35 = vpop.f32.mrb[2].mxu0  ;;  %v744_v36 = vpop.f32.mrb[2].mxu1 }
  0xfc   : > { %v733_v37 = vpop.f32.mrb[3].mxu0  ;;  %v745_v39 = vpop.f32.mrb[3].mxu1 }
  0xfd   : > { %v445_v41 = vadd.f32 %v731_v31, %v627_v28  ;;  %v461_v42 = vadd.f32 %v743_v33, %v627_v28  ;;  %v734_v43 = vadd.f32 %v733_v37, %v732_v35  ;;  %v746_v44 = vadd.f32 %v745_v39, %v744_v36 }
  0xff   : > { %v491_v45 = vadd.f32 %v673_v32, %v445_v41  ;;  %v495_v46 = vadd.f32 %v681_v34, %v461_v42  ;;  %v448_v47 = vadd.f32 %v734_v43, %v627_v28  ;;  %v464_v48 = vadd.f32 %v746_v44, %v627_v28 }
 0x101   : > { %v492_v49 = vadd.f32 %v674_v38, %v448_v47  ;;  %v496_v50 = vadd.f32 %v682_v40, %v464_v48  ;;  %v735_v51 = vpop.f32.mrb[4].mxu0  ;;  %v747_v52 = vpop.f32.mrb[4].mxu1  ;;  %v499_v55 = vmax.f32 %v491_v45, 0.0  ;;  %v503_v56 = vmax.f32 %v495_v46, 0.0 }
 0x102   : > { %v736_v57 = vpop.f32.mrb[5].mxu0  ;;  %v748_v58 = vpop.f32.mrb[5].mxu1 }
 0x103   : > { %v500_v59 = vmax.f32 %v492_v49, 0.0  ;;  %v504_v60 = vmax.f32 %v496_v50, 0.0  ;;  %v737_v61 = vadd.f32 %v736_v57, %v735_v51  ;;  %v749_v62 = vadd.f32 %v748_v58, %v747_v52  ;;  %v738_v63 = vpop.f32.mrb[6].mxu0  ;;  %v750_v0 = vpop.f32.mrb[6].mxu1 }
 0x104   : > { %v739_v3 = vpop.f32.mrb[7].mxu0  ;;  %v751_v4 = vpop.f32.mrb[7].mxu1 }
 0x105   : > { %v690_v5 = vpack.c.bf16 %v500_v59, %v499_v55  ;;  %v700_v6 = vpack.c.bf16 %v504_v60, %v503_v56  ;;  %v453_v7 = vadd.f32 %v737_v61, %v627_v28  ;;  %v469_v8 = vadd.f32 %v749_v62, %v627_v28 }
 0x106   : > { %v740_v9 = vadd.f32 %v739_v3, %v738_v63  ;;  %v752_v11 = vadd.f32 %v751_v4, %v750_v0 }
 0x107   : > { %691 = vst [vmem:[%s224_s12] sm:$0xff] %v690_v5   ;;  %711 = vst [vmem:[%s224_s12 + $0x10] sm:$0xff] %v700_v6   ;;  %v493_v13 = vadd.f32 %v677_v1, %v453_v7  ;;  %v497_v14 = vadd.f32 %v685_v2, %v469_v8 }
 0x108   : > { %v456_v15 = vadd.f32 %v740_v9, %v627_v28  ;;  %v472_v16 = vadd.f32 %v752_v11, %v627_v28 }
 0x109   : > { %v501_v19 = vmax.f32 %v493_v13, 0.0  ;;  %v505_v20 = vmax.f32 %v497_v14, 0.0 }
 0x10a   : > { %v494_v17 = vadd.f32 %v678_v10, %v456_v15  ;;  %v498_v18 = vadd.f32 %v686_v12, %v472_v16 }
 0x10c   : > { %v502_v21 = vmax.f32 %v494_v17, 0.0  ;;  %v506_v22 = vmax.f32 %v498_v18, 0.0 }
 0x10e   : > { %v695_v23 = vpack.c.bf16 %v502_v21, %v501_v19  ;;  %v705_v24 = vpack.c.bf16 %v506_v22, %v505_v20 }
 0x110   : > { %710 = vst [vmem:[%s224_s12 + $0x8] sm:$0xff] %v695_v23   ;;  %712 = vst [vmem:[%s224_s12 + $0x18] sm:$0xff] %v705_v24  }
 0x111 PF: > { %s14_s15 = sadd.s32 1, %s811_s15  }
 0x112   : > { %p11_p4 = scmp.ge.s32.totalorder %s14_s15, 4  }
 0x114   :  { %13 = sbr.rel (!%p11_p4) target bundleno = 1 (0x1), region = 69 }

// kernel: _lambda_.43
= control target key start
LH: loop header
LB: loop body
LE: loop exit
PB: predicated region body
PF: predicated region fallthrough
CT: control target
= control target key end

     0   :  { %s727_s12 = smov 0   ;;  %s809_s0 = inlined_call_operand.vmem [shape: bf16[128,256], index: 0, kind: input, shape index: {}]   ;;  %s810_s1 = inlined_call_operand.vmem [shape: bf16[256,128], index: 1, kind: input, shape index: {}]   ;;  %s811_s2 = inlined_call_operand.vmem [shape: f32[1,128], index: 2, kind: input, shape index: {}]   ;;  %s812_s3 = inlined_call_operand.vmem [shape: bf16[128,128], index: 3, kind: output, shape index: {}]  }
   0x1 LB: > { %s530_s13 = sadd.s32 4294967295, %s705_s12   ;;  %p534_p0 = scmp.ge.s32.totalorder %s705_s12, 1  ;;  %s705_s12 = sphi %s727_s12, %s13_s12  }
   0x2   : > { %p139_p1 = scmp.lt.s32.totalorder %s705_s12, 3 }
   0x4   : > { %p140_p2 = pnand %p534_p0, %p139_p1 }
   0x5   : > { %v671_v0 = vld [vmem:[%s810_s1 + $0x40] sm:$0xff] (!%p140_p2)   ;;  %s535_s16 = sshll.u32 (!%p140_p2), %s530_s13, 3  ;;  %v673_v2 = vld [vmem:[%s810_s1 + $0x48] sm:$0xff] (!%p140_p2)   ;;  %v675_v4 = vld [vmem:[%s810_s1 + $0x50] sm:$0xff] (!%p140_p2)  }
   0x6   : > { %143 = sbr.rel (%p140_p2) target bundleno = 271 (0x10f), region = 32  ;;  %v672_v1 = vld [vmem:[%s810_s1] sm:$0xff] (!%p140_p2)   ;;  %607 = vmatprep.subr.bf16.mxu0 (!%p140_p2), %v671_v0  ;;  %647 = vmatprep.subr.bf16.mxu1 (!%p140_p2), %v671_v0  ;;  %v674_v3 = vld [vmem:[%s810_s1 + $0x8] sm:$0xff] (!%p140_p2)   ;;  %p165_p3 = scmp.lt.s32.totalorder (!%p140_p2), %s535_s16, 15  ;;  %v676_v5 = vld [vmem:[%s810_s1 + $0x10] sm:$0xff] (!%p140_p2)  }
   0x7   : > { %608 = vmatpush3.bf16.msra.mxu0 (!%p140_p2), %v672_v1  ;;  %655 = vmatpush3.bf16.msra.mxu1 (!%p140_p2), %v672_v1  ;;  %v677_v6 = vld [vmem:[%s810_s1 + $0x58] sm:$0xff] (!%p140_p2)   ;;  %v679_v8 = vld [vmem:[%s810_s1 + $0x60] sm:$0xff] (!%p140_p2)   ;;  %v681_v10 = vld [vmem:[%s810_s1 + $0x68] sm:$0xff] (!%p140_p2)  }
   0x8   : > { %609 = vmatprep.subr.bf16.mxu0 (!%p140_p2), %v673_v2  ;;  %648 = vmatprep.subr.bf16.mxu1 (!%p140_p2), %v673_v2  ;;  %v678_v7 = vld [vmem:[%s810_s1 + $0x18] sm:$0xff] (!%p140_p2)   ;;  %v680_v9 = vld [vmem:[%s810_s1 + $0x20] sm:$0xff] (!%p140_p2)   ;;  %v682_v13 = vld [vmem:[%s810_s1 + $0x28] sm:$0xff] (!%p140_p2)  }
   0x9   : > { %v683_v14 = vld [vmem:[%s810_s1 + $0x70] sm:$0xff] (!%p140_p2)   ;;  %v685_v16 = vld [vmem:[%s810_s1 + $0x78] sm:$0xff] (!%p140_p2)   ;;  %v540_v26 = vld [vmem:[%s811_s2] ss:$0 sm:$0xff] (!%p140_p2) }
   0xa   : > { %v684_v15 = vld [vmem:[%s810_s1 + $0x30] sm:$0xff] (!%p140_p2)   ;;  %v686_v17 = vld [vmem:[%s810_s1 + $0x38] sm:$0xff] (!%p140_p2)  }
   0xb   : > { %610 = vmatpush3.bf16.msra.mxu0 (!%p140_p2), %v674_v3  ;;  %656 = vmatpush3.bf16.msra.mxu1 (!%p140_p2), %v674_v3 }
   0xc   : > { %611 = vmatprep.subr.bf16.mxu0 (!%p140_p2), %v675_v4  ;;  %649 = vmatprep.subr.bf16.mxu1 (!%p140_p2), %v675_v4 }
   0xd   : > { %s814_s16 = smov (!%p165_p3, %s535_s16), 15 }
   0xe   : > { %s575_s4 = sshll.u32 %s814_s16, 3  ;;  %s539_s28 = sshll.u32 %s814_s16, 2 }
   0xf   : > { %612 = vmatpush3.bf16.msra.mxu0 %v676_v5  ;;  %657 = vmatpush3.bf16.msra.mxu1 %v676_v5  ;;  %s768_s9 = scalar_lea.vmem %s809_s0, %s575_s4  ;;  %s175_s4 = scalar_lea.vmem %s812_s3, %s539_s28 }
  0x10   : > { %613 = vmatprep.subr.bf16.mxu0 %v677_v6  ;;  %650 = vmatprep.subr.bf16.mxu1 %v677_v6  ;;  %v689_v11 = vld [vmem:[%s768_s9 + $0x4] ss:$8 sps:$4 sm:$0xff]   ;;  %v687_v18 = vld [vmem:[%s768_s9] ss:$8 sps:$4 sm:$0xff]   ;;  %v693_v20 = vld [vmem:[%s768_s9 + $0x14] ss:$8 sps:$4 sm:$0xff]  }
  0x11   : > { %v692_v12 = vld [vmem:[%s768_s9 + $0x24] ss:$8 sps:$4 sm:$0xff]   ;;  %393 = vmatprep.mubr.bf16.mxu0 %v689_v11  ;;  %v690_v19 = vld [vmem:[%s768_s9 + $0x20] ss:$8 sps:$4 sm:$0xff]   ;;  %v695_v21 = vld [vmem:[%s768_s9 + $0x34] ss:$8 sps:$4 sm:$0xff]  }
  0x12   : > { %409 = vmatprep.mubr.bf16.mxu1 %v692_v12  ;;  %v697_v22 = vld [vmem:[%s768_s9 + $0x10] ss:$8 sps:$4 sm:$0xff]  }
  0x13   : > { %614 = vmatpush3.bf16.msra.mxu0 %v678_v7  ;;  %658 = vmatpush3.bf16.msra.mxu1 %v678_v7  ;;  %v698_v23 = vld [vmem:[%s768_s9 + $0x30] ss:$8 sps:$4 sm:$0xff]  }
  0x14   : > { %615 = vmatprep.subr.bf16.mxu0 %v679_v8  ;;  %651 = vmatprep.subr.bf16.mxu1 %v679_v8 }
  0x17   : > { %616 = vmatpush3.bf16.msra.mxu0 %v680_v9  ;;  %659 = vmatpush3.bf16.msra.mxu1 %v680_v9 }
  0x18   : > { %617 = vmatprep.subr.bf16.mxu0 %v681_v10  ;;  %652 = vmatprep.subr.bf16.mxu1 %v681_v10 }
  0x1b   : > { %618 = vmatpush3.bf16.msra.mxu0 %v682_v13  ;;  %660 = vmatpush3.bf16.msra.mxu1 %v682_v13 }
  0x1c   : > { %619 = vmatprep.subr.bf16.mxu0 %v683_v14  ;;  %653 = vmatprep.subr.bf16.mxu1 %v683_v14 }
  0x1f   : > { %620 = vmatpush3.bf16.msra.mxu0 %v684_v15  ;;  %661 = vmatpush3.bf16.msra.mxu1 %v684_v15 }
  0x20   : > { %621 = vmatprep.subr.bf16.mxu0 %v685_v16  ;;  %654 = vmatprep.subr.bf16.mxu1 %v685_v16 }
  0x23   : > { %622 = vmatpush3.bf16.msra.mxu0 %v686_v17  ;;  %662 = vmatpush3.bf16.msra.mxu1 %v686_v17 }
  0x26   : > { %394 = vmatmul.mubr.bf16.vlgmr.msra.gmra.mrb[0].mxu0 %v687_v18  ;;  %410 = vmatmul.mubr.bf16.vlgmr.msra.gmra.mrb[0].mxu1 %v690_v19 }
  0x27   : > { %401 = vmatprep.mubr.bf16.mxu0 %v693_v20  ;;  %417 = vmatprep.mubr.bf16.mxu1 %v695_v21 }
  0x2e   : > { %402 = vmatmul.mubr.bf16.gmra.mrb[4].mxu0 %v697_v22  ;;  %418 = vmatmul.mubr.bf16.gmra.mrb[4].mxu1 %v698_v23 }
  0xf9   : > { %v623_v24 = vpop.f32.mrb[0].mxu0  ;;  %v635_v25 = vpop.f32.mrb[0].mxu1 }
  0xfa   : > { %v624_v27 = vpop.f32.mrb[1].mxu0  ;;  %v636_v28 = vpop.f32.mrb[1].mxu1 }
  0xfb   : > { %v625_v29 = vadd.f32 %v624_v27, %v623_v24  ;;  %v637_v30 = vadd.f32 %v636_v28, %v635_v25  ;;  %v626_v31 = vpop.f32.mrb[2].mxu0  ;;  %v638_v32 = vpop.f32.mrb[2].mxu1 }
  0xfc   : > { %v627_v33 = vpop.f32.mrb[3].mxu0  ;;  %v639_v34 = vpop.f32.mrb[3].mxu1 }
  0xfd   : > { %v396_v35 = vadd.f32 %v625_v29, %v540_v26  ;;  %v412_v36 = vadd.f32 %v637_v30, %v540_v26  ;;  %v628_v37 = vadd.f32 %v627_v33, %v626_v31  ;;  %v640_v38 = vadd.f32 %v639_v34, %v638_v32 }
  0xff   : > { %v399_v39 = vadd.f32 %v628_v37, %v540_v26  ;;  %v415_v40 = vadd.f32 %v640_v38, %v540_v26  ;;  %v426_v41 = vmax.f32 %v396_v35, 0.0  ;;  %v430_v42 = vmax.f32 %v412_v36, 0.0 }
 0x101   : > { %v427_v43 = vmax.f32 %v399_v39, 0.0  ;;  %v431_v44 = vmax.f32 %v415_v40, 0.0  ;;  %v629_v45 = vpop.f32.mrb[4].mxu0  ;;  %v641_v46 = vpop.f32.mrb[4].mxu1 }
 0x102   : > { %v630_v47 = vpop.f32.mrb[5].mxu0  ;;  %v642_v48 = vpop.f32.mrb[5].mxu1 }
 0x103   : > { %v587_v49 = vpack.c.bf16 %v427_v43, %v426_v41  ;;  %v597_v50 = vpack.c.bf16 %v431_v44, %v430_v42  ;;  %v631_v51 = vadd.f32 %v630_v47, %v629_v45  ;;  %v643_v52 = vadd.f32 %v642_v48, %v641_v46  ;;  %v632_v53 = vpop.f32.mrb[6].mxu0  ;;  %v644_v54 = vpop.f32.mrb[6].mxu1 }
 0x104   : > { %v633_v55 = vpop.f32.mrb[7].mxu0  ;;  %v645_v56 = vpop.f32.mrb[7].mxu1 }
 0x105   : > { %588 = vst [vmem:[%s175_s4] sm:$0xff] %v587_v49   ;;  %605 = vst [vmem:[%s175_s4 + $0x10] sm:$0xff] %v597_v50   ;;  %v404_v57 = vadd.f32 %v631_v51, %v540_v26  ;;  %v420_v58 = vadd.f32 %v643_v52, %v540_v26  ;;  %v634_v59 = vadd.f32 %v633_v55, %v632_v53 }
 0x106   : > { %v646_v60 = vadd.f32 %v645_v56, %v644_v54 }
 0x107   : > { %v407_v61 = vadd.f32 %v634_v59, %v540_v26  ;;  %v428_v63 = vmax.f32 %v404_v57, 0.0  ;;  %v432_v0 = vmax.f32 %v420_v58, 0.0 }
 0x108   : > { %v423_v62 = vadd.f32 %v646_v60, %v540_v26 }
 0x109   : > { %v429_v1 = vmax.f32 %v407_v61, 0.0 }
 0x10a   : > { %v433_v2 = vmax.f32 %v423_v62, 0.0 }
 0x10b   : > { %v592_v3 = vpack.c.bf16 %v429_v1, %v428_v63 }
 0x10c   : > { %v602_v4 = vpack.c.bf16 %v433_v2, %v432_v0 }
 0x10d   : > { %604 = vst [vmem:[%s175_s4 + $0x8] sm:$0xff] %v592_v3  }
 0x10e   : > { %606 = vst [vmem:[%s175_s4 + $0x18] sm:$0xff] %v602_v4  }
 0x10f PF: > { %s13_s12 = sadd.s32 1, %s705_s12  }
 0x110   : > { %p10_p4 = scmp.ge.s32.totalorder %s13_s12, 4  }
 0x112   :  { %12 = sbr.rel (!%p10_p4) target bundleno = 1 (0x1), region = 62 }

// kernel: _lambda_.49
= control target key start
LH: loop header
LB: loop body
LE: loop exit
PB: predicated region body
PF: predicated region fallthrough
CT: control target
= control target key end

     0   :  { %s663_s12 = smov 0   ;;  %s790_s0 = inlined_call_operand.vmem [shape: bf16[32,256], index: 0, kind: input, shape index: {}]   ;;  %s791_s1 = inlined_call_operand.vmem [shape: bf16[256,256], index: 1, kind: input, shape index: {}]   ;;  %s792_s2 = inlined_call_operand.vmem [shape: f32[1,256], index: 2, kind: input, shape index: {}]   ;;  %s793_s3 = inlined_call_operand.vmem [shape: bf16[32,256], index: 3, kind: output, shape index: {}]  }
   0x1 LB: > { %s523_s13 = sadd.s32 4294967295, %s641_s12   ;;  %p527_p0 = scmp.ge.s32.totalorder %s641_s12, 1  ;;  %s641_s12 = sphi %s663_s12, %s13_s12  }
   0x2   : > { %p139_p1 = scmp.lt.s32.totalorder %s641_s12, 3 }
   0x4   : > { %p140_p2 = pnand %p527_p0, %p139_p1 }
   0x5   : > { %v584_v0 = vld [vmem:[%s791_s1 + $0x4] ss:$8 sps:$4 sm:$0xff] (!%p140_p2)   ;;  %v586_v1 = vld [vmem:[%s791_s1] ss:$8 sps:$4 sm:$0xff] (!%p140_p2)   ;;  %v587_v2 = vld [vmem:[%s791_s1 + $0x14] ss:$8 sps:$4 sm:$0xff] (!%p140_p2)   ;;  %v215_v34 = vlaneseq (!%p140_p2) }
   0x6   : > { %143 = sbr.rel (%p140_p2) target bundleno = 291 (0x123), region = 32  ;;  %395 = vmatprep.subr.bf16.mxu0 (!%p140_p2), %v584_v0  ;;  %v589_v3 = vld [vmem:[%s791_s1 + $0x10] ss:$8 sps:$4 sm:$0xff] (!%p140_p2)   ;;  %v590_v4 = vld [vmem:[%s791_s1 + $0x24] ss:$8 sps:$4 sm:$0xff] (!%p140_p2)   ;;  %s528_s24 = sshll.u32 (!%p140_p2), %s523_s13, 1 }
   0x7   : > { %396 = vmatpush1.bf16.msra.mxu0 (!%p140_p2), %v586_v1  ;;  %v592_v5 = vld [vmem:[%s791_s1 + $0x20] ss:$8 sps:$4 sm:$0xff] (!%p140_p2)   ;;  %v593_v6 = vld [vmem:[%s791_s1 + $0x34] ss:$8 sps:$4 sm:$0xff] (!%p140_p2)   ;;  %p166_p3 = scmp.lt.s32.totalorder (!%p140_p2), %s528_s24, 3  ;;  %v216_v35 = vshrl.u32 (!%p140_p2), %v215_v34, 7 }
   0x8   : > { %397 = vmatprep.subr.bf16.mxu0 (!%p140_p2), %v587_v2  ;;  %v595_v7 = vld [vmem:[%s791_s1 + $0x30] ss:$8 sps:$4 sm:$0xff] (!%p140_p2)   ;;  %v596_v8 = vld [vmem:[%s791_s1 + $0x44] ss:$8 sps:$4 sm:$0xff] (!%p140_p2)   ;;  %v598_v9 = vld [vmem:[%s791_s1 + $0x40] ss:$8 sps:$4 sm:$0xff] (!%p140_p2)  }
   0x9   : > { %v599_v10 = vld [vmem:[%s791_s1 + $0x54] ss:$8 sps:$4 sm:$0xff] (!%p140_p2)   ;;  %v601_v11 = vld [vmem:[%s791_s1 + $0x50] ss:$8 sps:$4 sm:$0xff] (!%p140_p2)   ;;  %v602_v12 = vld [vmem:[%s791_s1 + $0x64] ss:$8 sps:$4 sm:$0xff] (!%p140_p2)  }
   0xa   : > { %v604_v14 = vld [vmem:[%s791_s1 + $0x60] ss:$8 sps:$4 sm:$0xff] (!%p140_p2)   ;;  %v605_v15 = vld [vmem:[%s791_s1 + $0x74] ss:$8 sps:$4 sm:$0xff] (!%p140_p2)   ;;  %v607_v16 = vld [vmem:[%s791_s1 + $0x70] ss:$8 sps:$4 sm:$0xff] (!%p140_p2)  }
   0xb   : > { %398 = vmatpush1.bf16.msra.mxu0 (!%p140_p2), %v589_v3  ;;  %v608_v17 = vld [vmem:[%s791_s1 + $0x84] ss:$8 sps:$4 sm:$0xff] (!%p140_p2)   ;;  %v610_v18 = vld [vmem:[%s791_s1 + $0x80] ss:$8 sps:$4 sm:$0xff] (!%p140_p2)   ;;  %v611_v19 = vld [vmem:[%s791_s1 + $0x94] ss:$8 sps:$4 sm:$0xff] (!%p140_p2)  }
   0xc   : > { %399 = vmatprep.subr.bf16.mxu0 (!%p140_p2), %v590_v4  ;;  %v613_v20 = vld [vmem:[%s791_s1 + $0x90] ss:$8 sps:$4 sm:$0xff] (!%p140_p2)   ;;  %v614_v21 = vld [vmem:[%s791_s1 + $0xa4] ss:$8 sps:$4 sm:$0xff] (!%p140_p2)   ;;  %v616_v22 = vld [vmem:[%s791_s1 + $0xa0] ss:$8 sps:$4 sm:$0xff] (!%p140_p2)  }
   0xd   : > { %s795_s24 = smov (!%p166_p3, %s528_s24), 3  ;;  %v617_v23 = vld [vmem:[%s791_s1 + $0xb4] ss:$8 sps:$4 sm:$0xff]   ;;  %v619_v24 = vld [vmem:[%s791_s1 + $0xb0] ss:$8 sps:$4 sm:$0xff]   ;;  %v217_v36 = vsub.s32 0, %v216_v35 }
   0xe   : > { %s572_s10 = sshll.u32 %s795_s24, 3  ;;  %v620_v25 = vld [vmem:[%s791_s1 + $0xc4] ss:$8 sps:$4 sm:$0xff]   ;;  %v622_v26 = vld [vmem:[%s791_s1 + $0xc0] ss:$8 sps:$4 sm:$0xff]   ;;  %v221_v38 = vsub.s32 1, %v216_v35 }
   0xf   : > { %400 = vmatpush1.bf16.msra.mxu0 %v592_v5  ;;  %s715_s16 = scalar_lea.vmem %s790_s0, %s572_s10  ;;  %v623_v27 = vld [vmem:[%s791_s1 + $0xd4] ss:$8 sps:$4 sm:$0xff]   ;;  %v625_v28 = vld [vmem:[%s791_s1 + $0xd0] ss:$8 sps:$4 sm:$0xff]   ;;  %v626_v29 = vld [vmem:[%s791_s1 + $0xe4] ss:$8 sps:$4 sm:$0xff]   ;;  %s177_s13 = scalar_lea.vmem %s793_s3, %s572_s10 }
  0x10   : > { %401 = vmatprep.subr.bf16.mxu0 %v593_v6  ;;  %v634_v13 = vld [vmem:[%s715_s16 + $0x4] ss:$8 sps:$4 sm:$0xff]   ;;  %v628_v30 = vld [vmem:[%s791_s1 + $0xe0] ss:$8 sps:$4 sm:$0xff]   ;;  %v629_v31 = vld [vmem:[%s791_s1 + $0xf4] ss:$8 sps:$4 sm:$0xff]  }
  0x11   : > { %427 = vmatprep.mubr.bf16.mxu0 %v634_v13  ;;  %v631_v32 = vld [vmem:[%s791_s1 + $0xf0] ss:$8 sps:$4 sm:$0xff]   ;;  %v632_v33 = vld [vmem:[%s715_s16] ss:$8 sps:$4 sm:$0xff]  }
  0x12   : > { %v213_v37 = vld [vmem:[%s792_s2] sm:$0x3] }
  0x13   : > { %402 = vmatpush1.bf16.msra.mxu0 %v595_v7  ;;  %v218_v39 = vrot.slane %v213_v37, %v217_v36  ;;  %v222_v40 = vrot.slane %v213_v37, %v221_v38 }
  0x14   : > { %403 = vmatprep.subr.bf16.mxu0 %v596_v8 }
  0x17   : > { %404 = vmatpush1.bf16.msra.mxu0 %v598_v9 }
  0x18   : > { %405 = vmatprep.subr.bf16.mxu0 %v599_v10 }
  0x1b   : > { %406 = vmatpush1.bf16.msra.mxu0 %v601_v11 }
  0x1c   : > { %407 = vmatprep.subr.bf16.mxu0 %v602_v12 }
  0x1f   : > { %408 = vmatpush1.bf16.msra.mxu0 %v604_v14 }
  0x20   : > { %409 = vmatprep.subr.bf16.mxu0 %v605_v15 }
  0x23   : > { %410 = vmatpush1.bf16.msra.mxu0 %v607_v16 }
  0x24   : > { %411 = vmatprep.subr.bf16.mxu0 %v608_v17 }
  0x27   : > { %412 = vmatpush1.bf16.msra.mxu0 %v610_v18 }
  0x28   : > { %413 = vmatprep.subr.bf16.mxu0 %v611_v19 }
  0x2b   : > { %414 = vmatpush1.bf16.msra.mxu0 %v613_v20 }
  0x2c   : > { %415 = vmatprep.subr.bf16.mxu0 %v614_v21 }
  0x2f   : > { %416 = vmatpush1.bf16.msra.mxu0 %v616_v22 }
  0x30   : > { %417 = vmatprep.subr.bf16.mxu0 %v617_v23 }
  0x33   : > { %418 = vmatpush1.bf16.msra.mxu0 %v619_v24 }
  0x34   : > { %419 = vmatprep.subr.bf16.mxu0 %v620_v25 }
  0x37   : > { %420 = vmatpush1.bf16.msra.mxu0 %v622_v26 }
  0x38   : > { %421 = vmatprep.subr.bf16.mxu0 %v623_v27 }
  0x3b   : > { %422 = vmatpush1.bf16.msra.mxu0 %v625_v28 }
  0x3c   : > { %423 = vmatprep.subr.bf16.mxu0 %v626_v29 }
  0x3f   : > { %424 = vmatpush1.bf16.msra.mxu0 %v628_v30 }
  0x40   : > { %425 = vmatprep.subr.bf16.mxu0 %v629_v31 }
  0x43   : > { %426 = vmatpush1.bf16.msra.mxu0 %v631_v32 }
  0x46   : > { %428 = vmatmul.mubr.bf16.vlgmr.msra.gmra.mrb[0].mxu0 %v632_v33 }
 0x119   : > { %v429_v41 = vpop.f32.mrb[0].mxu0 }
 0x11a   : > { %v430_v42 = vadd.f32 %v429_v41, %v218_v39  ;;  %v431_v43 = vpop.f32.mrb[1].mxu0 }
 0x11b   : > { %v432_v44 = vadd.f32 %v431_v43, %v222_v40  ;;  %v433_v45 = vpop.f32.mrb[2].mxu0 }
 0x11c   : > { %v443_v46 = vmax.f32 %v430_v42, 0.0  ;;  %v434_v47 = vadd.f32 %v433_v45, %v218_v39  ;;  %v435_v48 = vpop.f32.mrb[3].mxu0 }
 0x11d   : > { %v436_v49 = vadd.f32 %v435_v48, %v222_v40 }
 0x11e   : > { %v574_v50 = vpack.c.bf16 %v432_v44, %v443_v46  ;;  %v445_v51 = vmax.f32 %v434_v47, 0.0 }
 0x120   : > { %463 = vst [vmem:[%s177_s13] sm:$0xff] %v574_v50  ;;  %v575_v52 = vpack.c.bf16 %v436_v49, %v445_v51 }
 0x122   : > { %464 = vst [vmem:[%s177_s13 + $0x8] sm:$0xff] %v575_v52 }
 0x123 PF: > { %s13_s12 = sadd.s32 1, %s641_s12  }
 0x124   : > { %p10_p4 = scmp.ge.s32.totalorder %s13_s12, 4  }
 0x126   :  { %12 = sbr.rel (!%p10_p4) target bundleno = 1 (0x1), region = 62 }

// kernel: _lambda_.51
= control target key start
LH: loop header
LB: loop body
LE: loop exit
PB: predicated region body
PF: predicated region fallthrough
CT: control target
= control target key end

     0   :  { %s715_s12 = smov 0   ;;  %s811_s0 = inlined_call_operand.vmem [shape: bf16[32,384], index: 0, kind: input, shape index: {}]   ;;  %s812_s1 = inlined_call_operand.vmem [shape: bf16[384,128], index: 1, kind: input, shape index: {}]   ;;  %s813_s2 = inlined_call_operand.vmem [shape: f32[1,128], index: 2, kind: input, shape index: {}]   ;;  %s814_s3 = inlined_call_operand.vmem [shape: bf16[32,128], index: 3, kind: output, shape index: {}]  }
   0x1 LB: > { %s547_s13 = sadd.s32 4294967295, %s691_s12   ;;  %p551_p0 = scmp.ge.s32.totalorder %s691_s12, 1  ;;  %s691_s12 = sphi %s715_s12, %s13_s12  }
   0x2   : > { %p139_p1 = scmp.lt.s32.totalorder %s691_s12, 3 }
   0x4   : > { %p140_p2 = pnand %p551_p0, %p139_p1 }
   0x5   : > { %v657_v0 = vld [vmem:[%s812_s1 + $0x40] sm:$0xff] (!%p140_p2)   ;;  %v693_v2 = vmov (!%p140_p2), 0.0   ;;  %v660_v4 = vld [vmem:[%s812_s1 + $0x48] sm:$0xff] (!%p140_p2)   ;;  %vm694_vm0 = vmmov (!%p140_p2), 0   ;;  %v663_v7 = vld [vmem:[%s812_s1 + $0x50] sm:$0xff] (!%p140_p2)   ;;  %s552_s28 = sshll.u32 (!%p140_p2), %s547_s13, 1 }
   0x6   : > { %143 = sbr.rel (%p140_p2) target bundleno = 264 (0x108), region = 32  ;;  %v658_v1 = vld [vmem:[%s812_s1] sm:$0xff] (!%p140_p2)   ;;  %626 = vmatprep.subr.bf16.mxu1 (!%p140_p2), %v693_v2  ;;  %595 = vmatprep.subr.bf16.mxu0 (!%p140_p2), %v657_v0  ;;  %v661_v5 = vld [vmem:[%s812_s1 + $0x8] sm:$0xff] (!%p140_p2)   ;;  %v664_v8 = vld [vmem:[%s812_s1 + $0x10] sm:$0xff] (!%p140_p2)   ;;  %p165_p3 = scmp.lt.s32.totalorder (!%p140_p2), %s552_s28, 3 }
   0x7   : > { %v659_v3 = vld [vmem:[%s812_s1 + $0x80] sm:$0xff] (!%p140_p2)   ;;  %596 = vmatpush3.bf16.msra.mxu0 (!%p140_p2), %v658_v1  ;;  %642 = vmatprep.mubr.msk.bf16.mxu1 (!%p140_p2), %vm694_vm0, %v693_v2  ;;  %v662_v6 = vld [vmem:[%s812_s1 + $0x88] sm:$0xff] (!%p140_p2)   ;;  %v665_v9 = vld [vmem:[%s812_s1 + $0x90] sm:$0xff] (!%p140_p2)  }
   0x8   : > { %627 = vmatpush3.bf16.msra.mxu1 (!%p140_p2), %v659_v3  ;;  %597 = vmatprep.subr.bf16.mxu0 (!%p140_p2), %v660_v4  ;;  %v666_v10 = vld [vmem:[%s812_s1 + $0x58] sm:$0xff] (!%p140_p2)   ;;  %v669_v13 = vld [vmem:[%s812_s1 + $0x60] sm:$0xff] (!%p140_p2)   ;;  %v672_v16 = vld [vmem:[%s812_s1 + $0x68] sm:$0xff] (!%p140_p2)  }
   0x9   : > { %628 = vmatprep.subr.bf16.mxu1 (!%p140_p2), %v693_v2  ;;  %v667_v11 = vld [vmem:[%s812_s1 + $0x18] sm:$0xff] (!%p140_p2)   ;;  %v670_v14 = vld [vmem:[%s812_s1 + $0x20] sm:$0xff] (!%p140_p2)   ;;  %v673_v17 = vld [vmem:[%s812_s1 + $0x28] sm:$0xff] (!%p140_p2)  }
   0xa   : > { %v668_v12 = vld [vmem:[%s812_s1 + $0x98] sm:$0xff] (!%p140_p2)   ;;  %v671_v15 = vld [vmem:[%s812_s1 + $0xa0] sm:$0xff] (!%p140_p2)   ;;  %v674_v18 = vld [vmem:[%s812_s1 + $0xa8] sm:$0xff] (!%p140_p2)  }
   0xb   : > { %598 = vmatpush3.bf16.msra.mxu0 (!%p140_p2), %v661_v5  ;;  %v675_v19 = vld [vmem:[%s812_s1 + $0x70] sm:$0xff] (!%p140_p2)   ;;  %v678_v22 = vld [vmem:[%s812_s1 + $0x78] sm:$0xff] (!%p140_p2)   ;;  %v556_v30 = vld [vmem:[%s813_s2] ss:$0 sm:$0xff] (!%p140_p2) }
   0xc   : > { %629 = vmatpush3.bf16.msra.mxu1 (!%p140_p2), %v662_v6  ;;  %599 = vmatprep.subr.bf16.mxu0 (!%p140_p2), %v663_v7  ;;  %v676_v20 = vld [vmem:[%s812_s1 + $0x30] sm:$0xff] (!%p140_p2)   ;;  %v679_v24 = vld [vmem:[%s812_s1 + $0x38] sm:$0xff] (!%p140_p2)  }
   0xd   : > { %630 = vmatprep.subr.bf16.mxu1 %v693_v2  ;;  %s816_s28 = smov (!%p165_p3, %s552_s28), 3  ;;  %v677_v21 = vld [vmem:[%s812_s1 + $0xb0] sm:$0xff]   ;;  %v683_v25 = vld [vmem:[%s812_s1 + $0xb8] sm:$0xff]  }
   0xe   : > { %s646_s21 = smul.u32 12, %s816_s28  ;;  %s555_s18 = sshll.u32 %s816_s28, 2 }
   0xf   : > { %600 = vmatpush3.bf16.msra.mxu0 %v664_v8 }
  0x10   : > { %631 = vmatpush3.bf16.msra.mxu1 %v665_v9  ;;  %601 = vmatprep.subr.bf16.mxu0 %v666_v10  ;;  %s169_s6 = scalar_lea.vmem %s811_s0, %s646_s21  ;;  %s175_s21 = scalar_lea.vmem %s814_s3, %s555_s18 }
  0x11   : > { %632 = vmatprep.subr.bf16.mxu1 %v693_v2  ;;  %v682_v23 = vld [vmem:[%s169_s6 + $0x4] ss:$12 sps:$4 sm:$0xff]   ;;  %v680_v26 = vld [vmem:[%s169_s6] ss:$12 sps:$4 sm:$0xff]   ;;  %v684_v27 = vld [vmem:[%s169_s6 + $0x8] ss:$12 sps:$4 sm:$0xff]  }
  0x12   : > { %429 = vmatprep.mubr.bf16.mxu0 %v682_v23 }
  0x13   : > { %602 = vmatpush3.bf16.msra.mxu0 %v667_v11 }
  0x14   : > { %633 = vmatpush3.bf16.msra.mxu1 %v668_v12  ;;  %603 = vmatprep.subr.bf16.mxu0 %v669_v13 }
  0x15   : > { %634 = vmatprep.subr.bf16.mxu1 %v693_v2 }
  0x17   : > { %604 = vmatpush3.bf16.msra.mxu0 %v670_v14 }
  0x18   : > { %635 = vmatpush3.bf16.msra.mxu1 %v671_v15  ;;  %605 = vmatprep.subr.bf16.mxu0 %v672_v16 }
  0x19   : > { %636 = vmatprep.subr.bf16.mxu1 %v693_v2 }
  0x1b   : > { %606 = vmatpush3.bf16.msra.mxu0 %v673_v17 }
  0x1c   : > { %637 = vmatpush3.bf16.msra.mxu1 %v674_v18  ;;  %607 = vmatprep.subr.bf16.mxu0 %v675_v19 }
  0x1d   : > { %638 = vmatprep.subr.bf16.mxu1 %v693_v2 }
  0x1f   : > { %608 = vmatpush3.bf16.msra.mxu0 %v676_v20 }
  0x20   : > { %639 = vmatpush3.bf16.msra.mxu1 %v677_v21  ;;  %609 = vmatprep.subr.bf16.mxu0 %v678_v22 }
  0x21   : > { %640 = vmatprep.subr.bf16.mxu1 %v693_v2 }
  0x23   : > { %610 = vmatpush3.bf16.msra.mxu0 %v679_v24 }
  0x24   : > { %641 = vmatpush3.bf16.msra.mxu1 %v683_v25 }
  0x26   : > { %430 = vmatmul.mubr.bf16.vlgmr.msra.gmra.mrb[0].mxu0 %v680_v26 }
  0x27   : > { %643 = vmatmul.mubr.bf16.vlgmr.msra.gmra.mrb[0].mxu1 %v684_v27 }
  0xf9   : > { %v611_v28 = vpop.f32.mrb[0].mxu0 }
  0xfa   : > { %v612_v29 = vpop.f32.mrb[1].mxu0  ;;  %v472_v31 = vpop.f32.mrb[0].mxu1 }
  0xfb   : > { %v613_v32 = vadd.f32 %v612_v29, %v611_v28  ;;  %v614_v33 = vpop.f32.mrb[2].mxu0  ;;  %v644_v34 = vpop.f32.mrb[1].mxu1 }
  0xfc   : > { %v615_v35 = vpop.f32.mrb[3].mxu0  ;;  %v475_v36 = vpop.f32.mrb[2].mxu1 }
  0xfd   : > { %v432_v37 = vadd.f32 %v613_v32, %v556_v30  ;;  %v616_v38 = vadd.f32 %v615_v35, %v614_v33  ;;  %v645_v39 = vpop.f32.mrb[3].mxu1 }
  0xff   : > { %v473_v40 = vadd.f32 %v472_v31, %v432_v37  ;;  %v435_v41 = vadd.f32 %v616_v38, %v556_v30 }
 0x101   : > { %v476_v42 = vadd.f32 %v475_v36, %v435_v41  ;;  %v479_v43 = vmax.f32 %v473_v40, 0.0 }
 0x103   : > { %v480_v44 = vmax.f32 %v476_v42, 0.0 }
 0x105   : > { %v593_v45 = vpack.c.bf16 %v480_v44, %v479_v43 }
 0x107   : > { %594 = vst [vmem:[%s175_s21] sm:$0xff] %v593_v45  }
 0x108 PF: > { %s13_s12 = sadd.s32 1, %s691_s12  }
 0x109   : > { %p10_p4 = scmp.ge.s32.totalorder %s13_s12, 4  }
 0x10b   :  { %12 = sbr.rel (!%p10_p4) target bundleno = 1 (0x1), region = 62 }

// kernel: _lambda_.50
= control target key start
LH: loop header
LB: loop body
LE: loop exit
PB: predicated region body
PF: predicated region fallthrough
CT: control target
= control target key end

     0   :  { %s793_s15 = smov 0   ;;  %s892_s0 = inlined_call_operand.vmem [shape: bf16[32,384], index: 0, kind: input, shape index: {}]   ;;  %s893_s1 = inlined_call_operand.vmem [shape: bf16[384,128], index: 1, kind: input, shape index: {}]   ;;  %s894_s2 = inlined_call_operand.vmem [shape: f32[1,128], index: 2, kind: input, shape index: {}]   ;;  %s895_s3 = inlined_call_operand.vmem [shape: bf16[32,128], index: 3, kind: input, shape index: {}]   ;;  %s896_s4 = inlined_call_operand.vmem [shape: bf16[32,128], index: 4, kind: output, shape index: {}]  }
   0x1 LB: > { %s614_s16 = sadd.s32 4294967295, %s764_s15   ;;  %p618_p0 = scmp.ge.s32.totalorder %s764_s15, 1  ;;  %s764_s15 = sphi %s793_s15, %s14_s15  }
   0x2   : > { %p175_p1 = scmp.lt.s32.totalorder %s764_s15, 3 }
   0x4   : > { %p176_p2 = pnand %p618_p0, %p175_p1 }
   0x5   : > { %v730_v0 = vld [vmem:[%s893_s1 + $0x40] sm:$0xff] (!%p176_p2)   ;;  %v766_v2 = vmov (!%p176_p2), 0.0   ;;  %v733_v4 = vld [vmem:[%s893_s1 + $0x48] sm:$0xff] (!%p176_p2)   ;;  %vm767_vm0 = vmmov (!%p176_p2), 0   ;;  %v736_v7 = vld [vmem:[%s893_s1 + $0x50] sm:$0xff] (!%p176_p2)   ;;  %s619_s5 = sshll.u32 (!%p176_p2), %s614_s16, 1 }
   0x6   : > { %179 = sbr.rel (%p176_p2) target bundleno = 266 (0x10a), region = 36  ;;  %v731_v1 = vld [vmem:[%s893_s1] sm:$0xff] (!%p176_p2)   ;;  %699 = vmatprep.subr.bf16.mxu1 (!%p176_p2), %v766_v2  ;;  %668 = vmatprep.subr.bf16.mxu0 (!%p176_p2), %v730_v0  ;;  %v734_v5 = vld [vmem:[%s893_s1 + $0x8] sm:$0xff] (!%p176_p2)   ;;  %v737_v8 = vld [vmem:[%s893_s1 + $0x10] sm:$0xff] (!%p176_p2)   ;;  %p208_p3 = scmp.lt.s32.totalorder (!%p176_p2), %s619_s5, 3 }
   0x7   : > { %v732_v3 = vld [vmem:[%s893_s1 + $0x80] sm:$0xff] (!%p176_p2)   ;;  %669 = vmatpush3.bf16.msra.mxu0 (!%p176_p2), %v731_v1  ;;  %715 = vmatprep.mubr.msk.bf16.mxu1 (!%p176_p2), %vm767_vm0, %v766_v2  ;;  %v735_v6 = vld [vmem:[%s893_s1 + $0x88] sm:$0xff] (!%p176_p2)   ;;  %v738_v9 = vld [vmem:[%s893_s1 + $0x90] sm:$0xff] (!%p176_p2)  }
   0x8   : > { %700 = vmatpush3.bf16.msra.mxu1 (!%p176_p2), %v732_v3  ;;  %670 = vmatprep.subr.bf16.mxu0 (!%p176_p2), %v733_v4  ;;  %v739_v10 = vld [vmem:[%s893_s1 + $0x58] sm:$0xff] (!%p176_p2)   ;;  %v742_v13 = vld [vmem:[%s893_s1 + $0x60] sm:$0xff] (!%p176_p2)   ;;  %v745_v16 = vld [vmem:[%s893_s1 + $0x68] sm:$0xff] (!%p176_p2)  }
   0x9   : > { %701 = vmatprep.subr.bf16.mxu1 (!%p176_p2), %v766_v2  ;;  %v740_v11 = vld [vmem:[%s893_s1 + $0x18] sm:$0xff] (!%p176_p2)   ;;  %v743_v14 = vld [vmem:[%s893_s1 + $0x20] sm:$0xff] (!%p176_p2)   ;;  %v746_v17 = vld [vmem:[%s893_s1 + $0x28] sm:$0xff] (!%p176_p2)  }
   0xa   : > { %v741_v12 = vld [vmem:[%s893_s1 + $0x98] sm:$0xff] (!%p176_p2)   ;;  %v744_v15 = vld [vmem:[%s893_s1 + $0xa0] sm:$0xff] (!%p176_p2)   ;;  %v747_v18 = vld [vmem:[%s893_s1 + $0xa8] sm:$0xff] (!%p176_p2)  }
   0xb   : > { %671 = vmatpush3.bf16.msra.mxu0 (!%p176_p2), %v734_v5  ;;  %v748_v19 = vld [vmem:[%s893_s1 + $0x70] sm:$0xff] (!%p176_p2)   ;;  %v751_v22 = vld [vmem:[%s893_s1 + $0x78] sm:$0xff] (!%p176_p2)   ;;  %v625_v30 = vld [vmem:[%s894_s2] ss:$0 sm:$0xff] (!%p176_p2) }
   0xc   : > { %702 = vmatpush3.bf16.msra.mxu1 (!%p176_p2), %v735_v6  ;;  %672 = vmatprep.subr.bf16.mxu0 (!%p176_p2), %v736_v7  ;;  %v749_v20 = vld [vmem:[%s893_s1 + $0x30] sm:$0xff] (!%p176_p2)   ;;  %v752_v24 = vld [vmem:[%s893_s1 + $0x38] sm:$0xff] (!%p176_p2)  }
   0xd   : > { %703 = vmatprep.subr.bf16.mxu1 %v766_v2  ;;  %s898_s5 = smov (!%p208_p3, %s619_s5), 3  ;;  %v750_v21 = vld [vmem:[%s893_s1 + $0xb0] sm:$0xff]   ;;  %v756_v25 = vld [vmem:[%s893_s1 + $0xb8] sm:$0xff]  }
   0xe   : > { %s719_s25 = smul.u32 12, %s898_s5  ;;  %s622_s21 = sshll.u32 %s898_s5, 2 }
   0xf   : > { %673 = vmatpush3.bf16.msra.mxu0 %v737_v8  ;;  %s218_s24 = scalar_lea.vmem %s895_s3, %s622_s21  ;;  %s224_s28 = scalar_lea.vmem %s896_s4, %s622_s21 }
  0x10   : > { %704 = vmatpush3.bf16.msra.mxu1 %v738_v9  ;;  %674 = vmatprep.subr.bf16.mxu0 %v739_v10  ;;  %s212_s11 = scalar_lea.vmem %s892_s0, %s719_s25  ;;  %v660_v32 = vld [vmem:[%s218_s24] sm:$0xff]  }
  0x11   : > { %705 = vmatprep.subr.bf16.mxu1 %v766_v2  ;;  %v755_v23 = vld [vmem:[%s212_s11 + $0x4] ss:$12 sps:$4 sm:$0xff]   ;;  %v753_v26 = vld [vmem:[%s212_s11] ss:$12 sps:$4 sm:$0xff]   ;;  %v757_v27 = vld [vmem:[%s212_s11 + $0x8] ss:$12 sps:$4 sm:$0xff]   ;;  %v661_v39 = vunpack.c.l.bf16 %v660_v32  ;;  %v662_v44 = vunpack.c.h.bf16 %v660_v32 }
  0x12   : > { %478 = vmatprep.mubr.bf16.mxu0 %v755_v23 }
  0x13   : > { %675 = vmatpush3.bf16.msra.mxu0 %v740_v11 }
  0x14   : > { %706 = vmatpush3.bf16.msra.mxu1 %v741_v12  ;;  %676 = vmatprep.subr.bf16.mxu0 %v742_v13 }
  0x15   : > { %707 = vmatprep.subr.bf16.mxu1 %v766_v2 }
  0x17   : > { %677 = vmatpush3.bf16.msra.mxu0 %v743_v14 }
  0x18   : > { %708 = vmatpush3.bf16.msra.mxu1 %v744_v15  ;;  %678 = vmatprep.subr.bf16.mxu0 %v745_v16 }
  0x19   : > { %709 = vmatprep.subr.bf16.mxu1 %v766_v2 }
  0x1b   : > { %679 = vmatpush3.bf16.msra.mxu0 %v746_v17 }
  0x1c   : > { %710 = vmatpush3.bf16.msra.mxu1 %v747_v18  ;;  %680 = vmatprep.subr.bf16.mxu0 %v748_v19 }
  0x1d   : > { %711 = vmatprep.subr.bf16.mxu1 %v766_v2 }
  0x1f   : > { %681 = vmatpush3.bf16.msra.mxu0 %v749_v20 }
  0x20   : > { %712 = vmatpush3.bf16.msra.mxu1 %v750_v21  ;;  %682 = vmatprep.subr.bf16.mxu0 %v751_v22 }
  0x21   : > { %713 = vmatprep.subr.bf16.mxu1 %v766_v2 }
  0x23   : > { %683 = vmatpush3.bf16.msra.mxu0 %v752_v24 }
  0x24   : > { %714 = vmatpush3.bf16.msra.mxu1 %v756_v25 }
  0x26   : > { %479 = vmatmul.mubr.bf16.vlgmr.msra.gmra.mrb[0].mxu0 %v753_v26 }
  0x27   : > { %716 = vmatmul.mubr.bf16.vlgmr.msra.gmra.mrb[0].mxu1 %v757_v27 }
  0xf9   : > { %v684_v28 = vpop.f32.mrb[0].mxu0 }
  0xfa   : > { %v685_v29 = vpop.f32.mrb[1].mxu0  ;;  %v521_v31 = vpop.f32.mrb[0].mxu1 }
  0xfb   : > { %v686_v33 = vadd.f32 %v685_v29, %v684_v28  ;;  %v687_v34 = vpop.f32.mrb[2].mxu0  ;;  %v717_v35 = vpop.f32.mrb[1].mxu1 }
  0xfc   : > { %v688_v36 = vpop.f32.mrb[3].mxu0  ;;  %v524_v37 = vpop.f32.mrb[2].mxu1 }
  0xfd   : > { %v481_v38 = vadd.f32 %v686_v33, %v625_v30  ;;  %v689_v40 = vadd.f32 %v688_v36, %v687_v34  ;;  %v718_v41 = vpop.f32.mrb[3].mxu1 }
  0xff   : > { %v522_v42 = vadd.f32 %v521_v31, %v481_v38  ;;  %v484_v43 = vadd.f32 %v689_v40, %v625_v30 }
 0x101   : > { %v532_v45 = vadd.f32 %v661_v39, %v522_v42  ;;  %v525_v46 = vadd.f32 %v524_v37, %v484_v43 }
 0x103   : > { %v533_v47 = vadd.f32 %v662_v44, %v525_v46  ;;  %v534_v48 = vmax.f32 %v532_v45, 0.0 }
 0x105   : > { %v535_v49 = vmax.f32 %v533_v47, 0.0 }
 0x107   : > { %v666_v50 = vpack.c.bf16 %v535_v49, %v534_v48 }
 0x109   : > { %667 = vst [vmem:[%s224_s28] sm:$0xff] %v666_v50  }
 0x10a PF: > { %s14_s15 = sadd.s32 1, %s764_s15  }
 0x10b   : > { %p11_p4 = scmp.ge.s32.totalorder %s14_s15, 4  }
 0x10d   :  { %13 = sbr.rel (!%p11_p4) target bundleno = 1 (0x1), region = 69 }

// kernel: _lambda_.61
= control target key start
LH: loop header
LB: loop body
LE: loop exit
PB: predicated region body
PF: predicated region fallthrough
CT: control target
= control target key end

     0   :  { %v565_v1 = vmov 0   ;;  %v67_v57 = vlaneseq  ;;  %s742_s1 = inlined_call_operand.vmem [shape: bf16[384,256], index: 1, kind: input, shape index: {}]   ;;  %s743_s0 = inlined_call_operand.vmem [shape: bf16[8,384], index: 0, kind: input, shape index: {}]   ;;  %s744_s2 = inlined_call_operand.vmem [shape: f32[1,256], index: 2, kind: input, shape index: {}]   ;;  %s745_s3 = inlined_call_operand.vmem [shape: bf16[8,256], index: 3, kind: output, shape index: {}]  }
   0x1   :  { %v490_v0 = vld [vmem:[%s742_s1 + $0x4] ss:$8 sps:$4 sm:$0xff]   ;;  %401 = vmatprep.mubr.bf16.mxu0 %v565_v1  ;;  %v492_v2 = vld [vmem:[%s742_s1] ss:$8 sps:$4 sm:$0xff]   ;;  %v493_v3 = vld [vmem:[%s742_s1 + $0x14] ss:$8 sps:$4 sm:$0xff]  }
   0x2   :  { %328 = vmatprep.subr.bf16.mxu1 %v490_v0  ;;  %v495_v4 = vld [vmem:[%s742_s1 + $0x10] ss:$8 sps:$4 sm:$0xff]   ;;  %v496_v5 = vld [vmem:[%s742_s1 + $0x24] ss:$8 sps:$4 sm:$0xff]   ;;  %v498_v6 = vld [vmem:[%s742_s1 + $0x20] ss:$8 sps:$4 sm:$0xff]  }
   0x3   :  { %329 = vmatpush1.bf16.msra.mxu1 %v492_v2  ;;  %v499_v7 = vld [vmem:[%s742_s1 + $0x34] ss:$8 sps:$4 sm:$0xff]   ;;  %v501_v8 = vld [vmem:[%s742_s1 + $0x30] ss:$8 sps:$4 sm:$0xff]   ;;  %v514_v9 = vld [vmem:[%s742_s1 + $0x104] ss:$8 sps:$4 sm:$0xff]  }
   0x4   :  { %330 = vmatprep.subr.bf16.mxu1 %v493_v3  ;;  %v502_v10 = vld [vmem:[%s742_s1 + $0x44] ss:$8 sps:$4 sm:$0xff]   ;;  %v518_v11 = vld [vmem:[%s742_s1 + $0x100] ss:$8 sps:$4 sm:$0xff]   ;;  %369 = vmatprep.subr.bf16.mxu0 %v514_v9  ;;  %v520_v12 = vld [vmem:[%s742_s1 + $0x114] ss:$8 sps:$4 sm:$0xff]  }
   0x5   :  { %370 = vmatpush1.bf16.msra.mxu0 %v518_v11  ;;  %v504_v13 = vld [vmem:[%s742_s1 + $0x40] ss:$8 sps:$4 sm:$0xff]   ;;  %v505_v14 = vld [vmem:[%s742_s1 + $0x54] ss:$8 sps:$4 sm:$0xff]   ;;  %v524_v15 = vld [vmem:[%s742_s1 + $0x110] ss:$8 sps:$4 sm:$0xff]  }
   0x6   :  { %371 = vmatprep.subr.bf16.mxu0 %v520_v12  ;;  %v526_v16 = vld [vmem:[%s742_s1 + $0x124] ss:$8 sps:$4 sm:$0xff]   ;;  %v507_v17 = vld [vmem:[%s742_s1 + $0x50] ss:$8 sps:$4 sm:$0xff]   ;;  %v530_v18 = vld [vmem:[%s742_s1 + $0x120] ss:$8 sps:$4 sm:$0xff]  }
   0x7   :  { %331 = vmatpush1.bf16.msra.mxu1 %v495_v4  ;;  %v532_v19 = vld [vmem:[%s742_s1 + $0x134] ss:$8 sps:$4 sm:$0xff]   ;;  %v508_v20 = vld [vmem:[%s742_s1 + $0x64] ss:$8 sps:$4 sm:$0xff]   ;;  %v536_v21 = vld [vmem:[%s742_s1 + $0x130] ss:$8 sps:$4 sm:$0xff]  }
   0x8   :  { %332 = vmatprep.subr.bf16.mxu1 %v496_v5  ;;  %v510_v22 = vld [vmem:[%s742_s1 + $0x60] ss:$8 sps:$4 sm:$0xff]   ;;  %v538_v23 = vld [vmem:[%s742_s1 + $0x144] ss:$8 sps:$4 sm:$0xff]   ;;  %v511_v24 = vld [vmem:[%s742_s1 + $0x74] ss:$8 sps:$4 sm:$0xff]  }
   0x9   :  { %372 = vmatpush1.bf16.msra.mxu0 %v524_v15  ;;  %v513_v25 = vld [vmem:[%s742_s1 + $0x70] ss:$8 sps:$4 sm:$0xff]   ;;  %v542_v26 = vld [vmem:[%s742_s1 + $0x140] ss:$8 sps:$4 sm:$0xff]   ;;  %v544_v27 = vld [vmem:[%s742_s1 + $0x154] ss:$8 sps:$4 sm:$0xff]  }
   0xa   :  { %373 = vmatprep.subr.bf16.mxu0 %v526_v16  ;;  %v516_v28 = vld [vmem:[%s742_s1 + $0x84] ss:$8 sps:$4 sm:$0xff]   ;;  %v548_v29 = vld [vmem:[%s742_s1 + $0x150] ss:$8 sps:$4 sm:$0xff]   ;;  %v519_v30 = vld [vmem:[%s742_s1 + $0x80] ss:$8 sps:$4 sm:$0xff]  }
   0xb   :  { %333 = vmatpush1.bf16.msra.mxu1 %v498_v6  ;;  %v550_v31 = vld [vmem:[%s742_s1 + $0x164] ss:$8 sps:$4 sm:$0xff]   ;;  %v522_v32 = vld [vmem:[%s742_s1 + $0x94] ss:$8 sps:$4 sm:$0xff]   ;;  %v554_v35 = vld [vmem:[%s742_s1 + $0x160] ss:$8 sps:$4 sm:$0xff]  }
   0xc   :  { %334 = vmatprep.subr.bf16.mxu1 %v499_v7  ;;  %v15_v33 = vld [vmem:[%s743_s0] sm:$0xff]  ;;  %v525_v36 = vld [vmem:[%s742_s1 + $0x90] ss:$8 sps:$4 sm:$0xff]   ;;  %v556_v37 = vld [vmem:[%s742_s1 + $0x174] ss:$8 sps:$4 sm:$0xff]   ;;  %v68_v58 = vshrl.u32 %v67_v57, 7 }
   0xd   :  { %374 = vmatpush1.bf16.msra.mxu0 %v530_v18  ;;  %v433_v34 = vcombine.high %v15_v33, %v15_v33  ;;  %v528_v38 = vld [vmem:[%s742_s1 + $0xa4] ss:$8 sps:$4 sm:$0xff]   ;;  %v560_v39 = vld [vmem:[%s742_s1 + $0x170] ss:$8 sps:$4 sm:$0xff]   ;;  %v531_v40 = vld [vmem:[%s742_s1 + $0xa0] ss:$8 sps:$4 sm:$0xff]   ;;  %v432_v52 = vcombine.low %v15_v33, %v15_v33 }
   0xe   :  { %375 = vmatprep.subr.bf16.mxu0 %v532_v19  ;;  %v534_v41 = vld [vmem:[%s742_s1 + $0xb4] ss:$8 sps:$4 sm:$0xff]   ;;  %v564_v42 = vld [vmem:[%s743_s0 + $0x8] ss:$0 sps:$4 sm:$0xff]   ;;  %v537_v43 = vld [vmem:[%s742_s1 + $0xb0] ss:$8 sps:$4 sm:$0xff]  }
   0xf   :  { %335 = vmatpush1.bf16.msra.mxu1 %v501_v8  ;;  %360 = vmatprep.mubr.bf16.mxu1 %v433_v34  ;;  %v540_v44 = vld [vmem:[%s742_s1 + $0xc4] ss:$8 sps:$4 sm:$0xff]   ;;  %v543_v45 = vld [vmem:[%s742_s1 + $0xc0] ss:$8 sps:$4 sm:$0xff]   ;;  %v546_v46 = vld [vmem:[%s742_s1 + $0xd4] ss:$8 sps:$4 sm:$0xff]  }
  0x10   :  { %336 = vmatprep.subr.bf16.mxu1 %v502_v10  ;;  %v549_v47 = vld [vmem:[%s742_s1 + $0xd0] ss:$8 sps:$4 sm:$0xff]   ;;  %v552_v48 = vld [vmem:[%s742_s1 + $0xe4] ss:$8 sps:$4 sm:$0xff]   ;;  %v555_v49 = vld [vmem:[%s742_s1 + $0xe0] ss:$8 sps:$4 sm:$0xff]  }
  0x11   :  { %376 = vmatpush1.bf16.msra.mxu0 %v536_v21  ;;  %v558_v50 = vld [vmem:[%s742_s1 + $0xf4] ss:$8 sps:$4 sm:$0xff]   ;;  %v561_v51 = vld [vmem:[%s742_s1 + $0xf0] ss:$8 sps:$4 sm:$0xff]   ;;  %v69_v59 = vsub.s32 0, %v68_v58  ;;  %v73_v61 = vsub.s32 1, %v68_v58 }
  0x12   :  { %377 = vmatprep.subr.bf16.mxu0 %v538_v23  ;;  %v65_v60 = vld [vmem:[%s744_s2] sm:$0x3] }
  0x13   :  { %337 = vmatpush1.bf16.msra.mxu1 %v504_v13  ;;  %v70_v62 = vrot.slane %v65_v60, %v69_v59  ;;  %v74_v63 = vrot.slane %v65_v60, %v73_v61 }
  0x14   :  { %338 = vmatprep.subr.bf16.mxu1 %v505_v14 }
  0x15   :  { %378 = vmatpush1.bf16.msra.mxu0 %v542_v26 }
  0x16   :  { %379 = vmatprep.subr.bf16.mxu0 %v544_v27 }
  0x17   :  { %339 = vmatpush1.bf16.msra.mxu1 %v507_v17 }
  0x18   :  { %340 = vmatprep.subr.bf16.mxu1 %v508_v20 }
  0x19   :  { %380 = vmatpush1.bf16.msra.mxu0 %v548_v29 }
  0x1a   :  { %381 = vmatprep.subr.bf16.mxu0 %v550_v31 }
  0x1b   :  { %341 = vmatpush1.bf16.msra.mxu1 %v510_v22 }
  0x1c   :  { %342 = vmatprep.subr.bf16.mxu1 %v511_v24 }
  0x1d   :  { %382 = vmatpush1.bf16.msra.mxu0 %v554_v35 }
  0x1e   :  { %383 = vmatprep.subr.bf16.mxu0 %v556_v37 }
  0x1f   :  { %343 = vmatpush1.bf16.msra.mxu1 %v513_v25 }
  0x20   :  { %344 = vmatprep.subr.bf16.mxu1 %v516_v28 }
  0x21   :  { %384 = vmatpush1.bf16.msra.mxu0 %v560_v39 }
  0x23   :  { %345 = vmatpush1.bf16.msra.mxu1 %v519_v30 }
  0x24   :  { %346 = vmatprep.subr.bf16.mxu1 %v522_v32  ;;  %402 = vmatmul.mubr.bf16.vlgmr.msra.gmra.mrb[0].mxu0 %v564_v42 }
  0x27   :  { %347 = vmatpush1.bf16.msra.mxu1 %v525_v36 }
  0x28   :  { %348 = vmatprep.subr.bf16.mxu1 %v528_v38 }
  0x2b   :  { %349 = vmatpush1.bf16.msra.mxu1 %v531_v40 }
  0x2c   :  { %350 = vmatprep.subr.bf16.mxu1 %v534_v41 }
  0x2f   :  { %351 = vmatpush1.bf16.msra.mxu1 %v537_v43 }
  0x30   :  { %352 = vmatprep.subr.bf16.mxu1 %v540_v44 }
  0x33   :  { %353 = vmatpush1.bf16.msra.mxu1 %v543_v45 }
  0x34   :  { %354 = vmatprep.subr.bf16.mxu1 %v546_v46 }
  0x37   :  { %355 = vmatpush1.bf16.msra.mxu1 %v549_v47 }
  0x38   :  { %356 = vmatprep.subr.bf16.mxu1 %v552_v48 }
  0x3b   :  { %357 = vmatpush1.bf16.msra.mxu1 %v555_v49 }
  0x3c   :  { %358 = vmatprep.subr.bf16.mxu1 %v558_v50 }
  0x3f   :  { %359 = vmatpush1.bf16.msra.mxu1 %v561_v51 }
  0x42   :  { %361 = vmatmul.mubr.bf16.vlgmr.msra.gmra.mrb[0].mxu1 %v432_v52 }
  0xf7   :  { %v403_v53 = vpop.f32.mrb[0].mxu0 }
  0xf8   :  { %v405_v54 = vpop.f32.mrb[1].mxu0 }
  0xf9   :  { %v407_v55 = vpop.f32.mrb[2].mxu0 }
  0xfa   :  { %v408_v56 = vpop.f32.mrb[3].mxu0 }
 0x115   :  { %v362_v0 = vpop.f32.mrb[0].mxu1 }
 0x116   :  { %v363_v1 = vadd.f32 %v362_v0, %v70_v62  ;;  %v364_v2 = vpop.f32.mrb[1].mxu1 }
 0x117   :  { %v365_v3 = vadd.f32 %v364_v2, %v74_v63  ;;  %v366_v4 = vpop.f32.mrb[2].mxu1 }
 0x118   :  { %v404_v5 = vadd.f32 %v403_v53, %v363_v1  ;;  %v367_v6 = vpop.f32.mrb[3].mxu1 }
 0x119   :  { %v406_v7 = vadd.f32 %v405_v54, %v365_v3 }
 0x11a   :  { %v415_v8 = vmax.f32 %v404_v5, 0.0 }
 0x11c   :  { %v484_v9 = vpack.c.bf16 %v406_v7, %v415_v8 }
 0x11e   :  { %427 = vst [vmem:[%s745_s3] sm:$0xff] %v484_v9 }

// kernel: _lambda_.62
= control target key start
LH: loop header
LB: loop body
LE: loop exit
PB: predicated region body
PF: predicated region fallthrough
CT: control target
= control target key end

     0   :  { %v662_v35 = vmov 0.0   ;;  %vm663_vm0 = vmmov 0   ;;  %s827_s1 = inlined_call_operand.vmem [shape: bf16[640,128], index: 1, kind: input, shape index: {}]   ;;  %s828_s0 = inlined_call_operand.vmem [shape: bf16[8,640], index: 0, kind: input, shape index: {}]   ;;  %s829_s2 = inlined_call_operand.vmem [shape: f32[1,128], index: 2, kind: input, shape index: {}]   ;;  %s830_s3 = inlined_call_operand.vmem [shape: bf16[8,128], index: 3, kind: input, shape index: {}]   ;;  %s831_s4 = inlined_call_operand.vmem [shape: bf16[8,128], index: 4, kind: output, shape index: {}]  }
   0x1   :  { %v617_v0 = vld [vmem:[%s827_s1 + $0x40] sm:$0xff]   ;;  %v621_v4 = vld [vmem:[%s827_s1 + $0x48] sm:$0xff]   ;;  %v625_v8 = vld [vmem:[%s827_s1 + $0x50] sm:$0xff]  }
   0x2   :  { %v618_v1 = vld [vmem:[%s827_s1] sm:$0xff]   ;;  %542 = vmatprep.subr.bf16.mxu0 %v617_v0  ;;  %v622_v5 = vld [vmem:[%s827_s1 + $0x8] sm:$0xff]   ;;  %v626_v9 = vld [vmem:[%s827_s1 + $0x10] sm:$0xff]  }
   0x3   :  { %v619_v2 = vld [vmem:[%s827_s1 + $0xc0] sm:$0xff]   ;;  %543 = vmatpush3.bf16.msra.mxu0 %v618_v1  ;;  %v623_v6 = vld [vmem:[%s827_s1 + $0xc8] sm:$0xff]   ;;  %v627_v10 = vld [vmem:[%s827_s1 + $0xd0] sm:$0xff]  }
   0x4   :  { %v620_v3 = vld [vmem:[%s827_s1 + $0x80] sm:$0xff]   ;;  %564 = vmatprep.subr.bf16.mxu1 %v619_v2  ;;  %544 = vmatprep.subr.bf16.mxu0 %v621_v4  ;;  %v624_v7 = vld [vmem:[%s827_s1 + $0x88] sm:$0xff]   ;;  %v628_v11 = vld [vmem:[%s827_s1 + $0x90] sm:$0xff]  }
   0x5   :  { %565 = vmatpush3.bf16.msra.mxu1 %v620_v3  ;;  %v629_v12 = vld [vmem:[%s827_s1 + $0x58] sm:$0xff]   ;;  %v633_v16 = vld [vmem:[%s827_s1 + $0x60] sm:$0xff]   ;;  %v637_v20 = vld [vmem:[%s827_s1 + $0x68] sm:$0xff]  }
   0x6   :  { %566 = vmatprep.subr.bf16.mxu1 %v623_v6  ;;  %v630_v13 = vld [vmem:[%s827_s1 + $0x18] sm:$0xff]   ;;  %v634_v17 = vld [vmem:[%s827_s1 + $0x20] sm:$0xff]   ;;  %v638_v21 = vld [vmem:[%s827_s1 + $0x28] sm:$0xff]  }
   0x7   :  { %545 = vmatpush3.bf16.msra.mxu0 %v622_v5  ;;  %v631_v14 = vld [vmem:[%s827_s1 + $0xd8] sm:$0xff]   ;;  %v635_v18 = vld [vmem:[%s827_s1 + $0xe0] sm:$0xff]   ;;  %v639_v22 = vld [vmem:[%s827_s1 + $0xe8] sm:$0xff]  }
   0x8   :  { %546 = vmatprep.subr.bf16.mxu0 %v625_v8  ;;  %v632_v15 = vld [vmem:[%s827_s1 + $0x98] sm:$0xff]   ;;  %v636_v19 = vld [vmem:[%s827_s1 + $0xa0] sm:$0xff]   ;;  %v640_v23 = vld [vmem:[%s827_s1 + $0xa8] sm:$0xff]  }
   0x9   :  { %567 = vmatpush3.bf16.msra.mxu1 %v624_v7  ;;  %v641_v24 = vld [vmem:[%s827_s1 + $0x70] sm:$0xff]   ;;  %v645_v28 = vld [vmem:[%s827_s1 + $0x78] sm:$0xff]   ;;  %v18_v31 = vld [vmem:[%s828_s0] sm:$0xff] }
   0xa   :  { %568 = vmatprep.subr.bf16.mxu1 %v627_v10  ;;  %v642_v25 = vld [vmem:[%s827_s1 + $0x30] sm:$0xff]   ;;  %v646_v29 = vld [vmem:[%s827_s1 + $0x38] sm:$0xff]   ;;  %v497_v32 = vcombine.low %v18_v31, %v18_v31  ;;  %v498_v33 = vcombine.high %v18_v31, %v18_v31  ;;  %v19_v36 = vld [vmem:[%s828_s0 + $0x8] sm:$0xff] }
   0xb   :  { %547 = vmatpush3.bf16.msra.mxu0 %v626_v9  ;;  %v643_v26 = vld [vmem:[%s827_s1 + $0xf0] sm:$0xff]   ;;  %v647_v30 = vld [vmem:[%s827_s1 + $0xf8] sm:$0xff]   ;;  %v499_v37 = vcombine.low %v19_v36, %v19_v36  ;;  %v500_v38 = vcombine.high %v19_v36, %v19_v36  ;;  %v654_v39 = vld [vmem:[%s827_s1 + $0x100] sm:$0xff]  }
   0xc   :  { %548 = vmatprep.subr.bf16.mxu0 %v629_v12  ;;  %v644_v27 = vld [vmem:[%s827_s1 + $0xb0] sm:$0xff]   ;;  %v651_v34 = vld [vmem:[%s827_s1 + $0xb8] sm:$0xff]   ;;  %398 = vmatprep.mubr.bf16.mxu0 %v498_v33  ;;  %v655_v40 = vld [vmem:[%s827_s1 + $0x108] sm:$0xff]  }
   0xd   :  { %569 = vmatpush3.bf16.msra.mxu1 %v628_v11  ;;  %438 = vmatprep.mubr.bf16.mxu1 %v500_v38  ;;  %v656_v41 = vld [vmem:[%s827_s1 + $0x110] sm:$0xff]   ;;  %v657_v42 = vld [vmem:[%s827_s1 + $0x118] sm:$0xff]   ;;  %v658_v43 = vld [vmem:[%s827_s1 + $0x120] sm:$0xff]  }
   0xe   :  { %570 = vmatprep.subr.bf16.mxu1 %v631_v14  ;;  %v659_v44 = vld [vmem:[%s827_s1 + $0x128] sm:$0xff]   ;;  %v660_v45 = vld [vmem:[%s827_s1 + $0x130] sm:$0xff]   ;;  %v661_v46 = vld [vmem:[%s827_s1 + $0x138] sm:$0xff]  }
   0xf   :  { %549 = vmatpush3.bf16.msra.mxu0 %v630_v13  ;;  %v650_v47 = vld [vmem:[%s828_s0 + $0x10] ss:$0 sps:$4 sm:$0xff]   ;;  %v496_v49 = vld [vmem:[%s829_s2] ss:$0 sm:$0xff] }
  0x10   :  { %550 = vmatprep.subr.bf16.mxu0 %v633_v16  ;;  %v486_v61 = vld [vmem:[%s830_s3] sm:$0xf] }
  0x11   :  { %571 = vmatpush3.bf16.msra.mxu1 %v632_v15  ;;  %v487_v62 = vunpack.c.l.bf16 %v486_v61 }
  0x12   :  { %572 = vmatprep.subr.bf16.mxu1 %v635_v18 }
  0x13   :  { %551 = vmatpush3.bf16.msra.mxu0 %v634_v17 }
  0x14   :  { %552 = vmatprep.subr.bf16.mxu0 %v637_v20 }
  0x15   :  { %573 = vmatpush3.bf16.msra.mxu1 %v636_v19 }
  0x16   :  { %574 = vmatprep.subr.bf16.mxu1 %v639_v22 }
  0x17   :  { %553 = vmatpush3.bf16.msra.mxu0 %v638_v21 }
  0x18   :  { %554 = vmatprep.subr.bf16.mxu0 %v641_v24 }
  0x19   :  { %575 = vmatpush3.bf16.msra.mxu1 %v640_v23 }
  0x1a   :  { %576 = vmatprep.subr.bf16.mxu1 %v643_v26 }
  0x1b   :  { %555 = vmatpush3.bf16.msra.mxu0 %v642_v25 }
  0x1c   :  { %556 = vmatprep.subr.bf16.mxu0 %v645_v28 }
  0x1d   :  { %577 = vmatpush3.bf16.msra.mxu1 %v644_v27 }
  0x1e   :  { %578 = vmatprep.subr.bf16.mxu1 %v647_v30 }
  0x1f   :  { %557 = vmatpush3.bf16.msra.mxu0 %v646_v29 }
  0x20   :  { %595 = vmatprep.subr.bf16.mxu0 %v662_v35 }
  0x21   :  { %579 = vmatpush3.bf16.msra.mxu1 %v651_v34 }
  0x22   :  { %399 = vmatmul.mubr.bf16.vlgmr.msra.gmra.mrb[0].mxu0 %v497_v32 }
  0x23   :  { %596 = vmatpush3.bf16.msra.mxu0 %v654_v39  ;;  %611 = vmatprep.mubr.msk.bf16.mxu0 %vm663_vm0, %v662_v35 }
  0x24   :  { %439 = vmatmul.mubr.bf16.vlgmr.msra.gmra.mrb[0].mxu1 %v499_v37  ;;  %597 = vmatprep.subr.bf16.mxu0 %v662_v35 }
  0x27   :  { %598 = vmatpush3.bf16.msra.mxu0 %v655_v40 }
  0x28   :  { %599 = vmatprep.subr.bf16.mxu0 %v662_v35 }
  0x2b   :  { %600 = vmatpush3.bf16.msra.mxu0 %v656_v41 }
  0x2c   :  { %601 = vmatprep.subr.bf16.mxu0 %v662_v35 }
  0x2f   :  { %602 = vmatpush3.bf16.msra.mxu0 %v657_v42 }
  0x30   :  { %603 = vmatprep.subr.bf16.mxu0 %v662_v35 }
  0x33   :  { %604 = vmatpush3.bf16.msra.mxu0 %v658_v43 }
  0x34   :  { %605 = vmatprep.subr.bf16.mxu0 %v662_v35 }
  0x37   :  { %606 = vmatpush3.bf16.msra.mxu0 %v659_v44 }
  0x38   :  { %607 = vmatprep.subr.bf16.mxu0 %v662_v35 }
  0x3b   :  { %608 = vmatpush3.bf16.msra.mxu0 %v660_v45 }
  0x3c   :  { %609 = vmatprep.subr.bf16.mxu0 %v662_v35 }
  0x3f   :  { %610 = vmatpush3.bf16.msra.mxu0 %v661_v46 }
  0x42   :  { %612 = vmatmul.mubr.bf16.vlgmr.msra.gmra.mrb[4].mxu0 %v650_v47 }
  0xf5   :  { %v558_v48 = vpop.f32.mrb[0].mxu0 }
  0xf6   :  { %v559_v50 = vpop.f32.mrb[1].mxu0 }
  0xf7   :  { %v560_v51 = vadd.f32 %v559_v50, %v558_v48  ;;  %v561_v52 = vpop.f32.mrb[2].mxu0  ;;  %v580_v53 = vpop.f32.mrb[0].mxu1 }
  0xf8   :  { %v562_v54 = vpop.f32.mrb[3].mxu0  ;;  %v581_v55 = vpop.f32.mrb[1].mxu1 }
  0xf9   :  { %v401_v56 = vadd.f32 %v560_v51, %v496_v49  ;;  %v582_v57 = vadd.f32 %v581_v55, %v580_v53  ;;  %v583_v58 = vpop.f32.mrb[2].mxu1 }
  0xfa   :  { %v584_v59 = vpop.f32.mrb[3].mxu1 }
  0xfb   :  { %v441_v60 = vadd.f32 %v582_v57, %v401_v56 }
 0x115   :  { %v480_v63 = vpop.f32.mrb[4].mxu0 }
 0x116   :  { %v481_v0 = vadd.f32 %v480_v63, %v441_v60  ;;  %v613_v1 = vpop.f32.mrb[5].mxu0 }
 0x117   :  { %v483_v2 = vpop.f32.mrb[6].mxu0 }
 0x118   :  { %v488_v3 = vadd.f32 %v487_v62, %v481_v0  ;;  %v614_v4 = vpop.f32.mrb[7].mxu0 }
 0x11a   :  { %v489_v5 = vmax.f32 %v488_v3, 0.0 }
 0x11c   :  { %v490_v6 = vpack.c.bf16 %v489_v5, %v489_v5 }
 0x11e   :  { %491 = vst [vmem:[%s831_s4] sm:$0xf] %v490_v6 }

// kernel: _lambda_.63
= control target key start
LH: loop header
LB: loop body
LE: loop exit
PB: predicated region body
PF: predicated region fallthrough
CT: control target
= control target key end

     0   :  { %v656_v35 = vmov 0.0   ;;  %vm657_vm0 = vmmov 0   ;;  %s813_s1 = inlined_call_operand.vmem [shape: bf16[640,128], index: 1, kind: input, shape index: {}]   ;;  %s814_s0 = inlined_call_operand.vmem [shape: bf16[8,640], index: 0, kind: input, shape index: {}]   ;;  %s815_s2 = inlined_call_operand.vmem [shape: f32[1,128], index: 2, kind: input, shape index: {}]   ;;  %s816_s3 = inlined_call_operand.vmem [shape: bf16[8,128], index: 3, kind: output, shape index: {}]  }
   0x1   :  { %v611_v0 = vld [vmem:[%s813_s1 + $0x40] sm:$0xff]   ;;  %v615_v4 = vld [vmem:[%s813_s1 + $0x48] sm:$0xff]   ;;  %v619_v8 = vld [vmem:[%s813_s1 + $0x50] sm:$0xff]  }
   0x2   :  { %v612_v1 = vld [vmem:[%s813_s1] sm:$0xff]   ;;  %536 = vmatprep.subr.bf16.mxu0 %v611_v0  ;;  %v616_v5 = vld [vmem:[%s813_s1 + $0x8] sm:$0xff]   ;;  %v620_v9 = vld [vmem:[%s813_s1 + $0x10] sm:$0xff]  }
   0x3   :  { %v613_v2 = vld [vmem:[%s813_s1 + $0xc0] sm:$0xff]   ;;  %537 = vmatpush3.bf16.msra.mxu0 %v612_v1  ;;  %v617_v6 = vld [vmem:[%s813_s1 + $0xc8] sm:$0xff]   ;;  %v621_v10 = vld [vmem:[%s813_s1 + $0xd0] sm:$0xff]  }
   0x4   :  { %v614_v3 = vld [vmem:[%s813_s1 + $0x80] sm:$0xff]   ;;  %558 = vmatprep.subr.bf16.mxu1 %v613_v2  ;;  %538 = vmatprep.subr.bf16.mxu0 %v615_v4  ;;  %v618_v7 = vld [vmem:[%s813_s1 + $0x88] sm:$0xff]   ;;  %v622_v11 = vld [vmem:[%s813_s1 + $0x90] sm:$0xff]  }
   0x5   :  { %559 = vmatpush3.bf16.msra.mxu1 %v614_v3  ;;  %v623_v12 = vld [vmem:[%s813_s1 + $0x58] sm:$0xff]   ;;  %v627_v16 = vld [vmem:[%s813_s1 + $0x60] sm:$0xff]   ;;  %v631_v20 = vld [vmem:[%s813_s1 + $0x68] sm:$0xff]  }
   0x6   :  { %560 = vmatprep.subr.bf16.mxu1 %v617_v6  ;;  %v624_v13 = vld [vmem:[%s813_s1 + $0x18] sm:$0xff]   ;;  %v628_v17 = vld [vmem:[%s813_s1 + $0x20] sm:$0xff]   ;;  %v632_v21 = vld [vmem:[%s813_s1 + $0x28] sm:$0xff]  }
   0x7   :  { %539 = vmatpush3.bf16.msra.mxu0 %v616_v5  ;;  %v625_v14 = vld [vmem:[%s813_s1 + $0xd8] sm:$0xff]   ;;  %v629_v18 = vld [vmem:[%s813_s1 + $0xe0] sm:$0xff]   ;;  %v633_v22 = vld [vmem:[%s813_s1 + $0xe8] sm:$0xff]  }
   0x8   :  { %540 = vmatprep.subr.bf16.mxu0 %v619_v8  ;;  %v626_v15 = vld [vmem:[%s813_s1 + $0x98] sm:$0xff]   ;;  %v630_v19 = vld [vmem:[%s813_s1 + $0xa0] sm:$0xff]   ;;  %v634_v23 = vld [vmem:[%s813_s1 + $0xa8] sm:$0xff]  }
   0x9   :  { %561 = vmatpush3.bf16.msra.mxu1 %v618_v7  ;;  %v635_v24 = vld [vmem:[%s813_s1 + $0x70] sm:$0xff]   ;;  %v639_v28 = vld [vmem:[%s813_s1 + $0x78] sm:$0xff]   ;;  %v15_v31 = vld [vmem:[%s814_s0] sm:$0xff] }
   0xa   :  { %562 = vmatprep.subr.bf16.mxu1 %v621_v10  ;;  %v636_v25 = vld [vmem:[%s813_s1 + $0x30] sm:$0xff]   ;;  %v640_v29 = vld [vmem:[%s813_s1 + $0x38] sm:$0xff]   ;;  %v491_v32 = vcombine.low %v15_v31, %v15_v31  ;;  %v492_v33 = vcombine.high %v15_v31, %v15_v31  ;;  %v16_v36 = vld [vmem:[%s814_s0 + $0x8] sm:$0xff] }
   0xb   :  { %541 = vmatpush3.bf16.msra.mxu0 %v620_v9  ;;  %v637_v26 = vld [vmem:[%s813_s1 + $0xf0] sm:$0xff]   ;;  %v641_v30 = vld [vmem:[%s813_s1 + $0xf8] sm:$0xff]   ;;  %v493_v37 = vcombine.low %v16_v36, %v16_v36  ;;  %v494_v38 = vcombine.high %v16_v36, %v16_v36  ;;  %v648_v39 = vld [vmem:[%s813_s1 + $0x100] sm:$0xff]  }
   0xc   :  { %542 = vmatprep.subr.bf16.mxu0 %v623_v12  ;;  %v638_v27 = vld [vmem:[%s813_s1 + $0xb0] sm:$0xff]   ;;  %v645_v34 = vld [vmem:[%s813_s1 + $0xb8] sm:$0xff]   ;;  %395 = vmatprep.mubr.bf16.mxu0 %v492_v33  ;;  %v649_v40 = vld [vmem:[%s813_s1 + $0x108] sm:$0xff]  }
   0xd   :  { %563 = vmatpush3.bf16.msra.mxu1 %v622_v11  ;;  %435 = vmatprep.mubr.bf16.mxu1 %v494_v38  ;;  %v650_v41 = vld [vmem:[%s813_s1 + $0x110] sm:$0xff]   ;;  %v651_v42 = vld [vmem:[%s813_s1 + $0x118] sm:$0xff]   ;;  %v652_v43 = vld [vmem:[%s813_s1 + $0x120] sm:$0xff]  }
   0xe   :  { %564 = vmatprep.subr.bf16.mxu1 %v625_v14  ;;  %v653_v44 = vld [vmem:[%s813_s1 + $0x128] sm:$0xff]   ;;  %v654_v45 = vld [vmem:[%s813_s1 + $0x130] sm:$0xff]   ;;  %v655_v46 = vld [vmem:[%s813_s1 + $0x138] sm:$0xff]  }
   0xf   :  { %543 = vmatpush3.bf16.msra.mxu0 %v624_v13  ;;  %v644_v47 = vld [vmem:[%s814_s0 + $0x10] ss:$0 sps:$4 sm:$0xff]   ;;  %v490_v49 = vld [vmem:[%s815_s2] ss:$0 sm:$0xff] }
  0x10   :  { %544 = vmatprep.subr.bf16.mxu0 %v627_v16 }
  0x11   :  { %565 = vmatpush3.bf16.msra.mxu1 %v626_v15 }
  0x12   :  { %566 = vmatprep.subr.bf16.mxu1 %v629_v18 }
  0x13   :  { %545 = vmatpush3.bf16.msra.mxu0 %v628_v17 }
  0x14   :  { %546 = vmatprep.subr.bf16.mxu0 %v631_v20 }
  0x15   :  { %567 = vmatpush3.bf16.msra.mxu1 %v630_v19 }
  0x16   :  { %568 = vmatprep.subr.bf16.mxu1 %v633_v22 }
  0x17   :  { %547 = vmatpush3.bf16.msra.mxu0 %v632_v21 }
  0x18   :  { %548 = vmatprep.subr.bf16.mxu0 %v635_v24 }
  0x19   :  { %569 = vmatpush3.bf16.msra.mxu1 %v634_v23 }
  0x1a   :  { %570 = vmatprep.subr.bf16.mxu1 %v637_v26 }
  0x1b   :  { %549 = vmatpush3.bf16.msra.mxu0 %v636_v25 }
  0x1c   :  { %550 = vmatprep.subr.bf16.mxu0 %v639_v28 }
  0x1d   :  { %571 = vmatpush3.bf16.msra.mxu1 %v638_v27 }
  0x1e   :  { %572 = vmatprep.subr.bf16.mxu1 %v641_v30 }
  0x1f   :  { %551 = vmatpush3.bf16.msra.mxu0 %v640_v29 }
  0x20   :  { %589 = vmatprep.subr.bf16.mxu0 %v656_v35 }
  0x21   :  { %573 = vmatpush3.bf16.msra.mxu1 %v645_v34 }
  0x22   :  { %396 = vmatmul.mubr.bf16.vlgmr.msra.gmra.mrb[0].mxu0 %v491_v32 }
  0x23   :  { %590 = vmatpush3.bf16.msra.mxu0 %v648_v39  ;;  %605 = vmatprep.mubr.msk.bf16.mxu0 %vm657_vm0, %v656_v35 }
  0x24   :  { %436 = vmatmul.mubr.bf16.vlgmr.msra.gmra.mrb[0].mxu1 %v493_v37  ;;  %591 = vmatprep.subr.bf16.mxu0 %v656_v35 }
  0x27   :  { %592 = vmatpush3.bf16.msra.mxu0 %v649_v40 }
  0x28   :  { %593 = vmatprep.subr.bf16.mxu0 %v656_v35 }
  0x2b   :  { %594 = vmatpush3.bf16.msra.mxu0 %v650_v41 }
  0x2c   :  { %595 = vmatprep.subr.bf16.mxu0 %v656_v35 }
  0x2f   :  { %596 = vmatpush3.bf16.msra.mxu0 %v651_v42 }
  0x30   :  { %597 = vmatprep.subr.bf16.mxu0 %v656_v35 }
  0x33   :  { %598 = vmatpush3.bf16.msra.mxu0 %v652_v43 }
  0x34   :  { %599 = vmatprep.subr.bf16.mxu0 %v656_v35 }
  0x37   :  { %600 = vmatpush3.bf16.msra.mxu0 %v653_v44 }
  0x38   :  { %601 = vmatprep.subr.bf16.mxu0 %v656_v35 }
  0x3b   :  { %602 = vmatpush3.bf16.msra.mxu0 %v654_v45 }
  0x3c   :  { %603 = vmatprep.subr.bf16.mxu0 %v656_v35 }
  0x3f   :  { %604 = vmatpush3.bf16.msra.mxu0 %v655_v46 }
  0x42   :  { %606 = vmatmul.mubr.bf16.vlgmr.msra.gmra.mrb[4].mxu0 %v644_v47 }
  0xf5   :  { %v552_v48 = vpop.f32.mrb[0].mxu0 }
  0xf6   :  { %v553_v50 = vpop.f32.mrb[1].mxu0 }
  0xf7   :  { %v554_v51 = vadd.f32 %v553_v50, %v552_v48  ;;  %v555_v52 = vpop.f32.mrb[2].mxu0  ;;  %v574_v53 = vpop.f32.mrb[0].mxu1 }
  0xf8   :  { %v556_v54 = vpop.f32.mrb[3].mxu0  ;;  %v575_v55 = vpop.f32.mrb[1].mxu1 }
  0xf9   :  { %v398_v56 = vadd.f32 %v554_v51, %v490_v49  ;;  %v576_v57 = vadd.f32 %v575_v55, %v574_v53  ;;  %v577_v58 = vpop.f32.mrb[2].mxu1 }
  0xfa   :  { %v578_v59 = vpop.f32.mrb[3].mxu1 }
  0xfb   :  { %v438_v60 = vadd.f32 %v576_v57, %v398_v56 }
 0x115   :  { %v477_v61 = vpop.f32.mrb[4].mxu0 }
 0x116   :  { %v478_v62 = vadd.f32 %v477_v61, %v438_v60  ;;  %v607_v63 = vpop.f32.mrb[5].mxu0 }
 0x117   :  { %v480_v0 = vpop.f32.mrb[6].mxu0 }
 0x118   :  { %v483_v1 = vmax.f32 %v478_v62, 0.0  ;;  %v608_v2 = vpop.f32.mrb[7].mxu0 }
 0x11a   :  { %v484_v3 = vpack.c.bf16 %v483_v1, %v483_v1 }
 0x11c   :  { %485 = vst [vmem:[%s816_s3] sm:$0xf] %v484_v3 }

// kernel: _lambda_.67
= control target key start
LH: loop header
LB: loop body
LE: loop exit
PB: predicated region body
PF: predicated region fallthrough
CT: control target
= control target key end

     0   :  { %v610_v1 = vmov 0.0   ;;  %v611_v7 = vmov 1966171168   ;;  %v79_v9 = vlaneseq  ;;  %vm612_vm0 = vmmov 0   ;;  %s782_s1 = inlined_call_operand.vmem [shape: bf16[256,128], index: 1, kind: input, shape index: {}]   ;;  %s783_s0 = inlined_call_operand.vmem [shape: bf16[2,256], index: 0, kind: input, shape index: {}]   ;;  %s784_s3 = inlined_call_operand.vmem [shape: bf16[128,128], index: 3, kind: input, shape index: {}]   ;;  %s785_s5 = inlined_call_operand.vmem [shape: bf16[128,128], index: 5, kind: input, shape index: {}]   ;;  %s786_s2 = inlined_call_operand.vmem [shape: f32[1,128], index: 2, kind: input, shape index: {}]   ;;  %s787_s4 = inlined_call_operand.vmem [shape: f32[1,128], index: 4, kind: input, shape index: {}]   ;;  %s788_s6 = inlined_call_operand.vmem [shape: f32[1,128], index: 6, kind: input, shape index: {}]   ;;  %s789_s7 = inlined_call_operand.vmem [shape: f32[2,128], index: 7, kind: output, shape index: {}]  }
   0x1   :  { %v578_v0 = vld [vmem:[%s782_s1 + $0x40] sm:$0xff]   ;;  %535 = vmatprep.subr.bf16.mxu1 %v610_v1  ;;  %v580_v3 = vld [vmem:[%s782_s1 + $0x48] sm:$0xff]   ;;  %v582_v5 = vld [vmem:[%s782_s1 + $0x50] sm:$0xff]   ;;  %v77_v8 = vunpack.c.l.s4 %v611_v7  ;;  %551 = vmatprep.mubr.msk.bf16.mxu1 %vm612_vm0, %v610_v1 }
   0x2   :  { %v579_v2 = vld [vmem:[%s782_s1] sm:$0xff]   ;;  %495 = vmatprep.subr.bf16.mxu0 %v578_v0  ;;  %v581_v4 = vld [vmem:[%s782_s1 + $0x8] sm:$0xff]   ;;  %v583_v6 = vld [vmem:[%s782_s1 + $0x10] sm:$0xff]   ;;  %v80_v13 = vshrl.u32 %v79_v9, 7 }
   0x3   :  { %496 = vmatpush3.bf16.msra.mxu0 %v579_v2  ;;  %v584_v10 = vld [vmem:[%s782_s1 + $0x58] sm:$0xff]   ;;  %v78_v12 = vunpack.c.0.s8 %v77_v8  ;;  %v586_v14 = vld [vmem:[%s782_s1 + $0x60] sm:$0xff]   ;;  %v588_v16 = vld [vmem:[%s782_s1 + $0x68] sm:$0xff]  }
   0x4   :  { %497 = vmatprep.subr.bf16.mxu0 %v580_v3  ;;  %v585_v11 = vld [vmem:[%s782_s1 + $0x18] sm:$0xff]   ;;  %v587_v15 = vld [vmem:[%s782_s1 + $0x20] sm:$0xff]   ;;  %v589_v21 = vld [vmem:[%s782_s1 + $0x28] sm:$0xff]  }
   0x5   :  { %v81_v17 = vsub.s32 %v78_v12, %v80_v13  ;;  %v460_v18 = vld.sshfl [vmem:[%s783_s0] sm:$0x11 pattern:$0x75316420]  ;;  %v595_v23 = vld [vmem:[%s784_s3 + $0x8] sm:$0xff]   ;;  %v590_v24 = vld [vmem:[%s782_s1 + $0x70] sm:$0xff]  }
   0x6   :  { %v75_v19 = vcombine.high %v460_v18, %v460_v18  ;;  %v594_v20 = vld [vmem:[%s784_s3] sm:$0xff]   ;;  %v591_v25 = vld [vmem:[%s782_s1 + $0x30] sm:$0xff]   ;;  %v592_v27 = vld [vmem:[%s782_s1 + $0x78] sm:$0xff]  }
   0x7   :  { %498 = vmatpush3.bf16.msra.mxu0 %v581_v4  ;;  %536 = vmatpush3.bf16.msra.mxu1 %v594_v20  ;;  %v596_v26 = vld [vmem:[%s784_s3 + $0x10] sm:$0xff]   ;;  %v593_v28 = vld [vmem:[%s782_s1 + $0x38] sm:$0xff]   ;;  %v82_v30 = vrot.slane %v460_v18, %v81_v17  ;;  %v598_v31 = vld [vmem:[%s784_s3 + $0x20] sm:$0xff]  }
   0x8   :  { %499 = vmatprep.subr.bf16.mxu0 %v582_v5  ;;  %v89_v22 = vrot.slane %v75_v19, %v81_v17  ;;  %537 = vmatprep.subr.bf16.mxu1 %v610_v1  ;;  %v597_v29 = vld [vmem:[%s784_s3 + $0x18] sm:$0xff]   ;;  %v599_v32 = vld [vmem:[%s784_s3 + $0x28] sm:$0xff]   ;;  %v600_v33 = vld [vmem:[%s784_s3 + $0x30] sm:$0xff]  }
   0x9   :  { %v601_v34 = vld [vmem:[%s784_s3 + $0x38] sm:$0xff]   ;;  %v602_v35 = vld [vmem:[%s785_s5] sm:$0xff]   ;;  %v603_v36 = vld [vmem:[%s785_s5 + $0x8] sm:$0xff]  }
   0xa   :  { %220 = vmatprep.mubr.bf16.mxu0 %v89_v22  ;;  %v604_v37 = vld [vmem:[%s785_s5 + $0x10] sm:$0xff]   ;;  %v605_v38 = vld [vmem:[%s785_s5 + $0x18] sm:$0xff]   ;;  %v606_v39 = vld [vmem:[%s785_s5 + $0x20] sm:$0xff]  }
   0xb   :  { %500 = vmatpush3.bf16.msra.mxu0 %v583_v6  ;;  %538 = vmatpush3.bf16.msra.mxu1 %v595_v23  ;;  %v607_v40 = vld [vmem:[%s785_s5 + $0x28] sm:$0xff]   ;;  %v459_v42 = vld [vmem:[%s786_s2] ss:$0 sm:$0xff]  ;;  %v608_v50 = vld [vmem:[%s785_s5 + $0x30] sm:$0xff]  }
   0xc   :  { %501 = vmatprep.subr.bf16.mxu0 %v584_v10  ;;  %539 = vmatprep.subr.bf16.mxu1 %v610_v1  ;;  %v609_v51 = vld [vmem:[%s785_s5 + $0x38] sm:$0xff]   ;;  %v477_v52 = vld [vmem:[%s787_s4] ss:$0 sm:$0xff] }
   0xd   :  { %v486_v60 = vld [vmem:[%s788_s6] ss:$0 sm:$0xff] }
   0xf   :  { %502 = vmatpush3.bf16.msra.mxu0 %v585_v11  ;;  %540 = vmatpush3.bf16.msra.mxu1 %v596_v26 }
  0x10   :  { %503 = vmatprep.subr.bf16.mxu0 %v586_v14  ;;  %541 = vmatprep.subr.bf16.mxu1 %v610_v1 }
  0x13   :  { %504 = vmatpush3.bf16.msra.mxu0 %v587_v15  ;;  %542 = vmatpush3.bf16.msra.mxu1 %v597_v29 }
  0x14   :  { %505 = vmatprep.subr.bf16.mxu0 %v588_v16  ;;  %543 = vmatprep.subr.bf16.mxu1 %v610_v1 }
  0x17   :  { %506 = vmatpush3.bf16.msra.mxu0 %v589_v21  ;;  %544 = vmatpush3.bf16.msra.mxu1 %v598_v31 }
  0x18   :  { %507 = vmatprep.subr.bf16.mxu0 %v590_v24  ;;  %545 = vmatprep.subr.bf16.mxu1 %v610_v1 }
  0x1b   :  { %508 = vmatpush3.bf16.msra.mxu0 %v591_v25  ;;  %546 = vmatpush3.bf16.msra.mxu1 %v599_v32 }
  0x1c   :  { %509 = vmatprep.subr.bf16.mxu0 %v592_v27  ;;  %547 = vmatprep.subr.bf16.mxu1 %v610_v1 }
  0x1f   :  { %510 = vmatpush3.bf16.msra.mxu0 %v593_v28  ;;  %548 = vmatpush3.bf16.msra.mxu1 %v600_v33 }
  0x20   :  { %555 = vmatprep.subr.bf16.mxu0 %v610_v1  ;;  %549 = vmatprep.subr.bf16.mxu1 %v610_v1 }
  0x22   :  { %221 = vmatmul.mubr.bf16.vlgmr.msra.gmra.mrb[0].mxu0 %v82_v30 }
  0x23   :  { %550 = vmatpush3.bf16.msra.mxu1 %v601_v34  ;;  %571 = vmatprep.mubr.msk.bf16.mxu0 %vm612_vm0, %v610_v1 }
  0x24   :  { %556 = vmatpush3.bf16.msra.mxu0 %v602_v35 }
  0x25   :  { %557 = vmatprep.subr.bf16.mxu0 %v610_v1 }
  0x28   :  { %558 = vmatpush3.bf16.msra.mxu0 %v603_v36 }
  0x29   :  { %559 = vmatprep.subr.bf16.mxu0 %v610_v1 }
  0x2c   :  { %560 = vmatpush3.bf16.msra.mxu0 %v604_v37 }
  0x2d   :  { %561 = vmatprep.subr.bf16.mxu0 %v610_v1 }
  0x30   :  { %562 = vmatpush3.bf16.msra.mxu0 %v605_v38 }
  0x31   :  { %563 = vmatprep.subr.bf16.mxu0 %v610_v1 }
  0x34   :  { %564 = vmatpush3.bf16.msra.mxu0 %v606_v39 }
  0x35   :  { %565 = vmatprep.subr.bf16.mxu0 %v610_v1 }
  0x38   :  { %566 = vmatpush3.bf16.msra.mxu0 %v607_v40 }
  0x39   :  { %567 = vmatprep.subr.bf16.mxu0 %v610_v1 }
  0x3c   :  { %568 = vmatpush3.bf16.msra.mxu0 %v608_v50 }
  0x3d   :  { %569 = vmatprep.subr.bf16.mxu0 %v610_v1 }
  0x40   :  { %570 = vmatpush3.bf16.msra.mxu0 %v609_v51 }
  0xf5   :  { %v511_v41 = vpop.f32.mrb[0].mxu0 }
  0xf6   :  { %v512_v43 = vpop.f32.mrb[1].mxu0 }
  0xf7   :  { %v513_v44 = vadd.f32 %v512_v43, %v511_v41  ;;  %v514_v45 = vpop.f32.mrb[2].mxu0 }
  0xf8   :  { %v515_v46 = vpop.f32.mrb[3].mxu0 }
  0xf9   :  { %v223_v47 = vadd.f32 %v513_v44, %v459_v42 }
  0xfb   :  { %v228_v48 = vmax.f32 %v223_v47, 0.0 }
  0xfd   :  { %v229_v49 = vpack.c.bf16 %v228_v48, %v228_v48 }
  0xff   :  { %552 = vmatmul.mubr.bf16.vlgmr.msra.gmra.mrb[0].mxu1 %v229_v49 }
 0x1d2   :  { %v335_v53 = vpop.f32.mrb[0].mxu1 }
 0x1d3   :  { %v336_v54 = vadd.f32 %v477_v52, %v335_v53  ;;  %v553_v55 = vpop.f32.mrb[1].mxu1 }
 0x1d4   :  { %v338_v56 = vpop.f32.mrb[2].mxu1 }
 0x1d5   :  { %v341_v57 = vmax.f32 %v336_v54, 0.0  ;;  %v554_v58 = vpop.f32.mrb[3].mxu1 }
 0x1d7   :  { %v342_v59 = vpack.c.bf16 %v341_v57, %v341_v57 }
 0x1d9   :  { %572 = vmatmul.mubr.bf16.vlgmr.msra.gmra.mrb[4].mxu0 %v342_v59 }
 0x2ac   :  { %v448_v61 = vpop.f32.mrb[4].mxu0 }
 0x2ad   :  { %v449_v62 = vadd.f32 %v486_v60, %v448_v61  ;;  %v573_v63 = vpop.f32.mrb[5].mxu0 }
 0x2ae   :  { %v451_v0 = vpop.f32.mrb[6].mxu0 }
 0x2af   :  { %454 = vst [vmem:[%s789_s7] sm:$0x3] %v449_v62  ;;  %v574_v1 = vpop.f32.mrb[7].mxu0 }

</bundles_post_ra>
